<compile_context>
chip_gen: v7x
topology: tpu7x:2x2x1
jax: 0.10.0
libtpu: 0.0.40
codegen_flags: <defaults>
</compile_context>

<pallas_src>
import jax
import jax.numpy as jnp
from jax.experimental import pallas as pl
from jax.experimental.pallas import tpu as pltpu


def _round_up(v, m):
    return ((v + m - 1) // m) * m


def _default_point_shards():
    """2 shards on v7x (2 TensorCores/chip), else 1. Correct either way."""
    try:
        kind = jax.devices()[0].device_kind.lower()
    except Exception:
        return 1
    return 2 if "7" in kind else 1


def _pointnet_feature_kernel(x_ref, w1_ref, b1_ref, w2_ref, b2_ref, w3_ref,
                             out_ref):
    """One (shard, batch_tile, point_tile) step: per-point MLP + running max."""
    nt = pl.program_id(2)                     # point-tile index (reduction axis)
    tb, tn, _ = x_ref.shape
    feat = out_ref.shape[-1]

    # Fold (batch_tile, point_tile) into the matmul M dimension.
    # tn is a multiple of 16 (bf16 sublane pack), so this reshape is a relabel.
    x = x_ref[...].reshape(tb * tn, 3).astype(jnp.float32)        # (M, 3)

    # Layer 1 (3 -> 64) on the VPU: three broadcast FMAs over (M, 64).
    # (An MXU dot here would use 3/128 of the systolic depth for M/8 pushes.)
    w1 = w1_ref[...]                                              # (3, 64) f32
    h = (x[:, 0:1] * w1[0:1, :]
         + x[:, 1:2] * w1[1:2, :]
         + x[:, 2:3] * w1[2:3, :]
         + b1_ref[...])
    h = jnp.maximum(h, 0.0).astype(w2_ref.dtype)                  # (M, 64) bf16

    # Layer 2 (64 -> 128), MXU, f32 accumulation.
    h = jnp.dot(h, w2_ref[...], preferred_element_type=jnp.float32) + b2_ref[...]
    h = jnp.maximum(h, 0.0).astype(w3_ref.dtype)                  # (M, 128) bf16

    # Layer 3 (128 -> 1024): RAW matmul only. Bias + ReLU commute with the
    # point-axis max and are applied once on the pooled features in the wrapper.
    h = jnp.dot(h, w3_ref[...], preferred_element_type=jnp.float32)  # (M, 1024) f32

    # Per-chunk max over this point tile, then running max across point tiles
    # (output block is resident across the reduction grid axis).
    chunk = jnp.max(h.reshape(tb, tn, feat), axis=1)[None]        # (1, tb, 1024)

    @pl.when(nt == 0)
    def _():
        out_ref[...] = chunk

    @pl.when(nt != 0)
    def _():
        out_ref[...] = jnp.maximum(out_ref[...], chunk)


def pointnet_forward(x, params, *, max_tn=2048, max_rows=2048,
                     point_shards=None, compute_dtype=jnp.bfloat16):
    """Full PointNet forward. x: (B, N, 3) f32 -> (B, 5) f32."""
    B, N, C = x.shape
    assert C == 3
    (w1, b1), (w2, b2), (w3, b3), (w4, b4), (w5, b5), (w6, b6) = params
    feat_dim = w3.shape[1]                    # 1024

    # ---- parallel point shards (v7x dual-TC) -------------------------------
    if point_shards is None:
        point_shards = _default_point_shards()
    point_shards = max(1, min(int(point_shards), max(1, N // 16)))

    # ---- batch tile ---------------------------------------------------------
    # Full-dim tb (legal block) avoids duplicated-batch padding; tb=8 keeps the
    # sublane rule for large multiples of 8.
    if B <= 8:
        tb = B
    elif B % 8 == 0:
        tb = 8
    elif B <= 64:
        tb = B                                # single batch tile, zero padding
    else:
        tb = 8                                # <=7 padded rows, negligible
    b_pad = _round_up(B, tb)

    # ---- point tile (multiple of 16 == bf16 sublane pack) -------------------
    rows_budget = max(16, ((max_rows // tb) // 16) * 16)
    tn_cap = max(16, (min(max_tn, rows_budget) // 16) * 16)
    per_shard = _round_up((N + point_shards - 1) // point_shards, 16)
    tn = min(_round_up(N, 16), tn_cap, per_shard)
    n_pad = _round_up(N, tn * point_shards)
    tiles_per_shard = n_pad // (tn * point_shards)
    m_rows = tb * tn

    # ---- padding: duplicated batch rows are sliced off; duplicated points do
    # not change the max (layer-3 output is per-point identical), so semantics
    # are preserved exactly. ---------------------------------------------------
    xp = x
    if b_pad != B:
        xp = jnp.concatenate(
            [xp, jnp.broadcast_to(xp[:1], (b_pad - B, N, C))], axis=0)
    if n_pad != N:
        xp = jnp.concatenate(
            [xp, jnp.broadcast_to(xp[:, :1], (b_pad, n_pad - N, C))], axis=1)
    xp = xp.astype(compute_dtype)

    # Layer-1 weights: bf16-rounded then f32 (VPU FMAs with exact bf16 products,
    # matching the bf16 MXU reference). Layers 2-3 stay bf16 for the MXU.
    w1f = w1.astype(compute_dtype).astype(jnp.float32)
    b1f = b1.astype(jnp.float32)
    w2c = w2.astype(compute_dtype)
    b2f = b2.astype(jnp.float32)
    w3c = w3.astype(compute_dtype)

    grid = (point_shards, b_pad // tb, tiles_per_shard)

    def wspec(shape):
        return pl.BlockSpec(shape, lambda si, bi, ni: (0, 0))

    # ---- VMEM budget (biggest live tensor is the (M, 1024) f32 layer-3 act) --
    vmem_est = (3 * m_rows * feat_dim * 4            # layer-3 f32 act + transient
                + m_rows * (64 + 128) * 4 * 2        # layer-1/2 activations
                + 2 * tb * tn * 128 * 2              # lane-padded x double buffer
                + (6 << 20))                         # weights / out blocks / slack
    vmem_limit = int(max(32 << 20, min(vmem_est, 48 << 20)))   # <= v7x 64 MiB

    flops = int(2 * b_pad * n_pad * (3 * 64 + 64 * 128 + 128 * feat_dim))
    bytes_accessed = int(xp.size * 2
                         + (w1f.size + b1f.size + b2f.size) * 4
                         + (w2c.size + w3c.size) * 2
                         + point_shards * b_pad * feat_dim * 4)
    cost = pl.CostEstimate(flops=flops, transcendentals=0,
                           bytes_accessed=bytes_accessed)

    feats = pl.pallas_call(
        _pointnet_feature_kernel,
        out_shape=jax.ShapeDtypeStruct((point_shards, b_pad, feat_dim),
                                       jnp.float32),
        grid_spec=pltpu.PrefetchScalarGridSpec(
            num_scalar_prefetch=0,
            grid=grid,
            in_specs=[
                pl.BlockSpec(
                    (tb, tn, C),
                    lambda si, bi, ni: (bi, si * tiles_per_shard + ni, 0)),
                wspec(w1f.shape), wspec(b1f.shape),
                wspec(w2c.shape), wspec(b2f.shape),
                wspec(w3c.shape),
            ],
            out_specs=pl.BlockSpec((1, tb, feat_dim),
                                   lambda si, bi, ni: (si, bi, 0)),
        ),
        compiler_params=pltpu.CompilerParams(
            dimension_semantics=("parallel", "parallel", "arbitrary"),
            vmem_limit_bytes=vmem_limit,
        ),
        cost_estimate=cost,
    )(xp, w1f, b1f, w2c, b2f, w3c)

    # ---- combine shards, apply hoisted layer-3 bias + ReLU, head MLP (XLA) ---
    g = jnp.max(feats, axis=0)[:B]                 # (B, 1024) raw pooled max
    g = jnp.maximum(g + b3, 0.0)                   # exact: max∘(+b)∘relu hoist
    g = g @ w4 + b4
    g = g @ w5 + b5
    g = g @ w6 + b6
    return g


def init_params(key):
    dims = [3, 64, 128, 1024, 512, 256, 5]
    params = []
    for i in range(6):
        key, kw, kb = jax.random.split(key, 3)
        fan_in, fan_out = dims[i], dims[i + 1]
        bound = 1.0 / jnp.sqrt(fan_in)
        # (in, out) layout == transpose of PyTorch nn.Linear weight.
        w = jax.random.uniform(kw, (fan_in, fan_out), jnp.float32, -bound, bound)
        b = jax.random.uniform(kb, (1, fan_out), jnp.float32, -bound, bound)
        params.append((w, b))
    return params


def pointnet_ref(x, params, compute_dtype=jnp.float32):
    """Pure-JAX reference; compute_dtype=bf16 mirrors the kernel's casts
    (per-point layers in bf16 with f32 accumulation, head MLP in f32)."""
    (w1, b1), (w2, b2), (w3, b3), (w4, b4), (w5, b5), (w6, b6) = params

    def dense(a, w, b):
        return jnp.dot(a.astype(compute_dtype), w.astype(compute_dtype),
                       preferred_element_type=jnp.float32) + b

    h = jax.nn.relu(dense(x, w1, b1))
    h = jax.nn.relu(dense(h, w2, b2))
    h = jax.nn.relu(dense(h, w3, b3))
    g = jnp.max(h, axis=1)
    g = g @ w4 + b4
    g = g @ w5 + b5
    g = g @ w6 + b6
    return g


if __name__ == "__main__":
    key = jax.random.PRNGKey(0)
    key, kx1, kx2 = jax.random.split(key, 3)
    params = init_params(key)

    fwd = jax.jit(pointnet_forward,
                  static_argnames=("max_tn", "max_rows", "point_shards"))

    # Config 1: aligned shapes, default tiling / auto point-shards.
    B1, N1 = 4, 128
    x1 = jax.random.normal(kx1, (B1, N1, 3), jnp.float32)
    out1 = jax.block_until_ready(fwd(x1, params))
    assert out1.shape == (B1, 5)
    ref1_matched = pointnet_ref(x1, params, compute_dtype=jnp.bfloat16)
    ref1_f32 = pointnet_ref(x1, params)
    assert jnp.allclose(out1, ref1_matched, atol=2e-3, rtol=2e-3)
    assert jnp.allclose(out1, ref1_f32, atol=2e-2, rtol=2e-2)

    # Config 2: non-aligned B/N, forced small point tiles + 2 point shards
    # (exercises padding, the running-max reduction, and the shard-combine).
    B2, N2 = 3, 100
    x2 = jax.random.normal(kx2, (B2, N2, 3), jnp.float32)
    out2 = jax.block_until_ready(fwd(x2, params, max_tn=32, point_shards=2))
    assert out2.shape == (B2, 5)
    ref2_matched = pointnet_ref(x2, params, compute_dtype=jnp.bfloat16)
    ref2_f32 = pointnet_ref(x2, params)
    assert jnp.allclose(out2, ref2_matched, atol=2e-3, rtol=2e-3)
    assert jnp.allclose(out2, ref2_f32, atol=2e-2, rtol=2e-2)

    print("KERNEL_OK")
</pallas_src>

<mosaic_0001>
module attributes {stable_mosaic.version = 11 : i64} {
  func.func @_pointnet_feature_kernel(%arg0: i32, %arg1: i32, %arg2: i32, %arg3: memref<4x128x3xbf16, #tpu.memory_space<vmem>>, %arg4: memref<3x64xf32, #tpu.memory_space<vmem>>, %arg5: memref<1x64xf32, #tpu.memory_space<vmem>>, %arg6: memref<64x128xbf16, #tpu.memory_space<vmem>>, %arg7: memref<1x128xf32, #tpu.memory_space<vmem>>, %arg8: memref<128x1024xbf16, #tpu.memory_space<vmem>>, %arg9: memref<1x4x1024xf32, #tpu.memory_space<vmem>>) attributes {dimension_semantics = [#tpu.dimension_semantics<parallel>, #tpu.dimension_semantics<parallel>, #tpu.dimension_semantics<arbitrary>], iteration_bounds = array<i64: 1, 1, 1>, scalar_prefetch = 0 : i64, scratch_operands = 0 : i64, tpu.core_type = #tpu.core_type<tc>, window_params = [{transform_indices = @transform_0, window_bounds = array<i64: 4, 128, 3>}, {pipeline_mode = #tpu.pipeline_mode<synchronous>, transform_indices = @transform_1, window_bounds = array<i64: 3, 64>}, {pipeline_mode = #tpu.pipeline_mode<synchronous>, transform_indices = @transform_2, window_bounds = array<i64: 1, 64>}, {pipeline_mode = #tpu.pipeline_mode<synchronous>, transform_indices = @transform_3, window_bounds = array<i64: 64, 128>}, {pipeline_mode = #tpu.pipeline_mode<synchronous>, transform_indices = @transform_4, window_bounds = array<i64: 1, 128>}, {pipeline_mode = #tpu.pipeline_mode<synchronous>, transform_indices = @transform_5, window_bounds = array<i64: 128, 1024>}, {transform_indices = @transform_6, window_bounds = array<i64: 1, 4, 1024>}]} {
    %c0 = arith.constant 0 : index
    %c0_0 = arith.constant 0 : index
    %c0_1 = arith.constant 0 : index
    %0 = vector.load %arg3[%c0, %c0_0, %c0_1] : memref<4x128x3xbf16, #tpu.memory_space<vmem>>, vector<4x128x3xbf16>
    %1 = vector.shape_cast %0 : vector<4x128x3xbf16> to vector<512x3xbf16>
    %2 = arith.extf %1 : vector<512x3xbf16> to vector<512x3xf32>
    %c0_2 = arith.constant 0 : index
    %c0_3 = arith.constant 0 : index
    %3 = vector.load %arg4[%c0_2, %c0_3] : memref<3x64xf32, #tpu.memory_space<vmem>>, vector<3x64xf32>
    %4 = vector.extract_strided_slice %2 {offsets = [0, 0], sizes = [512, 1], strides = [1, 1]} : vector<512x3xf32> to vector<512x1xf32>
    %5 = vector.extract_strided_slice %3 {offsets = [0, 0], sizes = [1, 64], strides = [1, 1]} : vector<3x64xf32> to vector<1x64xf32>
    %6 = vector.broadcast %4 : vector<512x1xf32> to vector<512x64xf32>
    %7 = vector.broadcast %5 : vector<1x64xf32> to vector<512x64xf32>
    %8 = arith.mulf %6, %7 : vector<512x64xf32>
    %9 = vector.extract_strided_slice %2 {offsets = [0, 1], sizes = [512, 1], strides = [1, 1]} : vector<512x3xf32> to vector<512x1xf32>
    %10 = vector.extract_strided_slice %3 {offsets = [1, 0], sizes = [1, 64], strides = [1, 1]} : vector<3x64xf32> to vector<1x64xf32>
    %11 = vector.broadcast %9 : vector<512x1xf32> to vector<512x64xf32>
    %12 = vector.broadcast %10 : vector<1x64xf32> to vector<512x64xf32>
    %13 = arith.mulf %11, %12 : vector<512x64xf32>
    %14 = arith.addf %8, %13 : vector<512x64xf32>
    %15 = vector.extract_strided_slice %2 {offsets = [0, 2], sizes = [512, 1], strides = [1, 1]} : vector<512x3xf32> to vector<512x1xf32>
    %16 = vector.extract_strided_slice %3 {offsets = [2, 0], sizes = [1, 64], strides = [1, 1]} : vector<3x64xf32> to vector<1x64xf32>
    %17 = vector.broadcast %15 : vector<512x1xf32> to vector<512x64xf32>
    %18 = vector.broadcast %16 : vector<1x64xf32> to vector<512x64xf32>
    %19 = arith.mulf %17, %18 : vector<512x64xf32>
    %20 = arith.addf %14, %19 : vector<512x64xf32>
    %c0_4 = arith.constant 0 : index
    %c0_5 = arith.constant 0 : index
    %21 = vector.load %arg5[%c0_4, %c0_5] : memref<1x64xf32, #tpu.memory_space<vmem>>, vector<1x64xf32>
    %22 = vector.broadcast %21 : vector<1x64xf32> to vector<512x64xf32>
    %23 = arith.addf %20, %22 : vector<512x64xf32>
    %cst = arith.constant 0.000000e+00 : f32
    %24 = vector.broadcast %cst : f32 to vector<512x64xf32>
    %25 = arith.maximumf %23, %24 : vector<512x64xf32>
    %26 = arith.truncf %25 : vector<512x64xf32> to vector<512x64xbf16>
    %c0_6 = arith.constant 0 : index
    %c0_7 = arith.constant 0 : index
    %27 = vector.load %arg6[%c0_6, %c0_7] : memref<64x128xbf16, #tpu.memory_space<vmem>>, vector<64x128xbf16>
    %cst_8 = arith.constant dense<0.000000e+00> : vector<512x128xf32>
    %28 = tpu.matmul %26, %27, %cst_8 {dimension_numbers = #tpu.dot_dimension_numbers<[1], [0], [0], [1], [0, 0, 1, 1], [], []>} : vector<512x64xbf16>, vector<64x128xbf16>, vector<512x128xf32> -> vector<512x128xf32>
    %c0_9 = arith.constant 0 : index
    %c0_10 = arith.constant 0 : index
    %29 = vector.load %arg7[%c0_9, %c0_10] : memref<1x128xf32, #tpu.memory_space<vmem>>, vector<1x128xf32>
    %30 = vector.broadcast %29 : vector<1x128xf32> to vector<512x128xf32>
    %31 = arith.addf %28, %30 : vector<512x128xf32>
    %cst_11 = arith.constant 0.000000e+00 : f32
    %32 = vector.broadcast %cst_11 : f32 to vector<512x128xf32>
    %33 = arith.maximumf %31, %32 : vector<512x128xf32>
    %34 = arith.truncf %33 : vector<512x128xf32> to vector<512x128xbf16>
    %c0_12 = arith.constant 0 : index
    %c0_13 = arith.constant 0 : index
    %35 = vector.load %arg8[%c0_12, %c0_13] : memref<128x1024xbf16, #tpu.memory_space<vmem>>, vector<128x1024xbf16>
    %cst_14 = arith.constant dense<0.000000e+00> : vector<512x1024xf32>
    %36 = tpu.matmul %34, %35, %cst_14 {dimension_numbers = #tpu.dot_dimension_numbers<[1], [0], [0], [1], [0, 0, 1, 1], [], []>} : vector<512x128xbf16>, vector<128x1024xbf16>, vector<512x1024xf32> -> vector<512x1024xf32>
    %37 = vector.shape_cast %36 : vector<512x1024xf32> to vector<4x128x1024xf32>
    %cst_15 = arith.constant dense<0xFF800000> : vector<4x1024xf32>
    %38 = vector.multi_reduction <maximumf>, %37, %cst_15 [1] : vector<4x128x1024xf32> to vector<4x1024xf32>
    %39 = vector.shape_cast %38 : vector<4x1024xf32> to vector<1x4x1024xf32>
    %c0_i32 = arith.constant 0 : i32
    %40 = arith.cmpi eq, %arg2, %c0_i32 : i32
    %41 = arith.extui %40 : i1 to i32
    %c0_i32_16 = arith.constant 0 : i32
    %42 = arith.cmpi ne, %41, %c0_i32_16 : i32
    scf.if %42 {
      %c0_19 = arith.constant 0 : index
      %c0_20 = arith.constant 0 : index
      %c0_21 = arith.constant 0 : index
      %46 = vector.load %arg9[%c0_19, %c0_20, %c0_21] : memref<1x4x1024xf32, #tpu.memory_space<vmem>>, vector<1x4x1024xf32>
      tpu.vector_store %arg9[%c0_19, %c0_20, %c0_21], %39 {strides = array<i32>} : memref<1x4x1024xf32, #tpu.memory_space<vmem>>, vector<1x4x1024xf32>,
    } else {
    }
    %c0_i32_17 = arith.constant 0 : i32
    %43 = arith.cmpi ne, %arg2, %c0_i32_17 : i32
    %44 = arith.extui %43 : i1 to i32
    %c0_i32_18 = arith.constant 0 : i32
    %45 = arith.cmpi ne, %44, %c0_i32_18 : i32
    scf.if %45 {
      %c0_19 = arith.constant 0 : index
      %c0_20 = arith.constant 0 : index
      %c0_21 = arith.constant 0 : index
      %46 = vector.load %arg9[%c0_19, %c0_20, %c0_21] : memref<1x4x1024xf32, #tpu.memory_space<vmem>>, vector<1x4x1024xf32>
      %47 = arith.maximumf %46, %39 : vector<1x4x1024xf32>
      %c0_22 = arith.constant 0 : index
      %c0_23 = arith.constant 0 : index
      %c0_24 = arith.constant 0 : index
      %48 = vector.load %arg9[%c0_22, %c0_23, %c0_24] : memref<1x4x1024xf32, #tpu.memory_space<vmem>>, vector<1x4x1024xf32>
      tpu.vector_store %arg9[%c0_22, %c0_23, %c0_24], %47 {strides = array<i32>} : memref<1x4x1024xf32, #tpu.memory_space<vmem>>, vector<1x4x1024xf32>,
    } else {
    }
    return
  }
  func.func @transform_0(%arg0: i32, %arg1: i32, %arg2: i32) -> (i32, i32, i32) {
    %c1_i32 = arith.constant 1 : i32
    %0 = arith.muli %arg0, %c1_i32 : i32
    %1 = arith.addi %0, %arg2 : i32
    %c0_i32 = arith.constant 0 : i32
    %c0_i32_0 = arith.constant 0 : i32
    return %arg1, %1, %c0_i32 : i32, i32, i32
  }
  func.func @transform_1(%arg0: i32, %arg1: i32, %arg2: i32) -> (i32, i32) {
    %c0_i32 = arith.constant 0 : i32
    %c0_i32_0 = arith.constant 0 : i32
    %c0_i32_1 = arith.constant 0 : i32
    return %c0_i32, %c0_i32_0 : i32, i32
  }
  func.func @transform_2(%arg0: i32, %arg1: i32, %arg2: i32) -> (i32, i32) {
    %c0_i32 = arith.constant 0 : i32
    %c0_i32_0 = arith.constant 0 : i32
    %c0_i32_1 = arith.constant 0 : i32
    return %c0_i32, %c0_i32_0 : i32, i32
  }
  func.func @transform_3(%arg0: i32, %arg1: i32, %arg2: i32) -> (i32, i32) {
    %c0_i32 = arith.constant 0 : i32
    %c0_i32_0 = arith.constant 0 : i32
    %c0_i32_1 = arith.constant 0 : i32
    return %c0_i32, %c0_i32_0 : i32, i32
  }
  func.func @transform_4(%arg0: i32, %arg1: i32, %arg2: i32) -> (i32, i32) {
    %c0_i32 = arith.constant 0 : i32
    %c0_i32_0 = arith.constant 0 : i32
    %c0_i32_1 = arith.constant 0 : i32
    return %c0_i32, %c0_i32_0 : i32, i32
  }
  func.func @transform_5(%arg0: i32, %arg1: i32, %arg2: i32) -> (i32, i32) {
    %c0_i32 = arith.constant 0 : i32
    %c0_i32_0 = arith.constant 0 : i32
    %c0_i32_1 = arith.constant 0 : i32
    return %c0_i32, %c0_i32_0 : i32, i32
  }
  func.func @transform_6(%arg0: i32, %arg1: i32, %arg2: i32) -> (i32, i32, i32) {
    %c0_i32 = arith.constant 0 : i32
    %c0_i32_0 = arith.constant 0 : i32
    return %arg0, %arg1, %c0_i32 : i32, i32, i32
  }
}

</mosaic_0001>

<bundles_post_ra>
// kernel: pointnet_forward.1
= control target key start
LH: loop header
LB: loop body
LE: loop exit
PB: predicated region body
PF: predicated region fallthrough
CT: control target
= control target key end

     0   :  { %11 = vsyncpa [#allocation3], 0  ;;  %s7069_s0 = inlined_call_operand.vmem [shape: bf16[4,128,3], index: 0, kind: input, shape index: {}]   ;;  %s7070_s1 = inlined_call_operand.vmem [shape: f32[3,64], index: 1, kind: input, shape index: {}]   ;;  %s7071_s2 = inlined_call_operand.hbm [shape: f32[1,64], index: 2, kind: input, shape index: {}]   ;;  %s7072_s3 = inlined_call_operand.vmem [shape: bf16[64,128], index: 3, kind: input, shape index: {}]   ;;  %s7073_s4 = inlined_call_operand.hbm [shape: f32[1,128], index: 4, kind: input, shape index: {}]   ;;  %s7074_s5 = inlined_call_operand.vmem [shape: bf16[128,1024], index: 5, kind: input, shape index: {}]   ;;  %s7075_s6 = inlined_call_operand.vmem [shape: f32[1,4,1024], index: 6, kind: output, shape index: {}]  }
   0x1   :  { %12 = vsyncpa [#allocation5], 0  ;;  %s5735_s21 = smov [#allocation2]   ;;  %s5736_s23 = smov [#allocation4]  }
   0x2   :  { %s31_s22 = sshll.u32 %s5735_s21, 4  ;;  %s43_s24 = sshll.u32 %s5736_s23, 4  ;;  %s32_s22 = int_to_ptr.vmem [resolvable:$true] %s31_s22  ;;  %s44_s24 = int_to_ptr.vmem [resolvable:$true] %s43_s24 }
   0x3   :  { %s5687_s27 = scalar_lea.hbm %s7071_s2, 16 }
   0x4   :  { %p5688_p0 = scmp.ne.s32.totalorder %s7071_s2, %s5687_s27  ;;  %p5691_p1 = scmp.lt.u32.totalorder %s5687_s27, %s7071_s2 }
   0x6   :  { %p5693_p2 = pnand %p5691_p1, %p5688_p0 }
   0x8   :  { %5696 = shalt.err (!%p5693_p2)
}
   0x9   :  { %s5697_s8 = scalar_lea.vmem %s32_s22, 16  ;;  %s5701_s9 = scalar_lea.vmem %s32_s22, 32 }
   0xa   :  { %p5698_p3 = scmp.ne.s32.totalorder %s32_s22, %s5697_s8  ;;  %p5702_p4 = scmp.lt.s32.totalorder %s32_s22, %s32_s22 }
   0xb   :  { %p5703_p5 = scmp.lt.s32.totalorder %s5701_s9, %s5697_s8 }
   0xd   :  { %p5704_p6 = por %p5703_p5, %p5702_p4 }
   0xf   :  { %p5705_p7 = pnand %p5704_p6, %p5698_p3 }
  0x11   :  { %5708 = shalt.err (!%p5705_p7)
}
  0x12   :  { %34 = dma.hbm_to_vmem [thread:$0]  %s7071_s2, 16, %s32_s22, [#allocation3]  }
  0x13   :  { %s5709_s14 = scalar_lea.hbm %s7073_s4, 16 }
  0x14   :  { %p5710_p8 = scmp.ne.s32.totalorder %s7073_s4, %s5709_s14  ;;  %p5713_p9 = scmp.lt.u32.totalorder %s5709_s14, %s7073_s4 }
  0x16   :  { %p5715_p10 = pnand %p5713_p9, %p5710_p8 }
  0x18   :  { %5718 = shalt.err (!%p5715_p10)
}
  0x19   :  { %s5719_s19 = scalar_lea.vmem %s44_s24, 16  ;;  %s5723_s20 = scalar_lea.vmem %s44_s24, 32 }
  0x1a   :  { %p5720_p11 = scmp.ne.s32.totalorder %s44_s24, %s5719_s19  ;;  %p5724_p12 = scmp.lt.s32.totalorder %s44_s24, %s44_s24 }
  0x1b   :  { %p5725_p13 = scmp.lt.s32.totalorder %s5723_s20, %s5719_s19 }
  0x1d   :  { %p5726_p0 = por %p5725_p13, %p5724_p12 }
  0x1f   :  { %p5727_p1 = pnand %p5726_p0, %p5720_p11 }
  0x21   :  { %5730 = shalt.err (!%p5727_p1)
}
  0x22   :  { %46 = dma.hbm_to_vmem [thread:$0]  %s7073_s4, 16, %s44_s24, [#allocation5]  }
  0x23   :  { %5731 = dma.done.wait [#allocation3], 16  }
  0x24   :  { %5732 = vsyncadd [#allocation3], 4294967280 }
  0x25   :  { %5733 = dma.done.wait [#allocation5], 16  }
  0x26   :  { %5734 = vsyncadd [#allocation5], 4294967280  ;;  %v5737_v0 = vmov 0   ;;  %v4973_v1 = vld [vmem:[%s7069_s0 + $0x8] sm:$0xff]   ;;  %v4846_v2 = vld [vmem:[%s7069_s0] sm:$0xff]   ;;  %v5738_v9 = vmov 1  }
  0x27   :  { %5137 = vset.pattern.permute.xlu1 %v5737_v0  ;;  %5125 = vset.pattern.permute.xlu0 %v5737_v0  ;;  %v4851_v3 = vunpack.c.l.bf16 %v4973_v1  ;;  %v4852_v4 = vunpack.c.h.bf16 %v4973_v1  ;;  %v4847_v5 = vunpack.c.l.bf16 %v4846_v2  ;;  %v4848_v6 = vunpack.c.h.bf16 %v4846_v2  ;;  %v4974_v10 = vld [vmem:[%s7069_s0 + $0x10] sm:$0xff]   ;;  %v4975_v11 = vld [vmem:[%s7069_s0 + $0x18] sm:$0xff]   ;;  %v5680_v12 = vld [vmem:[%s7072_s3] sm:$0xff]  }
  0x28   :  { %v4855_v13 = vunpack.c.l.bf16 %v4974_v10  ;;  %v4856_v14 = vunpack.c.h.bf16 %v4974_v10  ;;  %v4859_v15 = vunpack.c.l.bf16 %v4975_v11  ;;  %v4860_v16 = vunpack.c.h.bf16 %v4975_v11  ;;  %5040 = vmatprep.subr.bf16.mxu0 %v5680_v12  ;;  %5112 = vmatprep.subr.bf16.mxu1 %v5680_v12  ;;  %v5681_v18 = vld [vmem:[%s7072_s3 + $0x8] sm:$0xff]   ;;  %v4987_v21 = vld [vmem:[%s7069_s0 + $0x78] sm:$0xff]   ;;  %v5682_v22 = vld [vmem:[%s7072_s3 + $0x10] sm:$0xff]  }
  0x29   :  { %v5138_v7 = vpack.i.bf16 %v4852_v4, %v4851_v3  ;;  %v5126_v8 = vpack.i.bf16 %v4848_v6, %v4847_v5  ;;  %5041 = vmatpush3.bf16.msra.mxu0 %v5680_v12  ;;  %5116 = vmatpush3.bf16.msra.mxu1 %v5680_v12  ;;  %v5739_v17 = vmov 2   ;;  %v4977_v23 = vld [vmem:[%s7069_s0 + $0x28] sm:$0xff]   ;;  %v4907_v24 = vunpack.c.l.bf16 %v4987_v21  ;;  %v5683_v29 = vld [vmem:[%s7072_s3 + $0x18] sm:$0xff]   ;;  %v4976_v32 = vld [vmem:[%s7069_s0 + $0x20] sm:$0xff]  }
  0x2a   :  { %v5162_v19 = vpack.i.bf16 %v4856_v14, %v4855_v13  ;;  %v5174_v20 = vpack.i.bf16 %v4860_v16, %v4859_v15  ;;  %5042 = vmatprep.subr.bf16.mxu0 %v5681_v18  ;;  %5113 = vmatprep.subr.bf16.mxu1 %v5681_v18  ;;  %v4908_v25 = vunpack.c.h.bf16 %v4987_v21  ;;  %v4867_v27 = vunpack.c.l.bf16 %v4977_v23  ;;  %v4989_v31 = vld [vmem:[%s7069_s0 + $0x88] sm:$0xff]   ;;  %v4979_v33 = vld [vmem:[%s7069_s0 + $0x38] sm:$0xff]   ;;  %v4978_v48 = vld [vmem:[%s7069_s0 + $0x30] sm:$0xff]  }
  0x2b   :  { %5139 = vperm.xlu1 %5137, %v5138_v7   ;;  %5127 = vperm.xlu0 %5125, %v5126_v8   ;;  %v4868_v28 = vunpack.c.h.bf16 %v4977_v23  ;;  %v4915_v34 = vunpack.c.l.bf16 %v4989_v31  ;;  %v4916_v35 = vunpack.c.h.bf16 %v4989_v31  ;;  %v4863_v36 = vunpack.c.l.bf16 %v4976_v32  ;;  %v4981_v43 = vld [vmem:[%s7069_s0 + $0x48] sm:$0xff]   ;;  %v4991_v47 = vld [vmem:[%s7069_s0 + $0x98] sm:$0xff]   ;;  %v4980_v63 = vld [vmem:[%s7069_s0 + $0x40] sm:$0xff]  }
  0x2c   :  { %v5834_v26 = vpack.i.bf16 %v4908_v25, %v4907_v24  ;;  %v4864_v37 = vunpack.c.h.bf16 %v4976_v32  ;;  %v4875_v38 = vunpack.c.l.bf16 %v4979_v33  ;;  %v4876_v39 = vunpack.c.h.bf16 %v4979_v33  ;;  %v4983_v49 = vld [vmem:[%s7069_s0 + $0x58] sm:$0xff]   ;;  %v4985_v59 = vld [vmem:[%s7069_s0 + $0x68] sm:$0xff]   ;;  %v4982_v10 = vld [vmem:[%s7069_s0 + $0x50] sm:$0xff]  }
  0x2d   :  { %5043 = vmatpush3.bf16.msra.mxu0 %v5681_v18  ;;  %5117 = vmatpush3.bf16.msra.mxu1 %v5681_v18  ;;  %v5209_v30 = vpack.i.bf16 %v4868_v28, %v4867_v27  ;;  %v5851_v40 = vpack.i.bf16 %v4916_v35, %v4915_v34  ;;  %v4883_v44 = vunpack.c.l.bf16 %v4981_v43  ;;  %v4884_v45 = vunpack.c.h.bf16 %v4981_v43  ;;  %v4993_v62 = vld [vmem:[%s7069_s0 + $0xa8] sm:$0xff]   ;;  %v4999_v27 = vld [vmem:[%s7069_s0 + $0xd8] sm:$0xff]  }
  0x2e   :  { %5044 = vmatprep.subr.bf16.mxu0 %v5682_v22  ;;  %5114 = vmatprep.subr.bf16.mxu1 %v5682_v22  ;;  %v5197_v41 = vpack.i.bf16 %v4864_v37, %v4863_v36  ;;  %v5244_v42 = vpack.i.bf16 %v4876_v39, %v4875_v38  ;;  %v4923_v50 = vunpack.c.l.bf16 %v4991_v47  ;;  %v4924_v51 = vunpack.c.h.bf16 %v4991_v47  ;;  %v4997_v18 = vld [vmem:[%s7069_s0 + $0xc8] sm:$0xff]   ;;  %v198_v38 = vld [vmem:[%s7070_s1] sm:$0x7] }
  0x2f   :  { %5143 = vset.pattern.permute.xlu1 %v5738_v9  ;;  %5131 = vset.pattern.permute.xlu0 %v5738_v9  ;;  %v5279_v46 = vpack.i.bf16 %v4884_v45, %v4883_v44  ;;  %v4871_v52 = vunpack.c.l.bf16 %v4978_v48  ;;  %v4872_v53 = vunpack.c.h.bf16 %v4978_v48  ;;  %v4891_v55 = vunpack.c.l.bf16 %v4983_v49 }
  0x30   :  { %5145 = vperm.xlu1 %5143, %v5138_v7   ;;  %5133 = vperm.xlu0 %5131, %v5126_v8   ;;  %v5872_v54 = vpack.i.bf16 %v4924_v51, %v4923_v50  ;;  %v4892_v56 = vunpack.c.h.bf16 %v4983_v49  ;;  %v4899_v60 = vunpack.c.l.bf16 %v4985_v59  ;;  %v4900_v61 = vunpack.c.h.bf16 %v4985_v59  ;;  %v5001_v59 = vld [vmem:[%s7069_s0 + $0xe8] sm:$0xff]  }
  0x31   :  { %5045 = vmatpush3.bf16.msra.mxu0 %v5682_v22  ;;  %5118 = vmatpush3.bf16.msra.mxu1 %v5682_v22  ;;  %v5232_v57 = vpack.i.bf16 %v4872_v53, %v4871_v52  ;;  %v4931_v2 = vunpack.c.l.bf16 %v4993_v62  ;;  %v4932_v3 = vunpack.c.h.bf16 %v4993_v62  ;;  %v4879_v4 = vunpack.c.l.bf16 %v4980_v63 }
  0x32   :  { %5046 = vmatprep.subr.bf16.mxu0 %v5683_v29  ;;  %5115 = vmatprep.subr.bf16.mxu1 %v5683_v29  ;;  %v5314_v58 = vpack.i.bf16 %v4892_v56, %v4891_v55  ;;  %v5889_v1 = vpack.i.bf16 %v4900_v61, %v4899_v60  ;;  %v4880_v5 = vunpack.c.h.bf16 %v4980_v63  ;;  %v4887_v13 = vunpack.c.l.bf16 %v4982_v10 }
  0x33   :  { %v5893_v6 = vpack.i.bf16 %v4932_v3, %v4931_v2  ;;  %v4888_v14 = vunpack.c.h.bf16 %v4982_v10  ;;  %v4948_v21 = vunpack.c.h.bf16 %v4997_v18  ;;  %v519_v28 = vlaneseq }
  0x34   :  { %5149 = vset.pattern.permute.xlu1 %v5739_v17  ;;  %5155 = vset.pattern.permute.xlu0 %v5739_v17  ;;  %v4956_v31 = vunpack.c.h.bf16 %v4999_v27  ;;  %v4963_v60 = vunpack.c.l.bf16 %v5001_v59  ;;  %v4964_v61 = vunpack.c.h.bf16 %v5001_v59  ;;  %vm1569_vm0 = vcmask 523264  }
  0x35   :  { %5151 = vperm.xlu1 %5149, %v5126_v8   ;;  %5157 = vperm.xlu0 %5155, %v5138_v7   ;;  %v5267_v7 = vpack.i.bf16 %v4880_v5, %v4879_v4  ;;  %v4995_v8 = vld [vmem:[%s7069_s0 + $0xb8] sm:$0xff]   ;;  %v5302_v16 = vpack.i.bf16 %v4888_v14, %v4887_v13  ;;  %v520_v34 = vshrl.u32 %v519_v28, 7  ;;  %v4988_v4 = vld [vmem:[%s7069_s0 + $0x80] sm:$0xff]   ;;  %vm4572_vm1 = vcmask 1041409  }
  0x36   :  { %5047 = vmatpush3.bf16.msra.mxu0 %v5683_v29  ;;  %5119 = vmatpush3.bf16.msra.mxu1 %v5683_v29  ;;  %v4939_v11 = vunpack.c.l.bf16 %v4995_v8  ;;  %v4940_v12 = vunpack.c.h.bf16 %v4995_v8  ;;  %v4986_v29 = vld [vmem:[%s7069_s0 + $0x70] sm:$0xff]   ;;  %v5983_v5 = vpack.i.bf16 %v4964_v61, %v4963_v60  ;;  %vm4574_vm2 = vcmask 1045509  }
  0x37   :  { %v4903_v32 = vunpack.c.l.bf16 %v4986_v29  ;;  %v4904_v33 = vunpack.c.h.bf16 %v4986_v29  ;;  %v521_v37 = vsub.s32 0, %v520_v34  ;;  %v1233_v47 = vsub.s32 2, %v520_v34 }
  0x38   :  { %v5911_v15 = vpack.i.bf16 %v4940_v12, %v4939_v11  ;;  %vm4577_vm3 = vcmask 1042434   ;;  %vm4579_vm4 = vcmask 1046534   ;;  %vm4582_vm5 = vcmask 1043459  }
  0x39   :  { %5161 = vset.pattern.permute.xlu1 %v5737_v0  ;;  %5173 = vset.pattern.permute.xlu0 %v5737_v0  ;;  %v5952_v36 = vpack.i.bf16 %v4904_v33, %v4903_v32  ;;  %v5960_v45 = vrot.slane %v198_v38, %v521_v37  ;;  %v5977_v3 = vrot.slane %v198_v38, %v1233_v47  ;;  %vm4584_vm6 = vcmask 1047559  }
  0x3a   :  { %5163 = vperm.xlu1 %5161, %v5162_v19   ;;  %5175 = vperm.xlu0 %5173, %v5174_v20  }
  0x3e   :  { %5167 = vset.pattern.permute.xlu1 %v5738_v9  ;;  %5190 = vset.pattern.permute.xlu0 %v5739_v17 }
  0x3f   :  { %5169 = vperm.xlu1 %5167, %v5162_v19   ;;  %5192 = vperm.xlu0 %5190, %v5174_v20  }
  0x43   :  { %5180 = vperm.xlu1 %5167, %v5174_v20   ;;  %5208 = vset.pattern.permute.xlu0 %v5737_v0  ;;  %v4947_v20 = vunpack.c.l.bf16 %v4997_v18 }
  0x44   :  { %5210 = vperm.xlu0 %5208, %v5209_v30  }
  0x45   :  { %v5929_v24 = vpack.i.bf16 %v4948_v21, %v4947_v20 }
  0x47   :  { %5184 = vset.pattern.permute.xlu1 %v5739_v17 }
  0x48   :  { %5186 = vperm.xlu1 %5184, %v5162_v19   ;;  %5225 = vset.pattern.permute.xlu0 %v5739_v17  ;;  %v4984_v19 = vld [vmem:[%s7069_s0 + $0x60] sm:$0xff]  }
  0x49   :  { %5227 = vperm.xlu0 %5225, %v5209_v30   ;;  %v4895_v22 = vunpack.c.l.bf16 %v4984_v19  ;;  %v4896_v23 = vunpack.c.h.bf16 %v4984_v19 }
  0x4b   :  { %v5337_v25 = vpack.i.bf16 %v4896_v23, %v4895_v22  ;;  %v4911_v22 = vunpack.c.l.bf16 %v4988_v4  ;;  %v4912_v23 = vunpack.c.h.bf16 %v4988_v4 }
  0x4c   :  { %5196 = vset.pattern.permute.xlu1 %v5737_v0 }
  0x4d   :  { %5198 = vperm.xlu1 %5196, %v5197_v41   ;;  %5243 = vset.pattern.permute.xlu0 %v5737_v0 }
  0x4e   :  { %5245 = vperm.xlu0 %5243, %v5244_v42  }
  0x51   :  { %5202 = vset.pattern.permute.xlu1 %v5738_v9 }
  0x52   :  { %5204 = vperm.xlu1 %5202, %v5197_v41   ;;  %5260 = vset.pattern.permute.xlu0 %v5739_v17 }
  0x53   :  { %5262 = vperm.xlu0 %5260, %v5244_v42  }
  0x56   :  { %5215 = vperm.xlu1 %5202, %v5209_v30   ;;  %v4955_v30 = vunpack.c.l.bf16 %v4999_v27 }
  0x57   :  { %5278 = vset.pattern.permute.xlu0 %v5737_v0 }
  0x58   :  { %5280 = vperm.xlu0 %5278, %v5279_v46   ;;  %v5948_v35 = vpack.i.bf16 %v4956_v31, %v4955_v30  ;;  %v5993_v30 = vld [vmem:[#allocation2] ss:$0 sm:$0xff] }
  0x5a   :  { %5219 = vset.pattern.permute.xlu1 %v5739_v17 }
  0x5b   :  { %5221 = vperm.xlu1 %5219, %v5197_v41  }
  0x5c   :  { %5295 = vset.pattern.permute.xlu0 %v5739_v17 }
  0x5d   :  { %5297 = vperm.xlu0 %5295, %v5279_v46  }
  0x5f   :  { %5231 = vset.pattern.permute.xlu1 %v5737_v0 }
  0x60   :  { %5233 = vperm.xlu1 %5231, %v5232_v57  }
  0x61   :  { %5313 = vset.pattern.permute.xlu0 %v5737_v0 }
  0x62   :  { %5315 = vperm.xlu0 %5313, %v5314_v58  }
  0x64   :  { %5237 = vset.pattern.permute.xlu1 %v5738_v9 }
  0x65   :  { %5239 = vperm.xlu1 %5237, %v5232_v57  }
  0x66   :  { %5330 = vset.pattern.permute.xlu0 %v5739_v17 }
  0x67   :  { %5332 = vperm.xlu0 %5330, %v5314_v58  }
  0x69   :  { %5250 = vperm.xlu1 %5237, %v5244_v42   ;;  %v845_v42 = vsub.s32 1, %v520_v34 }
  0x6b   :  { %5348 = vset.pattern.permute.xlu0 %v5737_v0 }
  0x6c   :  { %5350 = vperm.xlu0 %5348, %v5889_v1  }
  0x6d   :  { %5254 = vset.pattern.permute.xlu1 %v5739_v17 }
  0x6e   :  { %5256 = vperm.xlu1 %5254, %v5232_v57  }
  0x70   :  { %5365 = vset.pattern.permute.xlu0 %v5739_v17 }
  0x71   :  { %5367 = vperm.xlu0 %5365, %v5889_v1  }
  0x72   :  { %5266 = vset.pattern.permute.xlu1 %v5737_v0 }
  0x73   :  { %5268 = vperm.xlu1 %5266, %v5267_v7  }
  0x75   :  { %5383 = vset.pattern.permute.xlu0 %v5737_v0 }
  0x76   :  { %5385 = vperm.xlu0 %5383, %v5834_v26  }
  0x77   :  { %5272 = vset.pattern.permute.xlu1 %v5738_v9 }
  0x78   :  { %5274 = vperm.xlu1 %5272, %v5267_v7  }
  0x7a   :  { %5400 = vset.pattern.permute.xlu0 %v5739_v17 }
  0x7b   :  { %5402 = vperm.xlu0 %5400, %v5834_v26  }
  0x7c   :  { %5285 = vperm.xlu1 %5272, %v5279_v46   ;;  %v5962_v46 = vrot.slane %v198_v38, %v845_v42  ;;  %v5997_v38 = vpack.i.bf16 %v4912_v23, %v4911_v22 }
  0x7f   :  { %5418 = vset.pattern.permute.xlu0 %v5737_v0 }
  0x80   :  { %5289 = vset.pattern.permute.xlu1 %v5739_v17  ;;  %5420 = vperm.xlu0 %5418, %v5851_v40  }
  0x81   :  { %5291 = vperm.xlu1 %5289, %v5267_v7  }
  0x84   :  { %5435 = vset.pattern.permute.xlu0 %v5739_v17 }
  0x85   :  { %5301 = vset.pattern.permute.xlu1 %v5737_v0  ;;  %5437 = vperm.xlu0 %5435, %v5851_v40  }
  0x86   :  { %5303 = vperm.xlu1 %5301, %v5302_v16  }
  0x89   :  { %5453 = vset.pattern.permute.xlu0 %v5737_v0 }
  0x8a   :  { %5307 = vset.pattern.permute.xlu1 %v5738_v9  ;;  %5455 = vperm.xlu0 %5453, %v5872_v54  }
  0x8b   :  { %5309 = vperm.xlu1 %5307, %v5302_v16  }
  0x8e   :  { %5470 = vset.pattern.permute.xlu0 %v5739_v17 }
  0x8f   :  { %5320 = vperm.xlu1 %5307, %v5314_v58   ;;  %5472 = vperm.xlu0 %5470, %v5872_v54  }
  0x93   :  { %5324 = vset.pattern.permute.xlu1 %v5739_v17  ;;  %5488 = vset.pattern.permute.xlu0 %v5737_v0 }
  0x94   :  { %5326 = vperm.xlu1 %5324, %v5302_v16   ;;  %5490 = vperm.xlu0 %5488, %v5893_v6  }
  0x98   :  { %5336 = vset.pattern.permute.xlu1 %v5737_v0  ;;  %5505 = vset.pattern.permute.xlu0 %v5739_v17 }
  0x99   :  { %5338 = vperm.xlu1 %5336, %v5337_v25   ;;  %5507 = vperm.xlu0 %5505, %v5893_v6  }
  0x9d   :  { %5342 = vset.pattern.permute.xlu1 %v5738_v9  ;;  %5535 = vperm.xlu0 %5505, %v5911_v15  }
  0x9e   :  { %5344 = vperm.xlu1 %5342, %v5337_v25  }
  0xa1   :  { %5539 = vset.pattern.permute.xlu0 %v5737_v0 }
  0xa2   :  { %5355 = vperm.xlu1 %5342, %v5889_v1   ;;  %5541 = vperm.xlu0 %5539, %v5911_v15  }
  0xa6   :  { %5359 = vset.pattern.permute.xlu1 %v5739_v17  ;;  %5558 = vperm.xlu0 %5539, %v5929_v24  }
  0xa7   :  { %5361 = vperm.xlu1 %5359, %v5337_v25  }
  0xaa   :  { %v5140_v39 = vpop.permute.xlu1 %5139  ;;  %v5128_v41 = vpop.permute.xlu0 %5127  ;;  %5586 = vperm.xlu0 %5539, %v5948_v35  }
  0xab   :  { %5371 = vset.pattern.permute.xlu1 %v5737_v0  ;;  %v5130_v43 = vunpack.i.h.bf16 %v5128_v41  ;;  %v5129_v44 = vunpack.i.l.bf16 %v5128_v41  ;;  %v5142_v48 = vunpack.i.h.bf16 %v5140_v39  ;;  %v5141_v49 = vunpack.i.l.bf16 %v5140_v39 }
  0xac   :  { %5373 = vperm.xlu1 %5371, %v5952_v36  }
  0xad   :  { %v524_v50 = vmul.f32 %v5130_v43, %v5960_v45  ;;  %v523_v51 = vmul.f32 %v5129_v44, %v5960_v45  ;;  %v526_v7 = vmul.f32 %v5142_v48, %v5960_v45  ;;  %v525_v8 = vmul.f32 %v5141_v49, %v5960_v45 }
  0xae   :  { %5590 = vset.pattern.permute.xlu0 %v5739_v17 }
  0xaf   :  { %v5146_v52 = vpop.permute.xlu1 %5145  ;;  %v5134_v53 = vpop.permute.xlu0 %5133  ;;  %5592 = vperm.xlu0 %5590, %v5929_v24  }
  0xb0   :  { %v5148_v55 = vunpack.i.h.bf16 %v5146_v52  ;;  %v5147_v56 = vunpack.i.l.bf16 %v5146_v52  ;;  %5377 = vset.pattern.permute.xlu1 %v5738_v9  ;;  %v5136_v57 = vunpack.i.h.bf16 %v5134_v53  ;;  %v5135_v58 = vunpack.i.l.bf16 %v5134_v53 }
  0xb1   :  { %5379 = vperm.xlu1 %5377, %v5952_v36  }
  0xb2   :  { %v850_v62 = vmul.f32 %v5148_v55, %v5962_v46  ;;  %v849_v63 = vmul.f32 %v5147_v56, %v5962_v46  ;;  %v848_v1 = vmul.f32 %v5136_v57, %v5962_v46  ;;  %v847_v2 = vmul.f32 %v5135_v58, %v5962_v46 }
  0xb3   :  { %5608 = vperm.xlu0 %5590, %v5948_v35  }
  0xb4   :  { %v911_v10 = vadd.f32 %v847_v2, %v523_v51  ;;  %v912_v11 = vadd.f32 %v848_v1, %v524_v50  ;;  %v5152_v12 = vpop.permute.xlu1 %5151  ;;  %v5158_v13 = vpop.permute.xlu0 %5157  ;;  %v913_v20 = vadd.f32 %v849_v63, %v525_v8  ;;  %v914_v21 = vadd.f32 %v850_v62, %v526_v7 }
  0xb5   :  { %v5154_v14 = vunpack.i.h.bf16 %v5152_v12  ;;  %v5153_v16 = vunpack.i.l.bf16 %v5152_v12  ;;  %v5160_v18 = vunpack.i.h.bf16 %v5158_v13  ;;  %v5159_v19 = vunpack.i.l.bf16 %v5158_v13  ;;  %5390 = vperm.xlu1 %5377, %v5834_v26  }
  0xb7   :  { %v1236_v25 = vmul.f32 %v5154_v14, %v5977_v3  ;;  %v1235_v27 = vmul.f32 %v5153_v16, %v5977_v3  ;;  %v1238_v28 = vmul.f32 %v5160_v18, %v5977_v3  ;;  %v1237_v29 = vmul.f32 %v5159_v19, %v5977_v3  ;;  %5636 = vperm.xlu0 %5590, %v5983_v5   ;;  %v4990_v19 = vld [vmem:[%s7069_s0 + $0x90] sm:$0xff]  }
  0xb9   :  { %v1302_v31 = vadd.f32 %v1238_v28, %v914_v21  ;;  %v1301_v32 = vadd.f32 %v1237_v29, %v913_v20  ;;  %5394 = vset.pattern.permute.xlu1 %v5739_v17  ;;  %v5164_v26 = vpop.permute.xlu1 %5163  ;;  %v5176_v33 = vpop.permute.xlu0 %5175  ;;  %v1299_v34 = vadd.f32 %v1235_v27, %v911_v10  ;;  %v1300_v37 = vadd.f32 %v1236_v25, %v912_v11  ;;  %v5003_v10 = vld [vmem:[%s7069_s0 + $0xf8] sm:$0xff]  }
  0xba   :  { %5396 = vperm.xlu1 %5394, %v5952_v36   ;;  %v5178_v51 = vunpack.i.h.bf16 %v5176_v33  ;;  %v5177_v52 = vunpack.i.l.bf16 %v5176_v33  ;;  %v5166_v2 = vunpack.i.h.bf16 %v5164_v26  ;;  %v5165_v4 = vunpack.i.l.bf16 %v5164_v26 }
  0xbb   :  { %v1373_v39 = vadd.f32 %v5993_v30, %v1302_v31  ;;  %v1372_v41 = vadd.f32 %v5993_v30, %v1301_v32  ;;  %v1370_v42 = vadd.f32 %v5993_v30, %v1299_v34  ;;  %v1371_v43 = vadd.f32 %v5993_v30, %v1300_v37  ;;  %5640 = vset.pattern.permute.xlu0 %v5737_v0 }
  0xbc   :  { %5642 = vperm.xlu0 %5640, %v5983_v5   ;;  %v530_v61 = vmul.f32 %v5178_v51, %v5960_v45  ;;  %v529_v62 = vmul.f32 %v5177_v52, %v5960_v45  ;;  %v4971_v13 = vunpack.c.l.bf16 %v5003_v10  ;;  %v4972_v14 = vunpack.c.h.bf16 %v5003_v10 }
  0xbd   :  { %v1437_v44 = vmax.f32 %v1373_v39, 0.0  ;;  %v1436_v47 = vmax.f32 %v1372_v41, 0.0  ;;  %v1434_v48 = vmax.f32 %v1370_v42, 0.0  ;;  %v1435_v49 = vmax.f32 %v1371_v43, 0.0 }
  0xbe   :  { %5406 = vset.pattern.permute.xlu1 %v5737_v0  ;;  %v5170_v36 = vpop.permute.xlu1 %5169  ;;  %v5193_v50 = vpop.permute.xlu0 %5192  ;;  %v6025_v23 = vpack.i.bf16 %v4972_v14, %v4971_v13  ;;  %v528_v25 = vmul.f32 %v5166_v2, %v5960_v45  ;;  %v527_v27 = vmul.f32 %v5165_v4, %v5960_v45  ;;  %v4919_v26 = vunpack.c.l.bf16 %v4990_v19 }
  0xbf   :  { %5408 = vperm.xlu1 %5406, %v5997_v38   ;;  %v1498_v53 = vpack.c.bf16 %v1435_v49, %v1434_v48  ;;  %v1499_v55 = vpack.c.bf16 %v1437_v44, %v1436_v47  ;;  %v5195_v56 = vunpack.i.h.bf16 %v5193_v50  ;;  %v5194_v57 = vunpack.i.l.bf16 %v5193_v50 }
  0xc0   :  { %v5172_v58 = vunpack.i.h.bf16 %v5170_v36  ;;  %v5171_v59 = vunpack.i.l.bf16 %v5170_v36  ;;  %v4920_v33 = vunpack.c.h.bf16 %v4990_v19  ;;  %5659 = vperm.xlu0 %5640, %v6025_v23  }
  0xc1   :  { %5048 = vmatprep.mubr.msk.bf16.mxu0 %vm1569_vm0, %v1498_v53  ;;  %v1242_v7 = vmul.f32 %v5195_v56, %v5977_v3  ;;  %v1241_v8 = vmul.f32 %v5194_v57, %v5977_v3 }
  0xc2   :  { %v5181_v60 = vpop.permute.xlu1 %5180  ;;  %5049 = vmatmul.mubr.msk.bf16.vlgmr.msra.gmra.mrb[0].mxu0 %vm1569_vm0, %v1499_v55  ;;  %v852_v16 = vmul.f32 %v5172_v58, %v5962_v46  ;;  %v851_v18 = vmul.f32 %v5171_v59, %v5962_v46  ;;  %v5442_v50 = vpack.i.bf16 %v4920_v33, %v4919_v26 }
  0xc3   :  { %v5183_v63 = vunpack.i.h.bf16 %v5181_v60  ;;  %v5182_v1 = vunpack.i.l.bf16 %v5181_v60  ;;  %5412 = vset.pattern.permute.xlu1 %v5738_v9  ;;  %v5211_v44 = vpop.permute.xlu0 %5210 }
  0xc4   :  { %5414 = vperm.xlu1 %5412, %v5997_v38   ;;  %v915_v34 = vadd.f32 %v851_v18, %v527_v27  ;;  %v916_v37 = vadd.f32 %v852_v16, %v528_v25  ;;  %5674 = vset.pattern.permute.xlu0 %v5739_v17  ;;  %v5213_v58 = vunpack.i.h.bf16 %v5211_v44 }
  0xc5   :  { %v854_v11 = vmul.f32 %v5183_v63, %v5962_v46  ;;  %v853_v12 = vmul.f32 %v5182_v1, %v5962_v46  ;;  %5676 = vperm.xlu0 %5674, %v6025_v23  }
  0xc6   :  { %v534_v4 = vmul.f32 %v5213_v58, %v5960_v45 }
  0xc7   :  { %v917_v20 = vadd.f32 %v853_v12, %v529_v62  ;;  %v918_v21 = vadd.f32 %v854_v11, %v530_v61  ;;  %v5187_v22 = vpop.permute.xlu1 %5186 }
  0xc8   :  { %v5189_v28 = vunpack.i.h.bf16 %v5187_v22  ;;  %v5188_v29 = vunpack.i.l.bf16 %v5187_v22  ;;  %5425 = vperm.xlu1 %5412, %v5851_v40   ;;  %v5228_v57 = vpop.permute.xlu0 %5227 }
  0xc9   :  { %v1305_v31 = vadd.f32 %v1241_v8, %v917_v20  ;;  %v1306_v32 = vadd.f32 %v1242_v7, %v918_v21  ;;  %v5230_v61 = vunpack.i.h.bf16 %v5228_v57  ;;  %v5229_v62 = vunpack.i.l.bf16 %v5228_v57  ;;  %v4992_v21 = vld [vmem:[%s7069_s0 + $0xa0] sm:$0xff]  }
  0xca   :  { %v1240_v39 = vmul.f32 %v5189_v28, %v5977_v3  ;;  %v1239_v41 = vmul.f32 %v5188_v29, %v5977_v3 }
  0xcb   :  { %v1376_v42 = vadd.f32 %v5993_v30, %v1305_v31  ;;  %v1377_v43 = vadd.f32 %v5993_v30, %v1306_v32  ;;  %v1246_v16 = vmul.f32 %v5230_v61, %v5977_v3  ;;  %v1245_v18 = vmul.f32 %v5229_v62, %v5977_v3 }
  0xcc   :  { %v1303_v47 = vadd.f32 %v1239_v41, %v915_v34  ;;  %v1304_v48 = vadd.f32 %v1240_v39, %v916_v37  ;;  %5429 = vset.pattern.permute.xlu1 %v5739_v17  ;;  %v5199_v40 = vpop.permute.xlu1 %5198  ;;  %v4927_v34 = vunpack.c.l.bf16 %v4992_v21  ;;  %v4928_v37 = vunpack.c.h.bf16 %v4992_v21 }
  0xcd   :  { %5431 = vperm.xlu1 %5429, %v5997_v38   ;;  %v1440_v51 = vmax.f32 %v1376_v42, 0.0  ;;  %v1441_v52 = vmax.f32 %v1377_v43, 0.0  ;;  %v5212_v38 = vunpack.i.l.bf16 %v5211_v44  ;;  %v5201_v11 = vunpack.i.h.bf16 %v5199_v40 }
  0xce   :  { %v1374_v49 = vadd.f32 %v5993_v30, %v1303_v47  ;;  %v1375_v36 = vadd.f32 %v5993_v30, %v1304_v48  ;;  %v5200_v12 = vunpack.i.l.bf16 %v5199_v40  ;;  %v5246_v48 = vpop.permute.xlu0 %5245 }
  0xcf   :  { %v1501_v60 = vpack.c.bf16 %v1441_v52, %v1440_v51  ;;  %v533_v7 = vmul.f32 %v5212_v38, %v5960_v45  ;;  %v532_v28 = vmul.f32 %v5201_v11, %v5960_v45  ;;  %v5477_v52 = vpack.i.bf16 %v4928_v37, %v4927_v34 }
  0xd0   :  { %v1438_v53 = vmax.f32 %v1374_v49, 0.0  ;;  %v1439_v55 = vmax.f32 %v1375_v36, 0.0  ;;  %v531_v29 = vmul.f32 %v5200_v12, %v5960_v45 }
  0xd1   :  { %5441 = vset.pattern.permute.xlu1 %v5737_v0  ;;  %v5205_v56 = vpop.permute.xlu1 %5204 }
  0xd2   :  { %5443 = vperm.xlu1 %5441, %v5442_v50   ;;  %v1500_v59 = vpack.c.bf16 %v1439_v55, %v1438_v53  ;;  %v5207_v63 = vunpack.i.h.bf16 %v5205_v56  ;;  %v5206_v1 = vunpack.i.l.bf16 %v5205_v56  ;;  %v5263_v38 = vpop.permute.xlu0 %5262 }
  0xd4   :  { %5052 = vmatprep.mubr.msk.bf16.mxu0 %vm1569_vm0, %v1500_v59  ;;  %v856_v19 = vmul.f32 %v5207_v63, %v5962_v46  ;;  %v855_v20 = vmul.f32 %v5206_v1, %v5962_v46  ;;  %v5248_v59 = vunpack.i.h.bf16 %v5246_v48  ;;  %v5264_v63 = vunpack.i.l.bf16 %v5263_v38 }
  0xd5   :  { %v5216_v2 = vpop.permute.xlu1 %5215  ;;  %5053 = vmatmul.mubr.msk.bf16.gmra.mrb[4].mxu0 %vm1569_vm0, %v1501_v60  ;;  %v5247_v60 = vunpack.i.l.bf16 %v5246_v48 }
  0xd6   :  { %v5218_v8 = vunpack.i.h.bf16 %v5216_v2  ;;  %v5217_v10 = vunpack.i.l.bf16 %v5216_v2  ;;  %5447 = vset.pattern.permute.xlu1 %v5738_v9  ;;  %v919_v39 = vadd.f32 %v855_v20, %v531_v29  ;;  %v920_v41 = vadd.f32 %v856_v19, %v532_v28 }
  0xd7   :  { %5449 = vperm.xlu1 %5447, %v5442_v50   ;;  %v1249_v19 = vmul.f32 %v5264_v63, %v5977_v3 }
  0xd8   :  { %v858_v13 = vmul.f32 %v5218_v8, %v5962_v46  ;;  %v857_v14 = vmul.f32 %v5217_v10, %v5962_v46  ;;  %v537_v8 = vmul.f32 %v5247_v60, %v5960_v45 }
  0xda   :  { %v921_v22 = vadd.f32 %v857_v14, %v533_v7  ;;  %v922_v25 = vadd.f32 %v858_v13, %v534_v4  ;;  %v5222_v27 = vpop.permute.xlu1 %5221  ;;  %v538_v7 = vmul.f32 %v5248_v59, %v5960_v45 }
  0xdb   :  { %v5224_v31 = vunpack.i.h.bf16 %v5222_v27  ;;  %v5223_v32 = vunpack.i.l.bf16 %v5222_v27  ;;  %5460 = vperm.xlu1 %5447, %v5872_v54  }
  0xdc   :  { %v1309_v26 = vadd.f32 %v1245_v18, %v921_v22  ;;  %v1310_v33 = vadd.f32 %v1246_v16, %v922_v25  ;;  %v4994_v22 = vld [vmem:[%s7069_s0 + $0xb0] sm:$0xff]  }
  0xdd   :  { %v1244_v42 = vmul.f32 %v5224_v31, %v5977_v3  ;;  %v1243_v43 = vmul.f32 %v5223_v32, %v5977_v3  ;;  %v4935_v37 = vunpack.c.l.bf16 %v4994_v22 }
  0xde   :  { %v1380_v44 = vadd.f32 %v5993_v30, %v1309_v26  ;;  %v1381_v47 = vadd.f32 %v5993_v30, %v1310_v33 }
  0xdf   :  { %v1307_v40 = vadd.f32 %v1243_v43, %v919_v39  ;;  %v1308_v49 = vadd.f32 %v1244_v42, %v920_v41  ;;  %5464 = vset.pattern.permute.xlu1 %v5739_v17  ;;  %v5234_v54 = vpop.permute.xlu1 %5233  ;;  %v4936_v39 = vunpack.c.h.bf16 %v4994_v22 }
  0xe0   :  { %5466 = vperm.xlu1 %5464, %v5442_v50   ;;  %v1444_v53 = vmax.f32 %v1380_v44, 0.0  ;;  %v1445_v55 = vmax.f32 %v1381_v47, 0.0  ;;  %v5265_v50 = vunpack.i.h.bf16 %v5263_v38  ;;  %v5236_v12 = vunpack.i.h.bf16 %v5234_v54  ;;  %v5281_v47 = vpop.permute.xlu0 %5280 }
  0xe1   :  { %v1378_v36 = vadd.f32 %v5993_v30, %v1307_v40  ;;  %v1379_v51 = vadd.f32 %v5993_v30, %v1308_v49  ;;  %v5235_v13 = vunpack.i.l.bf16 %v5234_v54  ;;  %v5283_v60 = vunpack.i.h.bf16 %v5281_v47 }
  0xe2   :  { %v1503_v62 = vpack.c.bf16 %v1445_v55, %v1444_v53  ;;  %v1250_v18 = vmul.f32 %v5265_v50, %v5977_v3  ;;  %v536_v29 = vmul.f32 %v5236_v12, %v5960_v45  ;;  %v6091_v53 = vpack.i.bf16 %v4936_v39, %v4935_v37  ;;  %v2060_v37 = vld [vmem:[%s7074_s5 + $0x48] sm:$0xff] }
  0xe3   :  { %v1442_v56 = vmax.f32 %v1378_v36, 0.0  ;;  %v1443_v57 = vmax.f32 %v1379_v51, 0.0  ;;  %v535_v31 = vmul.f32 %v5235_v13, %v5960_v45  ;;  %v2052_v13 = vld [vmem:[%s7074_s5 + $0x8] sm:$0xff] }
  0xe4   :  { %5476 = vset.pattern.permute.xlu1 %v5737_v0  ;;  %v5240_v58 = vpop.permute.xlu1 %5239  ;;  %v5298_v38 = vpop.permute.xlu0 %5297  ;;  %v2064_v39 = vld [vmem:[%s7074_s5 + $0x68] sm:$0xff] }
  0xe5   :  { %5478 = vperm.xlu1 %5476, %v5477_v52   ;;  %v1502_v61 = vpack.c.bf16 %v1443_v57, %v1442_v56  ;;  %v5242_v1 = vunpack.i.h.bf16 %v5240_v58  ;;  %v5241_v2 = vunpack.i.l.bf16 %v5240_v58  ;;  %v5300_v50 = vunpack.i.h.bf16 %v5298_v38 }
  0xe6   :  { %v5299_v63 = vunpack.i.l.bf16 %v5298_v38 }
  0xe7   :  { %5056 = vmatprep.mubr.msk.bf16.mxu0 %vm1569_vm0, %v1502_v61  ;;  %v860_v20 = vmul.f32 %v5242_v1, %v5962_v46  ;;  %v859_v21 = vmul.f32 %v5241_v2, %v5962_v46  ;;  %v5282_v61 = vunpack.i.l.bf16 %v5281_v47 }
  0xe8   :  { %v5251_v4 = vpop.permute.xlu1 %5250  ;;  %5057 = vmatmul.mubr.msk.bf16.gmra.mrb[8].mxu0 %vm1569_vm0, %v1503_v62 }
  0xe9   :  { %v5253_v10 = vunpack.i.h.bf16 %v5251_v4  ;;  %v5252_v11 = vunpack.i.l.bf16 %v5251_v4  ;;  %5482 = vset.pattern.permute.xlu1 %v5738_v9  ;;  %v923_v41 = vadd.f32 %v859_v21, %v535_v31  ;;  %v924_v42 = vadd.f32 %v860_v20, %v536_v29  ;;  %v4996_v20 = vld [vmem:[%s7069_s0 + $0xc0] sm:$0xff]  }
  0xea   :  { %5484 = vperm.xlu1 %5482, %v5477_v52   ;;  %v542_v4 = vmul.f32 %v5283_v60, %v5960_v45  ;;  %v2072_v60 = vld [vmem:[%s7074_s5 + $0xa8] sm:$0xff] }
  0xeb   :  { %v862_v14 = vmul.f32 %v5253_v10, %v5962_v46  ;;  %v861_v16 = vmul.f32 %v5252_v11, %v5962_v46  ;;  %v541_v10 = vmul.f32 %v5282_v61, %v5960_v45 }
  0xed   :  { %v925_v25 = vadd.f32 %v861_v16, %v537_v8  ;;  %v926_v27 = vadd.f32 %v862_v14, %v538_v7  ;;  %v5257_v28 = vpop.permute.xlu1 %5256  ;;  %v2056_v14 = vld [vmem:[%s7074_s5 + $0x28] sm:$0xff] }
  0xee   :  { %v5259_v32 = vunpack.i.h.bf16 %v5257_v28  ;;  %v5258_v26 = vunpack.i.l.bf16 %v5257_v28  ;;  %5495 = vperm.xlu1 %5482, %v5893_v6   ;;  %v4784_v21 = vcombine.high %v2052_v13, %v2056_v14  ;;  %v4783_v28 = vcombine.low %v2052_v13, %v2056_v14 }
  0xef   :  { %v1313_v33 = vadd.f32 %v1249_v19, %v925_v25  ;;  %v1314_v34 = vadd.f32 %v1250_v18, %v926_v27  ;;  %v1254_v18 = vmul.f32 %v5300_v50, %v5977_v3  ;;  %v1253_v19 = vmul.f32 %v5299_v63, %v5977_v3 }
  0xf0   :  { %v1248_v43 = vmul.f32 %v5259_v32, %v5977_v3  ;;  %v1247_v44 = vmul.f32 %v5258_v26, %v5977_v3  ;;  %2788 = vmatprep.subr.bf16.mxu0 %v4784_v21  ;;  %v2084_v21 = vld [vmem:[%s7074_s5 + $0x108] sm:$0xff] }
  0xf1   :  { %v1384_v48 = vadd.f32 %v5993_v30, %v1313_v33  ;;  %v1385_v40 = vadd.f32 %v5993_v30, %v1314_v34  ;;  %v4943_v34 = vunpack.c.l.bf16 %v4996_v20  ;;  %2789 = vmatpush1.bf16.msra.mxu0 %v4783_v28 }
  0xf2   :  { %v1311_v49 = vadd.f32 %v1247_v44, %v923_v41  ;;  %v1312_v54 = vadd.f32 %v1248_v43, %v924_v42  ;;  %5499 = vset.pattern.permute.xlu1 %v5739_v17  ;;  %v5269_v6 = vpop.permute.xlu1 %5268  ;;  %v4792_v44 = vcombine.high %v2060_v37, %v2064_v39 }
  0xf3   :  { %5501 = vperm.xlu1 %5499, %v5477_v52   ;;  %v1448_v55 = vmax.f32 %v1384_v48, 0.0  ;;  %v1449_v56 = vmax.f32 %v1385_v40, 0.0  ;;  %v5270_v8 = vunpack.i.l.bf16 %v5269_v6  ;;  %v5271_v16 = vunpack.i.h.bf16 %v5269_v6 }
  0xf4   :  { %v1382_v36 = vadd.f32 %v5993_v30, %v1311_v49  ;;  %v1383_v51 = vadd.f32 %v5993_v30, %v1312_v54  ;;  %v4944_v49 = vunpack.c.h.bf16 %v4996_v20  ;;  %2790 = vmatprep.subr.bf16.mxu0 %v4792_v44  ;;  %v2092_v44 = vld [vmem:[%s7074_s5 + $0x148] sm:$0xff] }
  0xf5   :  { %v1505_v52 = vpack.c.bf16 %v1449_v56, %v1448_v55  ;;  %v539_v31 = vmul.f32 %v5270_v8, %v5960_v45  ;;  %v540_v41 = vmul.f32 %v5271_v16, %v5960_v45  ;;  %v4791_v55 = vcombine.low %v2060_v37, %v2064_v39 }
  0xf6   :  { %v1446_v57 = vmax.f32 %v1382_v36, 0.0  ;;  %v1447_v58 = vmax.f32 %v1383_v51, 0.0  ;;  %v5316_v51 = vpop.permute.xlu0 %5315 }
  0xf7   :  { %5511 = vset.pattern.permute.xlu1 %v5737_v0  ;;  %v5275_v59 = vpop.permute.xlu1 %5274  ;;  %2791 = vmatpush1.bf16.msra.mxu0 %v4791_v55  ;;  %v5318_v13 = vunpack.i.h.bf16 %v5316_v51  ;;  %v5317_v14 = vunpack.i.l.bf16 %v5316_v51 }
  0xf8   :  { %5513 = vperm.xlu1 %5511, %v6091_v53   ;;  %v1504_v62 = vpack.c.bf16 %v1447_v58, %v1446_v57  ;;  %v5276_v1 = vunpack.i.l.bf16 %v5275_v59  ;;  %v5277_v2 = vunpack.i.h.bf16 %v5275_v59  ;;  %v2068_v59 = vld [vmem:[%s7074_s5 + $0x88] sm:$0xff] }
  0xfa   :  { %5060 = vmatprep.mubr.msk.bf16.mxu0 %vm1569_vm0, %v1504_v62  ;;  %v863_v22 = vmul.f32 %v5276_v1, %v5962_v46  ;;  %v864_v29 = vmul.f32 %v5277_v2, %v5962_v46  ;;  %v4799_v1 = vcombine.low %v2068_v59, %v2072_v60  ;;  %v2076_v2 = vld [vmem:[%s7074_s5 + $0xc8] sm:$0xff] }
  0xfb   :  { %v5286_v7 = vpop.permute.xlu1 %5285  ;;  %5061 = vmatmul.mubr.msk.bf16.gmra.mrb[12].mxu0 %vm1569_vm0, %v1505_v52  ;;  %v6141_v52 = vpack.i.bf16 %v4944_v49, %v4943_v34 }
  0xfc   :  { %v5288_v11 = vunpack.i.h.bf16 %v5286_v7  ;;  %v5287_v12 = vunpack.i.l.bf16 %v5286_v7  ;;  %5517 = vset.pattern.permute.xlu1 %v5738_v9  ;;  %v927_v47 = vadd.f32 %v863_v22, %v539_v31  ;;  %v928_v54 = vadd.f32 %v864_v29, %v540_v41  ;;  %v2088_v22 = vld [vmem:[%s7074_s5 + $0x128] sm:$0xff] }
  0xfd   :  { %5519 = vperm.xlu1 %5517, %v6091_v53   ;;  %v546_v31 = vmul.f32 %v5318_v13, %v5960_v45 }
  0xfe   :  { %v866_v25 = vmul.f32 %v5288_v11, %v5962_v46  ;;  %v865_v27 = vmul.f32 %v5287_v12, %v5962_v46 }
 0x100   :  { %v929_v32 = vadd.f32 %v865_v27, %v541_v10  ;;  %v930_v26 = vadd.f32 %v866_v25, %v542_v4  ;;  %v5292_v33 = vpop.permute.xlu1 %5291  ;;  %v2080_v4 = vld [vmem:[%s7074_s5 + $0xe8] sm:$0xff]  ;;  %v4800_v10 = vcombine.high %v2068_v59, %v2072_v60  ;;  %v4816_v27 = vcombine.high %v2084_v21, %v2088_v22 }
 0x101   :  { %v5294_v42 = vunpack.i.h.bf16 %v5292_v33  ;;  %v5293_v43 = vunpack.i.l.bf16 %v5292_v33  ;;  %5524 = vperm.xlu1 %5517, %v5911_v15   ;;  %v4808_v11 = vcombine.high %v2076_v2, %v2080_v4  ;;  %v4807_v20 = vcombine.low %v2076_v2, %v2080_v4 }
 0x102   :  { %v1317_v48 = vadd.f32 %v1253_v19, %v929_v32  ;;  %v1318_v40 = vadd.f32 %v1254_v18, %v930_v26  ;;  %2792 = vmatprep.subr.bf16.mxu0 %v4800_v10  ;;  %v545_v33 = vmul.f32 %v5317_v14, %v5960_v45 }
 0x103   :  { %v1252_v6 = vmul.f32 %v5294_v42, %v5977_v3  ;;  %v1251_v36 = vmul.f32 %v5293_v43, %v5977_v3  ;;  %2793 = vmatpush1.bf16.msra.mxu0 %v4799_v1  ;;  %v4998_v42 = vld [vmem:[%s7069_s0 + $0xd0] sm:$0xff]   ;;  %v4815_v43 = vcombine.low %v2084_v21, %v2088_v22 }
 0x104   :  { %v1388_v56 = vadd.f32 %v5993_v30, %v1317_v48  ;;  %v1389_v57 = vadd.f32 %v5993_v30, %v1318_v40  ;;  %2794 = vmatprep.subr.bf16.mxu0 %v4808_v11  ;;  %v4952_v1 = vunpack.c.h.bf16 %v4998_v42 }
 0x105   :  { %v1315_v58 = vadd.f32 %v1251_v36, %v927_v47  ;;  %v1316_v38 = vadd.f32 %v1252_v6, %v928_v54  ;;  %5528 = vset.pattern.permute.xlu1 %v5739_v17  ;;  %v6130_v15 = vpop.permute.xlu1 %5303  ;;  %v2096_v47 = vld [vmem:[%s7074_s5 + $0x168] sm:$0xff] }
 0x106   :  { %5530 = vperm.xlu1 %5528, %v6091_v53   ;;  %v1452_v50 = vmax.f32 %v1388_v56, 0.0  ;;  %v1453_v63 = vmax.f32 %v1389_v57, 0.0  ;;  %v5333_v53 = vpop.permute.xlu0 %5332  ;;  %v5306_v26 = vunpack.i.h.bf16 %v6130_v15  ;;  %v5305_v39 = vunpack.i.l.bf16 %v6130_v15 }
 0x107   :  { %v1386_v61 = vadd.f32 %v5993_v30, %v1315_v58  ;;  %v1387_v62 = vadd.f32 %v5993_v30, %v1316_v38  ;;  %v5335_v19 = vunpack.i.h.bf16 %v5333_v53  ;;  %v5334_v25 = vunpack.i.l.bf16 %v5333_v53  ;;  %2795 = vmatpush1.bf16.msra.mxu0 %v4807_v20 }
 0x108   :  { %v1507_v18 = vpack.c.bf16 %v1453_v63, %v1452_v50  ;;  %2796 = vmatprep.subr.bf16.mxu0 %v4816_v27  ;;  %v4824_v54 = vcombine.high %v2092_v44, %v2096_v47  ;;  %v544_v51 = vmul.f32 %v5306_v26, %v5960_v45  ;;  %v4951_v58 = vunpack.c.l.bf16 %v4998_v42 }
 0x109   :  { %v1450_v7 = vmax.f32 %v1386_v61, 0.0  ;;  %v1451_v8 = vmax.f32 %v1387_v62, 0.0  ;;  %v1258_v41 = vmul.f32 %v5335_v19, %v5977_v3  ;;  %v1257_v49 = vmul.f32 %v5334_v25, %v5977_v3  ;;  %v2100_v61 = vld [vmem:[%s7074_s5 + $0x188] sm:$0xff] }
 0x10a   :  { %5545 = vset.pattern.permute.xlu1 %v5737_v0  ;;  %v5310_v12 = vpop.permute.xlu1 %5309  ;;  %v543_v38 = vmul.f32 %v5305_v39, %v5960_v45  ;;  %v4823_v60 = vcombine.low %v2092_v44, %v2096_v47  ;;  %v2104_v62 = vld [vmem:[%s7074_s5 + $0x1a8] sm:$0xff]  ;;  %v5351_v53 = vpop.permute.xlu0 %5350  ;;  %v6203_v22 = vpack.i.bf16 %v4952_v1, %v4951_v58 }
 0x10b   :  { %5547 = vperm.xlu1 %5545, %v6141_v52   ;;  %v1506_v16 = vpack.c.bf16 %v1451_v8, %v1450_v7  ;;  %v5312_v28 = vunpack.i.h.bf16 %v5310_v12  ;;  %v5311_v29 = vunpack.i.l.bf16 %v5310_v12  ;;  %2797 = vmatpush1.bf16.msra.mxu0 %v4815_v43  ;;  %v4832_v2 = vcombine.high %v2100_v61, %v2104_v62  ;;  %v2112_v19 = vld [vmem:[%s7074_s5 + $0x1e8] sm:$0xff] }
 0x10c   :  { %2798 = vmatprep.subr.bf16.mxu0 %v4824_v54  ;;  %v5353_v26 = vunpack.i.h.bf16 %v5351_v53 }
 0x10d   :  { %5064 = vmatprep.mubr.msk.bf16.mxu0 %vm1569_vm0, %v1506_v16  ;;  %v868_v6 = vmul.f32 %v5312_v28, %v5962_v46  ;;  %v867_v36 = vmul.f32 %v5311_v29, %v5962_v46  ;;  %v4831_v16 = vcombine.low %v2100_v61, %v2104_v62 }
 0x10e   :  { %v5321_v32 = vpop.permute.xlu1 %5320  ;;  %5065 = vmatmul.mubr.msk.bf16.gmra.mrb[16].mxu0 %vm1569_vm0, %v1507_v18  ;;  %v2108_v18 = vld [vmem:[%s7074_s5 + $0x1c8] sm:$0xff]  ;;  %v550_v47 = vmul.f32 %v5353_v26, %v5960_v45 }
 0x10f   :  { %v5323_v34 = vunpack.i.h.bf16 %v5321_v32  ;;  %v5322_v37 = vunpack.i.l.bf16 %v5321_v32  ;;  %5551 = vset.pattern.permute.xlu1 %v5738_v9  ;;  %v931_v4 = vadd.f32 %v867_v36, %v543_v38  ;;  %v932_v7 = vadd.f32 %v868_v6, %v544_v51  ;;  %2799 = vmatpush1.bf16.msra.mxu0 %v4823_v60  ;;  %v5000_v38 = vld [vmem:[%s7069_s0 + $0xe0] sm:$0xff]  }
 0x110   :  { %5553 = vperm.xlu1 %5551, %v6141_v52   ;;  %2800 = vmatprep.subr.bf16.mxu0 %v4832_v2  ;;  %v4959_v2 = vunpack.c.l.bf16 %v5000_v38 }
 0x111   :  { %v870_v48 = vmul.f32 %v5323_v34, %v5962_v46  ;;  %v869_v40 = vmul.f32 %v5322_v37, %v5962_v46  ;;  %v5352_v34 = vunpack.i.l.bf16 %v5351_v53 }
 0x113   :  { %v933_v55 = vadd.f32 %v869_v40, %v545_v33  ;;  %v934_v56 = vadd.f32 %v870_v48, %v546_v31  ;;  %v5327_v57 = vpop.permute.xlu1 %5326  ;;  %2801 = vmatpush1.bf16.msra.mxu0 %v4831_v16  ;;  %v4839_v31 = vcombine.low %v2108_v18, %v2112_v19  ;;  %v4840_v33 = vcombine.high %v2108_v18, %v2112_v19 }
 0x114   :  { %v5329_v15 = vunpack.i.h.bf16 %v5327_v57  ;;  %v5328_v59 = vunpack.i.l.bf16 %v5327_v57  ;;  %5563 = vperm.xlu1 %5551, %v5929_v24  }
 0x115   :  { %v1321_v50 = vadd.f32 %v1257_v49, %v933_v55  ;;  %v1322_v63 = vadd.f32 %v1258_v41, %v934_v56  ;;  %2802 = vmatprep.subr.bf16.mxu0 %v4840_v33  ;;  %v549_v49 = vmul.f32 %v5352_v34, %v5960_v45 }
 0x116   :  { %v1256_v8 = vmul.f32 %v5329_v15, %v5977_v3  ;;  %v1255_v24 = vmul.f32 %v5328_v59, %v5977_v3 }
 0x117   :  { %v1392_v10 = vadd.f32 %v5993_v30, %v1321_v50  ;;  %v1393_v11 = vadd.f32 %v5993_v30, %v1322_v63  ;;  %2803 = vmatpush1.bf16.msra.mxu0 %v4839_v31 }
 0x118   :  { %v1319_v12 = vadd.f32 %v1255_v24, %v931_v4  ;;  %v1320_v13 = vadd.f32 %v1256_v8, %v932_v7  ;;  %5567 = vset.pattern.permute.xlu1 %v5739_v17  ;;  %v5339_v14 = vpop.permute.xlu1 %5338  ;;  %v6228_v4 = vld [vmem:[%s7074_s5] sm:$0xff] }
 0x119   :  { %5569 = vperm.xlu1 %5567, %v6141_v52   ;;  %v1456_v25 = vmax.f32 %v1392_v10, 0.0  ;;  %v1457_v27 = vmax.f32 %v1393_v11, 0.0  ;;  %v5368_v52 = vpop.permute.xlu0 %5367  ;;  %v5340_v40 = vunpack.i.l.bf16 %v5339_v14  ;;  %v5341_v36 = vunpack.i.h.bf16 %v5339_v14  ;;  %v6233_v7 = vld [vmem:[%s7074_s5 + $0x20] sm:$0xff] }
 0x11a   :  { %v1390_v20 = vadd.f32 %v5993_v30, %v1319_v12  ;;  %v1391_v21 = vadd.f32 %v5993_v30, %v1320_v13  ;;  %v5370_v41 = vunpack.i.h.bf16 %v5368_v52  ;;  %v5369_v43 = vunpack.i.l.bf16 %v5368_v52 }
 0x11b   :  { %v1509_v39 = vpack.c.bf16 %v1457_v27, %v1456_v25  ;;  %v547_v59 = vmul.f32 %v5340_v40, %v5960_v45  ;;  %v548_v50 = vmul.f32 %v5341_v36, %v5960_v45  ;;  %v4960_v10 = vunpack.c.h.bf16 %v5000_v38 }
 0x11c   :  { %v1454_v28 = vmax.f32 %v1390_v20, 0.0  ;;  %v1455_v29 = vmax.f32 %v1391_v21, 0.0  ;;  %v1262_v51 = vmul.f32 %v5370_v41, %v5977_v3  ;;  %v1261_v58 = vmul.f32 %v5369_v43, %v5977_v3 }
 0x11d   :  { %5573 = vset.pattern.permute.xlu1 %v5737_v0  ;;  %v5345_v32 = vpop.permute.xlu1 %5344  ;;  %v4782_v13 = vcombine.high %v6228_v4, %v6233_v7  ;;  %v5386_v18 = vpop.permute.xlu0 %5385 }
 0x11e   :  { %5575 = vperm.xlu1 %5573, %v6203_v22   ;;  %v1508_v37 = vpack.c.bf16 %v1455_v29, %v1454_v28  ;;  %v5346_v42 = vunpack.i.l.bf16 %v5345_v32  ;;  %v5347_v44 = vunpack.i.h.bf16 %v5345_v32  ;;  %v5613_v28 = vpack.i.bf16 %v4960_v10, %v4959_v2 }
 0x11f   :  { %2435 = vmatprep.subr.bf16.mxu1 %v4782_v13  ;;  %v5388_v34 = vunpack.i.h.bf16 %v5386_v18 }
 0x120   :  { %5068 = vmatprep.mubr.msk.bf16.mxu0 %vm1569_vm0, %v1508_v37  ;;  %v871_v55 = vmul.f32 %v5346_v42, %v5962_v46  ;;  %v872_v15 = vmul.f32 %v5347_v44, %v5962_v46  ;;  %v5387_v37 = vunpack.i.l.bf16 %v5386_v18 }
 0x121   :  { %v5356_v48 = vpop.permute.xlu1 %5355  ;;  %5069 = vmatmul.mubr.msk.bf16.gmra.mrb[20].mxu0 %vm1569_vm0, %v1509_v39  ;;  %v5403_v33 = vpop.permute.xlu0 %5402 }
 0x122   :  { %v5358_v54 = vunpack.i.h.bf16 %v5356_v48  ;;  %v5357_v6 = vunpack.i.l.bf16 %v5356_v48  ;;  %5579 = vset.pattern.permute.xlu1 %v5738_v9  ;;  %v935_v8 = vadd.f32 %v871_v55, %v547_v59  ;;  %v936_v11 = vadd.f32 %v872_v15, %v548_v50  ;;  %v5002_v15 = vld [vmem:[%s7069_s0 + $0xf0] sm:$0xff]  }
 0x123   :  { %5581 = vperm.xlu1 %5579, %v6203_v22   ;;  %v5404_v42 = vunpack.i.l.bf16 %v5403_v33  ;;  %v554_v48 = vmul.f32 %v5388_v34, %v5960_v45  ;;  %v553_v40 = vmul.f32 %v5387_v37, %v5960_v45 }
 0x124   :  { %v874_v56 = vmul.f32 %v5358_v54, %v5962_v46  ;;  %v873_v57 = vmul.f32 %v5357_v6, %v5962_v46 }
 0x126   :  { %v937_v60 = vadd.f32 %v873_v57, %v549_v49  ;;  %v938_v61 = vadd.f32 %v874_v56, %v550_v47  ;;  %v5362_v62 = vpop.permute.xlu1 %5361  ;;  %v1265_v57 = vmul.f32 %v5404_v42, %v5977_v3 }
 0x127   :  { %v5364_v63 = vunpack.i.h.bf16 %v5362_v62  ;;  %v5363_v1 = vunpack.i.l.bf16 %v5362_v62  ;;  %5597 = vperm.xlu1 %5579, %v5948_v35  }
 0x128   :  { %v1325_v24 = vadd.f32 %v1261_v58, %v937_v60  ;;  %v1326_v53 = vadd.f32 %v1262_v51, %v938_v61 }
 0x129   :  { %v1260_v12 = vmul.f32 %v5364_v63, %v5977_v3  ;;  %v1259_v35 = vmul.f32 %v5363_v1, %v5977_v3 }
 0x12a   :  { %v1396_v14 = vadd.f32 %v5993_v30, %v1325_v24  ;;  %v1397_v16 = vadd.f32 %v5993_v30, %v1326_v53  ;;  %v4967_v24 = vunpack.c.l.bf16 %v5002_v15  ;;  %v4968_v53 = vunpack.c.h.bf16 %v5002_v15 }
 0x12b   :  { %v1323_v19 = vadd.f32 %v1259_v35, %v935_v8  ;;  %v1324_v20 = vadd.f32 %v1260_v12, %v936_v11  ;;  %5601 = vset.pattern.permute.xlu1 %v5739_v17  ;;  %v5374_v21 = vpop.permute.xlu1 %5373 }
 0x12c   :  { %5603 = vperm.xlu1 %5601, %v6203_v22   ;;  %v1460_v29 = vmax.f32 %v1396_v14, 0.0  ;;  %v1461_v52 = vmax.f32 %v1397_v16, 0.0  ;;  %v5405_v22 = vunpack.i.h.bf16 %v5403_v33  ;;  %v5376_v6 = vunpack.i.h.bf16 %v5374_v21  ;;  %v5421_v16 = vpop.permute.xlu0 %5420 }
 0x12d   :  { %v1394_v25 = vadd.f32 %v5993_v30, %v1323_v19  ;;  %v1395_v27 = vadd.f32 %v5993_v30, %v1324_v20  ;;  %v5375_v36 = vunpack.i.l.bf16 %v5374_v21  ;;  %v6268_v20 = vld [vmem:[#allocation2] ss:$0 sm:$0xff]  ;;  %v5423_v33 = vunpack.i.h.bf16 %v5421_v16 }
 0x12e   :  { %v1511_v41 = vpack.c.bf16 %v1461_v52, %v1460_v29  ;;  %v1266_v56 = vmul.f32 %v5405_v22, %v5977_v3  ;;  %v552_v62 = vmul.f32 %v5376_v6, %v5960_v45  ;;  %v5422_v34 = vunpack.i.l.bf16 %v5421_v16 }
 0x12f   :  { %v1458_v31 = vmax.f32 %v1394_v25, 0.0  ;;  %v1459_v32 = vmax.f32 %v1395_v27, 0.0  ;;  %v551_v50 = vmul.f32 %v5375_v36, %v5960_v45  ;;  %v5647_v27 = vpack.i.bf16 %v4968_v53, %v4967_v24 }
 0x130   :  { %5612 = vset.pattern.permute.xlu1 %v5737_v0  ;;  %v5380_v26 = vpop.permute.xlu1 %5379 }
 0x131   :  { %5614 = vperm.xlu1 %5612, %v5613_v28   ;;  %v1510_v39 = vpack.c.bf16 %v1459_v32, %v1458_v31  ;;  %v5382_v43 = vunpack.i.h.bf16 %v5380_v26  ;;  %v5381_v44 = vunpack.i.l.bf16 %v5380_v26  ;;  %v5438_v26 = vpop.permute.xlu0 %5437 }
 0x133   :  { %5072 = vmatprep.mubr.msk.bf16.mxu0 %vm1569_vm0, %v1510_v39  ;;  %v876_v58 = vmul.f32 %v5382_v43, %v5962_v46  ;;  %v875_v38 = vmul.f32 %v5381_v44, %v5962_v46  ;;  %v5440_v39 = vunpack.i.h.bf16 %v5438_v26  ;;  %v558_v44 = vmul.f32 %v5423_v33, %v5960_v45 }
 0x134   :  { %v5391_v47 = vpop.permute.xlu1 %5390  ;;  %5073 = vmatmul.mubr.msk.bf16.gmra.mrb[24].mxu0 %vm1569_vm0, %v1511_v41  ;;  %v5439_v41 = vunpack.i.l.bf16 %v5438_v26 }
 0x135   :  { %v5393_v49 = vunpack.i.h.bf16 %v5391_v47  ;;  %v5392_v54 = vunpack.i.l.bf16 %v5391_v47  ;;  %5618 = vset.pattern.permute.xlu1 %v5738_v9  ;;  %v939_v10 = vadd.f32 %v875_v38, %v551_v50  ;;  %v940_v11 = vadd.f32 %v876_v58, %v552_v62 }
 0x136   :  { %5620 = vperm.xlu1 %5618, %v5613_v28   ;;  %v557_v47 = vmul.f32 %v5422_v34, %v5960_v45  ;;  %v2067_v34 = vld [vmem:[%s7074_s5 + $0x80] sm:$0xff] }
 0x137   :  { %v878_v51 = vmul.f32 %v5393_v49, %v5962_v46  ;;  %v877_v55 = vmul.f32 %v5392_v54, %v5962_v46 }
 0x139   :  { %v941_v59 = vadd.f32 %v877_v55, %v553_v40  ;;  %v942_v60 = vadd.f32 %v878_v51, %v554_v48  ;;  %v5397_v61 = vpop.permute.xlu1 %5396  ;;  %v1270_v51 = vmul.f32 %v5440_v39, %v5977_v3  ;;  %v1269_v55 = vmul.f32 %v5439_v41, %v5977_v3 }
 0x13a   :  { %v5399_v63 = vunpack.i.h.bf16 %v5397_v61  ;;  %v5398_v1 = vunpack.i.l.bf16 %v5397_v61  ;;  %5625 = vperm.xlu1 %5618, %v5983_v5  }
 0x13b   :  { %v1329_v2 = vadd.f32 %v1265_v57, %v941_v59  ;;  %v1330_v8 = vadd.f32 %v1266_v56, %v942_v60 }
 0x13c   :  { %v1264_v12 = vmul.f32 %v5399_v63, %v5977_v3  ;;  %v1263_v35 = vmul.f32 %v5398_v1, %v5977_v3 }
 0x13d   :  { %v1400_v13 = vadd.f32 %v5993_v30, %v1329_v2  ;;  %v1401_v14 = vadd.f32 %v5993_v30, %v1330_v8 }
 0x13e   :  { %v1327_v18 = vadd.f32 %v1263_v35, %v939_v10  ;;  %v1328_v19 = vadd.f32 %v1264_v12, %v940_v11  ;;  %5629 = vset.pattern.permute.xlu1 %v5739_v17  ;;  %v5409_v5 = vpop.permute.xlu1 %5408  ;;  %v5456_v10 = vpop.permute.xlu0 %5455 }
 0x13f   :  { %5631 = vperm.xlu1 %5629, %v5613_v28   ;;  %v1464_v29 = vmax.f32 %v1400_v13, 0.0  ;;  %v1465_v52 = vmax.f32 %v1401_v14, 0.0  ;;  %v5411_v49 = vunpack.i.h.bf16 %v5409_v5  ;;  %v5410_v54 = vunpack.i.l.bf16 %v5409_v5  ;;  %v2059_v5 = vld [vmem:[%s7074_s5 + $0x40] sm:$0xff] }
 0x140   :  { %v1398_v21 = vadd.f32 %v6268_v20, %v1327_v18  ;;  %v1399_v25 = vadd.f32 %v6268_v20, %v1328_v19 }
 0x141   :  { %v1513_v28 = vpack.c.bf16 %v1465_v52, %v1464_v29  ;;  %v556_v15 = vmul.f32 %v5411_v49, %v5960_v45  ;;  %v555_v59 = vmul.f32 %v5410_v54, %v5960_v45  ;;  %v2079_v49 = vld [vmem:[%s7074_s5 + $0xe0] sm:$0xff] }
 0x142   :  { %v1462_v31 = vmax.f32 %v1398_v21, 0.0  ;;  %v1463_v32 = vmax.f32 %v1399_v25, 0.0  ;;  %v2063_v21 = vld [vmem:[%s7074_s5 + $0x60] sm:$0xff]  ;;  %v5473_v29 = vpop.permute.xlu0 %5472 }
 0x143   :  { %5646 = vset.pattern.permute.xlu1 %v5737_v0  ;;  %v5415_v30 = vpop.permute.xlu1 %5414  ;;  %v5475_v26 = vunpack.i.h.bf16 %v5473_v29  ;;  %v5474_v33 = vunpack.i.l.bf16 %v5473_v29 }
 0x144   :  { %5648 = vperm.xlu1 %5646, %v5647_v27   ;;  %v1512_v37 = vpack.c.bf16 %v1463_v32, %v1462_v31  ;;  %v5417_v22 = vunpack.i.h.bf16 %v5415_v30  ;;  %v5416_v42 = vunpack.i.l.bf16 %v5415_v30  ;;  %v4781_v31 = vcombine.low %v6228_v4, %v6233_v7 }
 0x145   :  { %v4790_v30 = vcombine.high %v2059_v5, %v2063_v21 }
 0x146   :  { %5076 = vmatprep.mubr.msk.bf16.mxu0 %vm1569_vm0, %v1512_v37  ;;  %v880_v56 = vmul.f32 %v5417_v22, %v5962_v46  ;;  %v879_v57 = vmul.f32 %v5416_v42, %v5962_v46  ;;  %v2071_v37 = vld [vmem:[%s7074_s5 + $0xa0] sm:$0xff] }
 0x147   :  { %v5426_v43 = vpop.permute.xlu1 %5425  ;;  %5077 = vmatmul.mubr.msk.bf16.gmra.mrb[28].mxu0 %vm1569_vm0, %v1513_v28 }
 0x148   :  { %v5428_v48 = vunpack.i.h.bf16 %v5426_v43  ;;  %v5427_v40 = vunpack.i.l.bf16 %v5426_v43  ;;  %5652 = vset.pattern.permute.xlu1 %v5738_v9  ;;  %2820 = vmatprep.mubr.bf16.mxu0 %v5737_v0  ;;  %v943_v63 = vadd.f32 %v879_v57, %v555_v59  ;;  %v944_v1 = vadd.f32 %v880_v56, %v556_v15 }
 0x149   :  { %5654 = vperm.xlu1 %5652, %v5647_v27   ;;  %v4789_v43 = vcombine.low %v2059_v5, %v2063_v21  ;;  %v2095_v5 = vld [vmem:[%s7074_s5 + $0x160] sm:$0xff] }
 0x14a   :  { %v882_v6 = vmul.f32 %v5428_v48, %v5962_v46  ;;  %v881_v36 = vmul.f32 %v5427_v40, %v5962_v46  ;;  %v4798_v48 = vcombine.high %v2067_v34, %v2071_v37  ;;  %v2075_v40 = vld [vmem:[%s7074_s5 + $0xc0] sm:$0xff] }
 0x14b   :  { %v4806_v15 = vcombine.high %v2075_v40, %v2079_v49 }
 0x14c   :  { %v945_v58 = vadd.f32 %v881_v36, %v557_v47  ;;  %v946_v38 = vadd.f32 %v882_v6, %v558_v44  ;;  %v5432_v9 = vpop.permute.xlu1 %5431  ;;  %v1274_v36 = vmul.f32 %v5475_v26, %v5977_v3  ;;  %v2099_v26 = vld [vmem:[%s7074_s5 + $0x180] sm:$0xff] }
 0x14d   :  { %v5434_v60 = vunpack.i.h.bf16 %v5432_v9  ;;  %v5433_v61 = vunpack.i.l.bf16 %v5432_v9  ;;  %5664 = vperm.xlu1 %5652, %v6025_v23   ;;  %v4797_v9 = vcombine.low %v2067_v34, %v2071_v37  ;;  %v6356_v37 = vld [vmem:[%s7074_s5 + $0x10] sm:$0xff] }
 0x14e   :  { %v1333_v62 = vadd.f32 %v1269_v55, %v945_v58  ;;  %v1334_v50 = vadd.f32 %v1270_v51, %v946_v38  ;;  %v1273_v51 = vmul.f32 %v5474_v33, %v5977_v3  ;;  %v2103_v33 = vld [vmem:[%s7074_s5 + $0x1a0] sm:$0xff] }
 0x14f   :  { %v1268_v2 = vmul.f32 %v5434_v60, %v5977_v3  ;;  %v1267_v8 = vmul.f32 %v5433_v61, %v5977_v3 }
 0x150   :  { %v1404_v24 = vadd.f32 %v6268_v20, %v1333_v62  ;;  %v1405_v53 = vadd.f32 %v6268_v20, %v1334_v50 }
 0x151   :  { %v1331_v11 = vadd.f32 %v1267_v8, %v943_v63  ;;  %v1332_v12 = vadd.f32 %v1268_v2, %v944_v1  ;;  %5668 = vset.pattern.permute.xlu1 %v5739_v17  ;;  %v5444_v35 = vpop.permute.xlu1 %5443  ;;  %v5458_v17 = vunpack.i.h.bf16 %v5456_v10  ;;  %v2083_v1 = vld [vmem:[%s7074_s5 + $0x100] sm:$0xff] }
 0x152   :  { %5670 = vperm.xlu1 %5668, %v5647_v27   ;;  %v1468_v14 = vmax.f32 %v1404_v24, 0.0  ;;  %v1469_v16 = vmax.f32 %v1405_v53, 0.0  ;;  %v5457_v27 = vunpack.i.l.bf16 %v5456_v10  ;;  %v5446_v44 = vunpack.i.h.bf16 %v5444_v35  ;;  %v2087_v2 = vld [vmem:[%s7074_s5 + $0x120] sm:$0xff] }
 0x153   :  { %v1402_v23 = vadd.f32 %v6268_v20, %v1331_v11  ;;  %v1403_v13 = vadd.f32 %v6268_v20, %v1332_v12  ;;  %v562_v41 = vmul.f32 %v5458_v17, %v5960_v45  ;;  %v5445_v47 = vunpack.i.l.bf16 %v5444_v35  ;;  %v5491_v11 = vpop.permute.xlu0 %5490 }
 0x154   :  { %v1515_v32 = vpack.c.bf16 %v1469_v16, %v1468_v14  ;;  %v561_v4 = vmul.f32 %v5457_v27, %v5960_v45  ;;  %v560_v59 = vmul.f32 %v5446_v44, %v5960_v45  ;;  %v4813_v27 = vcombine.low %v2083_v1, %v2087_v2 }
 0x155   :  { %v1466_v18 = vmax.f32 %v1402_v23, 0.0  ;;  %v1467_v19 = vmax.f32 %v1403_v13, 0.0  ;;  %v559_v60 = vmul.f32 %v5445_v47, %v5960_v45  ;;  %v4805_v23 = vcombine.low %v2075_v40, %v2079_v49 }
 0x156   :  { %v5450_v25 = vpop.permute.xlu1 %5449  ;;  %v4830_v49 = vcombine.high %v2099_v26, %v2103_v33 }
 0x157   :  { %v1514_v52 = vpack.c.bf16 %v1467_v19, %v1466_v18  ;;  %v5452_v28 = vunpack.i.h.bf16 %v5450_v25  ;;  %v5451_v39 = vunpack.i.l.bf16 %v5450_v25  ;;  %v4814_v18 = vcombine.high %v2083_v1, %v2087_v2  ;;  %v2091_v19 = vld [vmem:[%s7074_s5 + $0x140] sm:$0xff] }
 0x158   :  { %v4821_v47 = vcombine.low %v2091_v19, %v2095_v5 }
 0x159   :  { %5080 = vmatprep.mubr.msk.bf16.mxu1 %vm1569_vm0, %v1514_v52  ;;  %v884_v55 = vmul.f32 %v5452_v28, %v5962_v46  ;;  %v883_v56 = vmul.f32 %v5451_v39, %v5962_v46  ;;  %v6361_v28 = vld [vmem:[%s7074_s5 + $0x30] sm:$0xff]  ;;  %v6366_v39 = vld [vmem:[%s7074_s5 + $0x18] sm:$0xff] }
 0x15a   :  { %v5461_v22 = vpop.permute.xlu1 %5460  ;;  %5081 = vmatmul.mubr.msk.bf16.vlgmr.msra.gmra.mrb[0].mxu1 %vm1569_vm0, %v1515_v32  ;;  %v5508_v32 = vpop.permute.xlu0 %5507 }
 0x15b   :  { %v5463_v7 = vunpack.i.h.bf16 %v5461_v22  ;;  %v5462_v42 = vunpack.i.l.bf16 %v5461_v22  ;;  %2436 = vmatpush1.bf16.msra.mxu1 %v4781_v31  ;;  %v947_v8 = vadd.f32 %v883_v56, %v559_v60  ;;  %v948_v24 = vadd.f32 %v884_v55, %v560_v59  ;;  %v2111_v55 = vld [vmem:[%s7074_s5 + $0x1e0] sm:$0xff] }
 0x15c   :  { %2437 = vmatprep.subr.bf16.mxu1 %v4790_v30  ;;  %v4822_v30 = vcombine.high %v2091_v19, %v2095_v5  ;;  %v5492_v22 = vunpack.i.l.bf16 %v5491_v11  ;;  %v5510_v44 = vunpack.i.h.bf16 %v5508_v32  ;;  %v5509_v40 = vunpack.i.l.bf16 %v5508_v32 }
 0x15d   :  { %v886_v54 = vmul.f32 %v5463_v7, %v5962_v46  ;;  %v885_v6 = vmul.f32 %v5462_v42, %v5962_v46  ;;  %v4785_v7 = vcombine.low %v6356_v37, %v6361_v28  ;;  %v6373_v42 = vld [vmem:[%s7074_s5 + $0x38] sm:$0xff]  ;;  %v4829_v60 = vcombine.low %v2099_v26, %v2103_v33 }
 0x15e   :  { %v1278_v59 = vmul.f32 %v5510_v44, %v5977_v3 }
 0x15f   :  { %v949_v57 = vadd.f32 %v885_v6, %v561_v4  ;;  %v950_v58 = vadd.f32 %v886_v54, %v562_v41  ;;  %v5467_v38 = vpop.permute.xlu1 %5466  ;;  %2438 = vmatpush1.bf16.msra.mxu1 %v4789_v43  ;;  %v5493_v41 = vunpack.i.h.bf16 %v5491_v11 }
 0x160   :  { %v5469_v61 = vunpack.i.h.bf16 %v5467_v38  ;;  %v5468_v62 = vunpack.i.l.bf16 %v5467_v38  ;;  %2439 = vmatprep.subr.bf16.mxu1 %v4798_v48  ;;  %v4788_v48 = vcombine.high %v6366_v39, %v6373_v42 }
 0x161   :  { %v1337_v50 = vadd.f32 %v1273_v51, %v949_v57  ;;  %v1338_v63 = vadd.f32 %v1274_v36, %v950_v58  ;;  %v2107_v51 = vld [vmem:[%s7074_s5 + $0x1c0] sm:$0xff]  ;;  %v566_v56 = vmul.f32 %v5493_v41, %v5960_v45  ;;  %v565_v57 = vmul.f32 %v5492_v22, %v5960_v45 }
 0x162   :  { %v1272_v53 = vmul.f32 %v5469_v61, %v5977_v3  ;;  %v1271_v10 = vmul.f32 %v5468_v62, %v5977_v3  ;;  %3494 = vmatprep.subr.bf16.mxu0 %v4788_v48 }
 0x163   :  { %v1408_v12 = vadd.f32 %v6268_v20, %v1337_v50  ;;  %v1409_v35 = vadd.f32 %v6268_v20, %v1338_v63  ;;  %2440 = vmatpush1.bf16.msra.mxu1 %v4797_v9  ;;  %v1277_v50 = vmul.f32 %v5509_v40, %v5977_v3  ;;  %v4838_v63 = vcombine.high %v2107_v51, %v2111_v55 }
 0x164   :  { %v1335_v13 = vadd.f32 %v1271_v10, %v947_v8  ;;  %v1336_v14 = vadd.f32 %v1272_v53, %v948_v24  ;;  %v6337_v16 = vpop.permute.xlu1 %5478  ;;  %2441 = vmatprep.subr.bf16.mxu1 %v4806_v15  ;;  %v4837_v10 = vcombine.low %v2107_v51, %v2111_v55 }
 0x165   :  { %v1472_v17 = vmax.f32 %v1408_v12, 0.0  ;;  %v1473_v29 = vmax.f32 %v1409_v35, 0.0  ;;  %v5481_v9 = vunpack.i.h.bf16 %v6337_v16  ;;  %v5480_v15 = vunpack.i.l.bf16 %v6337_v16  ;;  %v5536_v16 = vpop.permute.xlu0 %5535 }
 0x166   :  { %v1406_v21 = vadd.f32 %v6268_v20, %v1335_v13  ;;  %v1407_v25 = vadd.f32 %v6268_v20, %v1336_v14  ;;  %v5538_v40 = vunpack.i.h.bf16 %v5536_v16 }
 0x167   :  { %2442 = vmatpush1.bf16.msra.mxu1 %v4805_v23  ;;  %v1517_v43 = vpack.c.bf16 %v1473_v29, %v1472_v17  ;;  %v564_v11 = vmul.f32 %v5481_v9, %v5960_v45  ;;  %v563_v12 = vmul.f32 %v5480_v15, %v5960_v45 }
 0x168   :  { %v1470_v52 = vmax.f32 %v1406_v21, 0.0  ;;  %v1471_v31 = vmax.f32 %v1407_v25, 0.0  ;;  %2443 = vmatprep.subr.bf16.mxu1 %v4814_v18  ;;  %v4786_v18 = vcombine.high %v6356_v37, %v6361_v28  ;;  %v1282_v15 = vmul.f32 %v5538_v40, %v5977_v3  ;;  %v2081_v37 = vld [vmem:[%s7074_s5 + $0xf0] sm:$0xff]  ;;  %v2090_v28 = vld [vmem:[%s7074_s5 + $0x138] sm:$0xff] }
 0x169   :  { %v5485_v34 = vpop.permute.xlu1 %5484 }
 0x16a   :  { %v1516_v4 = vpack.c.bf16 %v1471_v31, %v1470_v52  ;;  %v5487_v54 = vunpack.i.h.bf16 %v5485_v34  ;;  %v5486_v6 = vunpack.i.l.bf16 %v5485_v34  ;;  %v5542_v34 = vpop.permute.xlu0 %5541 }
 0x16b   :  { %2444 = vmatpush1.bf16.msra.mxu1 %v4813_v27  ;;  %v5544_v44 = vunpack.i.h.bf16 %v5542_v34 }
 0x16c   :  { %5084 = vmatprep.mubr.msk.bf16.mxu1 %vm1569_vm0, %v1516_v4  ;;  %2445 = vmatprep.subr.bf16.mxu1 %v4822_v30  ;;  %v888_v1 = vmul.f32 %v5487_v54, %v5962_v46  ;;  %v887_v2 = vmul.f32 %v5486_v6, %v5962_v46 }
 0x16d   :  { %v5496_v36 = vpop.permute.xlu1 %5495  ;;  %5085 = vmatmul.mubr.msk.bf16.gmra.mrb[4].mxu1 %vm1569_vm0, %v1517_v43 }
 0x16e   :  { %v5498_v58 = vunpack.i.h.bf16 %v5496_v36  ;;  %v5497_v38 = vunpack.i.l.bf16 %v5496_v36  ;;  %v951_v19 = vadd.f32 %v887_v2, %v563_v12  ;;  %v952_v5 = vadd.f32 %v888_v1, %v564_v11  ;;  %v5559_v9 = vpop.permute.xlu0 %5558 }
 0x16f   :  { %2446 = vmatpush1.bf16.msra.mxu1 %v4821_v47  ;;  %v5543_v47 = vunpack.i.l.bf16 %v5542_v34  ;;  %v5560_v34 = vunpack.i.l.bf16 %v5559_v9 }
 0x170   :  { %v890_v61 = vmul.f32 %v5498_v58, %v5962_v46  ;;  %v889_v62 = vmul.f32 %v5497_v38, %v5962_v46  ;;  %2447 = vmatprep.subr.bf16.mxu1 %v4830_v49  ;;  %v5537_v49 = vunpack.i.l.bf16 %v5536_v16 }
 0x172   :  { %v953_v8 = vadd.f32 %v889_v62, %v565_v57  ;;  %v954_v24 = vadd.f32 %v890_v61, %v566_v56  ;;  %v5502_v53 = vpop.permute.xlu1 %5501  ;;  %v570_v56 = vmul.f32 %v5544_v44, %v5960_v45  ;;  %v569_v57 = vmul.f32 %v5543_v47, %v5960_v45  ;;  %v6419_v16 = vpop.permute.xlu0 %5586 }
 0x173   :  { %v5504_v35 = vunpack.i.h.bf16 %v5502_v53  ;;  %v5503_v23 = vunpack.i.l.bf16 %v5502_v53  ;;  %2448 = vmatpush1.bf16.msra.mxu1 %v4829_v60 }
 0x174   :  { %v1341_v13 = vadd.f32 %v1277_v50, %v953_v8  ;;  %v1342_v14 = vadd.f32 %v1278_v59, %v954_v24  ;;  %2449 = vmatprep.subr.bf16.mxu1 %v4838_v63  ;;  %v1281_v59 = vmul.f32 %v5537_v49, %v5977_v3 }
 0x175   :  { %v1276_v21 = vmul.f32 %v5504_v35, %v5977_v3  ;;  %v1275_v25 = vmul.f32 %v5503_v23, %v5977_v3 }
 0x176   :  { %v1412_v17 = vadd.f32 %v6268_v20, %v1341_v13  ;;  %v1413_v29 = vadd.f32 %v6268_v20, %v1342_v14 }
 0x177   :  { %v1339_v27 = vadd.f32 %v1275_v25, %v951_v19  ;;  %v1340_v52 = vadd.f32 %v1276_v21, %v952_v5  ;;  %v5514_v31 = vpop.permute.xlu1 %5513  ;;  %2450 = vmatpush1.bf16.msra.mxu1 %v4837_v10 }
 0x178   :  { %3141 = vmatprep.subr.bf16.mxu1 %v4786_v18  ;;  %v1476_v26 = vmax.f32 %v1412_v17, 0.0  ;;  %v1477_v33 = vmax.f32 %v1413_v29, 0.0  ;;  %v5516_v58 = vunpack.i.h.bf16 %v5514_v31  ;;  %v5515_v38 = vunpack.i.l.bf16 %v5514_v31 }
 0x179   :  { %v1410_v32 = vadd.f32 %v6268_v20, %v1339_v27  ;;  %v1411_v30 = vadd.f32 %v6268_v20, %v1340_v52 }
 0x17a   :  { %v1519_v48 = vpack.c.bf16 %v1477_v33, %v1476_v26  ;;  %v568_v8 = vmul.f32 %v5516_v58, %v5960_v45  ;;  %v567_v24 = vmul.f32 %v5515_v38, %v5960_v45  ;;  %v5561_v26 = vunpack.i.h.bf16 %v5559_v9 }
 0x17b   :  { %v1474_v41 = vmax.f32 %v1410_v32, 0.0  ;;  %v1475_v22 = vmax.f32 %v1411_v30, 0.0  ;;  %v5593_v30 = vpop.permute.xlu0 %5592 }
 0x17c   :  { %v5520_v4 = vpop.permute.xlu1 %5519  ;;  %v5595_v44 = vunpack.i.h.bf16 %v5593_v30  ;;  %v5594_v47 = vunpack.i.l.bf16 %v5593_v30  ;;  %v574_v49 = vmul.f32 %v5561_v26, %v5960_v45  ;;  %v4787_v26 = vcombine.low %v6366_v39, %v6373_v42 }
 0x17d   :  { %v1518_v43 = vpack.c.bf16 %v1475_v22, %v1474_v41  ;;  %v5522_v54 = vunpack.i.h.bf16 %v5520_v4  ;;  %v5521_v6 = vunpack.i.l.bf16 %v5520_v4 }
 0x17e   :  { %v1286_v58 = vmul.f32 %v5595_v44, %v5977_v3  ;;  %v1285_v38 = vmul.f32 %v5594_v47, %v5977_v3 }
 0x17f   :  { %5088 = vmatprep.mubr.msk.bf16.mxu1 %vm1569_vm0, %v1518_v43  ;;  %v892_v62 = vmul.f32 %v5522_v54, %v5962_v46  ;;  %v891_v50 = vmul.f32 %v5521_v6, %v5962_v46  ;;  %v6428_v6 = vld [vmem:[#allocation4] ss:$0 sm:$0xff]  ;;  %v5609_v42 = vpop.permute.xlu0 %5608 }
 0x180   :  { %v5525_v36 = vpop.permute.xlu1 %5524  ;;  %5089 = vmatmul.mubr.msk.bf16.gmra.mrb[8].mxu1 %vm1569_vm0, %v1519_v48 }
 0x181   :  { %v5527_v51 = vunpack.i.h.bf16 %v5525_v36  ;;  %v5526_v55 = vunpack.i.l.bf16 %v5525_v36  ;;  %v955_v35 = vadd.f32 %v891_v50, %v567_v24  ;;  %v956_v23 = vadd.f32 %v892_v62, %v568_v8 }
 0x182   :  { %v573_v36 = vmul.f32 %v5560_v34, %v5960_v45 }
 0x183   :  { %v894_v60 = vmul.f32 %v5527_v51, %v5962_v46  ;;  %v893_v61 = vmul.f32 %v5526_v55, %v5962_v46 }
 0x185   :  { %v958_v63 = vadd.f32 %v894_v60, %v570_v56  ;;  %v957_v1 = vadd.f32 %v893_v61, %v569_v57  ;;  %v5531_v2 = vpop.permute.xlu1 %5530 }
 0x186   :  { %v5533_v53 = vunpack.i.h.bf16 %v5531_v2  ;;  %v5532_v10 = vunpack.i.l.bf16 %v5531_v2 }
 0x187   :  { %v1345_v11 = vadd.f32 %v1281_v59, %v957_v1  ;;  %v1346_v12 = vadd.f32 %v1282_v15, %v958_v63 }
 0x188   :  { %v1280_v13 = vmul.f32 %v5533_v53, %v5977_v3  ;;  %v1279_v14 = vmul.f32 %v5532_v10, %v5977_v3 }
 0x189   :  { %v1416_v18 = vadd.f32 %v6268_v20, %v1345_v11  ;;  %v1417_v19 = vadd.f32 %v6268_v20, %v1346_v12 }
 0x18a   :  { %v1343_v5 = vadd.f32 %v1279_v14, %v955_v35  ;;  %v1344_v21 = vadd.f32 %v1280_v13, %v956_v23  ;;  %v5548_v25 = vpop.permute.xlu1 %5547 }
 0x18b   :  { %v1480_v27 = vmax.f32 %v1416_v18, 0.0  ;;  %v1481_v52 = vmax.f32 %v1417_v19, 0.0  ;;  %v5549_v48 = vunpack.i.l.bf16 %v5548_v25  ;;  %v5550_v40 = vunpack.i.h.bf16 %v5548_v25  ;;  %v2066_v25 = vld [vmem:[%s7074_s5 + $0x78] sm:$0xff] }
 0x18c   :  { %v1414_v17 = vadd.f32 %v6268_v20, %v1343_v5  ;;  %v1415_v29 = vadd.f32 %v6268_v20, %v1344_v21  ;;  %v2062_v21 = vld [vmem:[%s7074_s5 + $0x58] sm:$0xff] }
 0x18d   :  { %v1521_v43 = vpack.c.bf16 %v1481_v52, %v1480_v27  ;;  %v571_v15 = vmul.f32 %v5549_v48, %v5960_v45  ;;  %v572_v50 = vmul.f32 %v5550_v40, %v5960_v45  ;;  %v4795_v40 = vcombine.low %v2062_v21, %v2066_v25 }
 0x18e   :  { %v1478_v31 = vmax.f32 %v1414_v17, 0.0  ;;  %v1479_v32 = vmax.f32 %v1415_v29, 0.0 }
 0x18f   :  { %v5554_v33 = vpop.permute.xlu1 %5553 }
 0x190   :  { %v5555_v41 = vunpack.i.l.bf16 %v5554_v33  ;;  %v1520_v22 = vpack.c.bf16 %v1479_v32, %v1478_v31  ;;  %v5556_v4 = vunpack.i.h.bf16 %v5554_v33 }
 0x192   :  { %5092 = vmatprep.mubr.msk.bf16.mxu1 %vm1569_vm0, %v1520_v22  ;;  %v895_v51 = vmul.f32 %v5555_v41, %v5962_v46  ;;  %v896_v57 = vmul.f32 %v5556_v4, %v5962_v46  ;;  %v4796_v4 = vcombine.high %v2062_v21, %v2066_v25 }
 0x193   :  { %v5564_v54 = vpop.permute.xlu1 %5563  ;;  %5093 = vmatmul.mubr.msk.bf16.gmra.mrb[12].mxu1 %vm1569_vm0, %v1521_v43 }
 0x194   :  { %v5566_v55 = vunpack.i.h.bf16 %v5564_v54  ;;  %v5565_v56 = vunpack.i.l.bf16 %v5564_v54  ;;  %v959_v2 = vadd.f32 %v895_v51, %v571_v15  ;;  %v960_v12 = vadd.f32 %v896_v57, %v572_v50  ;;  %v2070_v15 = vld [vmem:[%s7074_s5 + $0x98] sm:$0xff] }
 0x195   :  { %v5050_v9 = vpop.f32.mrb[0].mxu0  ;;  %v5589_v54 = vunpack.i.h.bf16 %v6419_v16  ;;  %v5588_v51 = vunpack.i.l.bf16 %v6419_v16 }
 0x196   :  { %v898_v59 = vmul.f32 %v5566_v55, %v5962_v46  ;;  %v897_v60 = vmul.f32 %v5565_v56, %v5962_v46  ;;  %v1709_v61 = vadd.f32 %v5050_v9, %v6428_v6  ;;  %v1700_v62 = vpop.f32.mrb[1].mxu0  ;;  %v5610_v9 = vunpack.i.l.bf16 %v5609_v42 }
 0x197   :  { %v1701_v63 = vadd.f32 %v6428_v6, %v1700_v62  ;;  %v5051_v1 = vpop.f32.mrb[2].mxu0  ;;  %v578_v16 = vmul.f32 %v5589_v54, %v5960_v45 }
 0x198   :  { %v961_v8 = vadd.f32 %v897_v60, %v573_v36  ;;  %v962_v24 = vadd.f32 %v898_v59, %v574_v49  ;;  %v1712_v53 = vadd.f32 %v5051_v1, %v6428_v6  ;;  %v5570_v10 = vpop.permute.xlu1 %5569  ;;  %v1703_v11 = vpop.f32.mrb[3].mxu0  ;;  %v1957_v19 = vmax.f32 %v1709_v61, 0.0  ;;  %v2074_v60 = vld [vmem:[%s7074_s5 + $0xb8] sm:$0xff] }
 0x199   :  { %v5572_v35 = vunpack.i.h.bf16 %v5570_v10  ;;  %v5571_v23 = vunpack.i.l.bf16 %v5570_v10  ;;  %v1704_v13 = vadd.f32 %v6428_v6, %v1703_v11  ;;  %v1955_v17 = vmax.f32 %v1701_v63, 0.0 }
 0x19a   :  { %v1349_v14 = vadd.f32 %v1285_v38, %v961_v8  ;;  %v1350_v18 = vadd.f32 %v1286_v58, %v962_v24  ;;  %v1958_v5 = vmax.f32 %v1712_v53, 0.0  ;;  %v5611_v38 = vunpack.i.h.bf16 %v5609_v42 }
 0x19b   :  { %v1284_v29 = vmul.f32 %v5572_v35, %v5977_v3  ;;  %v1283_v27 = vmul.f32 %v5571_v23, %v5977_v3  ;;  %v1956_v52 = vmax.f32 %v1704_v13, 0.0  ;;  %v4803_v50 = vcombine.low %v2070_v15, %v2074_v60 }
 0x19c   :  { %v1420_v31 = vadd.f32 %v6268_v20, %v1349_v14  ;;  %v1421_v32 = vadd.f32 %v6268_v20, %v1350_v18  ;;  %v6453_v30 = vpack.c.bf16 %v1958_v5, %v1957_v19  ;;  %v4804_v63 = vcombine.high %v2070_v15, %v2074_v60 }
 0x19d   :  { %v1347_v33 = vadd.f32 %v1283_v27, %v959_v2  ;;  %v1348_v34 = vadd.f32 %v1284_v29, %v960_v12  ;;  %v6457_v41 = vpack.c.bf16 %v1956_v52, %v1955_v17  ;;  %v5576_v22 = vpop.permute.xlu1 %5575  ;;  %v577_v1 = vmul.f32 %v5588_v51, %v5960_v45 }
 0x19e   :  { %v1484_v47 = vmax.f32 %v1420_v31, 0.0  ;;  %v1485_v48 = vmax.f32 %v1421_v32, 0.0  ;;  %v5577_v59 = vunpack.i.l.bf16 %v5576_v22  ;;  %v5578_v61 = vunpack.i.h.bf16 %v5576_v22  ;;  %v5637_v22 = vpop.permute.xlu0 %5636 }
 0x19f   :  { %v1418_v43 = vadd.f32 %v6268_v20, %v1347_v33  ;;  %v1419_v44 = vadd.f32 %v6268_v20, %v1348_v34  ;;  %2821 = vmatmul.mubr.bf16.vlgmr.msra.gmra.mrb[32].mxu0 %v6457_v41  ;;  %v1290_v10 = vmul.f32 %v5611_v38, %v5977_v3  ;;  %v1289_v11 = vmul.f32 %v5610_v9, %v5977_v3 }
 0x1a0   :  { %2830 = vmatprep.mubr.bf16.mxu0 %v5737_v0  ;;  %3495 = vmatpush1.bf16.msra.mxu0 %v4787_v26  ;;  %v1523_v58 = vpack.c.bf16 %v1485_v48, %v1484_v47  ;;  %v575_v35 = vmul.f32 %v5577_v59, %v5960_v45  ;;  %v576_v19 = vmul.f32 %v5578_v61, %v5960_v45 }
 0x1a1   :  { %v1482_v49 = vmax.f32 %v1418_v43, 0.0  ;;  %v1483_v39 = vmax.f32 %v1419_v44, 0.0  ;;  %3496 = vmatprep.subr.bf16.mxu0 %v4796_v4 }
 0x1a2   :  { %v5582_v36 = vpop.permute.xlu1 %5581  ;;  %v5643_v9 = vpop.permute.xlu0 %5642 }
 0x1a3   :  { %v5583_v55 = vunpack.i.l.bf16 %v5582_v36  ;;  %v1522_v56 = vpack.c.bf16 %v1483_v39, %v1482_v49  ;;  %v5584_v57 = vunpack.i.h.bf16 %v5582_v36 }
 0x1a4   :  { %3497 = vmatpush1.bf16.msra.mxu0 %v4795_v40 }
 0x1a5   :  { %5096 = vmatprep.mubr.msk.bf16.mxu1 %vm1569_vm0, %v1522_v56  ;;  %v899_v2 = vmul.f32 %v5583_v55, %v5962_v46  ;;  %v900_v53 = vmul.f32 %v5584_v57, %v5962_v46  ;;  %3498 = vmatprep.subr.bf16.mxu0 %v4804_v63 }
 0x1a6   :  { %v5598_v62 = vpop.permute.xlu1 %5597  ;;  %5097 = vmatmul.mubr.msk.bf16.gmra.mrb[16].mxu1 %vm1569_vm0, %v1523_v58 }
 0x1a7   :  { %v5600_v8 = vunpack.i.h.bf16 %v5598_v62  ;;  %v5599_v24 = vunpack.i.l.bf16 %v5598_v62  ;;  %2831 = vmatmul.mubr.bf16.gmra.mrb[36].mxu0 %v6453_v30  ;;  %v963_v25 = vadd.f32 %v899_v2, %v575_v35  ;;  %v964_v32 = vadd.f32 %v900_v53, %v576_v19 }
 0x1a8   :  { %v5054_v12 = vpop.f32.mrb[4].mxu0  ;;  %2840 = vmatprep.mubr.bf16.mxu0 %v5737_v0  ;;  %3499 = vmatpush1.bf16.msra.mxu0 %v4803_v50  ;;  %v5645_v62 = vunpack.i.h.bf16 %v5643_v9 }
 0x1a9   :  { %v902_v23 = vmul.f32 %v5600_v8, %v5962_v46  ;;  %v901_v13 = vmul.f32 %v5599_v24, %v5962_v46  ;;  %v1725_v14 = vadd.f32 %v5054_v12, %v6428_v6  ;;  %v1716_v18 = vpop.f32.mrb[5].mxu0  ;;  %v5639_v8 = vunpack.i.h.bf16 %v5637_v22 }
 0x1aa   :  { %v1717_v5 = vadd.f32 %v6428_v6, %v1716_v18  ;;  %v5055_v21 = vpop.f32.mrb[6].mxu0  ;;  %v5638_v24 = vunpack.i.l.bf16 %v5637_v22  ;;  %v582_v35 = vmul.f32 %v5645_v62, %v5960_v45 }
 0x1ab   :  { %v965_v17 = vadd.f32 %v901_v13, %v577_v1  ;;  %v966_v29 = vadd.f32 %v902_v23, %v578_v16  ;;  %v1728_v27 = vadd.f32 %v5055_v21, %v6428_v6  ;;  %v5604_v52 = vpop.permute.xlu1 %5603  ;;  %v1719_v31 = vpop.f32.mrb[7].mxu0  ;;  %v1961_v44 = vmax.f32 %v1725_v14, 0.0 }
 0x1ac   :  { %v5606_v26 = vunpack.i.h.bf16 %v5604_v52  ;;  %v5605_v33 = vunpack.i.l.bf16 %v5604_v52  ;;  %v1720_v34 = vadd.f32 %v6428_v6, %v1719_v31  ;;  %v1959_v48 = vmax.f32 %v1717_v5, 0.0 }
 0x1ad   :  { %v1353_v4 = vadd.f32 %v1289_v11, %v965_v17  ;;  %v1354_v43 = vadd.f32 %v1290_v10, %v966_v29  ;;  %v1962_v47 = vmax.f32 %v1728_v27, 0.0  ;;  %v5644_v1 = vunpack.i.l.bf16 %v5643_v9 }
 0x1ae   :  { %v1288_v40 = vmul.f32 %v5606_v26, %v5977_v3  ;;  %v1287_v49 = vmul.f32 %v5605_v33, %v5977_v3  ;;  %v1960_v39 = vmax.f32 %v1720_v34, 0.0  ;;  %v1294_v5 = vmul.f32 %v5639_v8, %v5977_v3 }
 0x1af   :  { %v1424_v42 = vadd.f32 %v6268_v20, %v1353_v4  ;;  %v1425_v54 = vadd.f32 %v6268_v20, %v1354_v43  ;;  %v6493_v36 = vpack.c.bf16 %v1962_v47, %v1961_v44  ;;  %v581_v18 = vmul.f32 %v5644_v1, %v5960_v45 }
 0x1b0   :  { %v1351_v51 = vadd.f32 %v1287_v49, %v963_v25  ;;  %v1352_v55 = vadd.f32 %v1288_v40, %v964_v32  ;;  %v6495_v56 = vpack.c.bf16 %v1960_v39, %v1959_v48  ;;  %v5615_v57 = vpop.permute.xlu1 %5614  ;;  %v1293_v21 = vmul.f32 %v5638_v24, %v5977_v3 }
 0x1b1   :  { %v1488_v15 = vmax.f32 %v1424_v42, 0.0  ;;  %v1489_v59 = vmax.f32 %v1425_v54, 0.0  ;;  %v5616_v10 = vunpack.i.l.bf16 %v5615_v57  ;;  %v5617_v11 = vunpack.i.h.bf16 %v5615_v57 }
 0x1b2   :  { %v1422_v58 = vadd.f32 %v6268_v20, %v1351_v51  ;;  %v1423_v38 = vadd.f32 %v6268_v20, %v1352_v55  ;;  %2841 = vmatmul.mubr.bf16.gmra.mrb[40].mxu0 %v6495_v56 }
 0x1b3   :  { %2850 = vmatprep.mubr.bf16.mxu0 %v5737_v0  ;;  %v1525_v53 = vpack.c.bf16 %v1489_v59, %v1488_v15  ;;  %v579_v17 = vmul.f32 %v5616_v10, %v5960_v45  ;;  %v580_v32 = vmul.f32 %v5617_v11, %v5960_v45 }
 0x1b4   :  { %v1486_v60 = vmax.f32 %v1422_v58, 0.0  ;;  %v1487_v16 = vmax.f32 %v1423_v38, 0.0 }
 0x1b5   :  { %v5621_v61 = vpop.permute.xlu1 %5620 }
 0x1b6   :  { %v5622_v50 = vunpack.i.l.bf16 %v5621_v61  ;;  %v1524_v63 = vpack.c.bf16 %v1487_v16, %v1486_v60  ;;  %v5623_v2 = vunpack.i.h.bf16 %v5621_v61  ;;  %v5660_v16 = vpop.permute.xlu0 %5659 }
 0x1b8   :  { %5100 = vmatprep.mubr.msk.bf16.mxu1 %vm1569_vm0, %v1524_v63  ;;  %v903_v23 = vmul.f32 %v5622_v50, %v5962_v46  ;;  %v904_v19 = vmul.f32 %v5623_v2, %v5962_v46 }
 0x1b9   :  { %v5626_v12 = vpop.permute.xlu1 %5625  ;;  %5101 = vmatmul.mubr.msk.bf16.gmra.mrb[20].mxu1 %vm1569_vm0, %v1525_v53 }
 0x1ba   :  { %v5628_v13 = vunpack.i.h.bf16 %v5626_v12  ;;  %v5627_v14 = vunpack.i.l.bf16 %v5626_v12  ;;  %2851 = vmatmul.mubr.bf16.gmra.mrb[44].mxu0 %v6493_v36  ;;  %v967_v34 = vadd.f32 %v903_v23, %v579_v17  ;;  %v968_v48 = vadd.f32 %v904_v19, %v580_v32  ;;  %v5677_v53 = vpop.permute.xlu0 %5676 }
 0x1bb   :  { %v5058_v25 = vpop.f32.mrb[8].mxu0  ;;  %2860 = vmatprep.mubr.bf16.mxu0 %v5737_v0  ;;  %v5661_v23 = vunpack.i.l.bf16 %v5660_v16  ;;  %v5679_v19 = vunpack.i.h.bf16 %v5677_v53 }
 0x1bc   :  { %v906_v29 = vmul.f32 %v5628_v13, %v5962_v46  ;;  %v905_v27 = vmul.f32 %v5627_v14, %v5962_v46  ;;  %v1741_v52 = vadd.f32 %v5058_v25, %v6428_v6  ;;  %v1732_v31 = vpop.f32.mrb[9].mxu0  ;;  %v2078_v13 = vld [vmem:[%s7074_s5 + $0xd8] sm:$0xff] }
 0x1bd   :  { %v1733_v26 = vadd.f32 %v6428_v6, %v1732_v31  ;;  %v5059_v33 = vpop.f32.mrb[10].mxu0 }
 0x1be   :  { %v970_v22 = vadd.f32 %v906_v29, %v582_v35  ;;  %v969_v4 = vadd.f32 %v905_v27, %v581_v18  ;;  %v1744_v43 = vadd.f32 %v5059_v33, %v6428_v6  ;;  %v5632_v44 = vpop.permute.xlu1 %5631  ;;  %v1735_v47 = vpop.f32.mrb[11].mxu0  ;;  %v1965_v51 = vmax.f32 %v1741_v52, 0.0 }
 0x1bf   :  { %v5634_v40 = vunpack.i.h.bf16 %v5632_v44  ;;  %v5633_v49 = vunpack.i.l.bf16 %v5632_v44  ;;  %v1736_v39 = vadd.f32 %v6428_v6, %v1735_v47  ;;  %v1963_v57 = vmax.f32 %v1733_v26, 0.0 }
 0x1c0   :  { %v1357_v42 = vadd.f32 %v1293_v21, %v969_v4  ;;  %v1358_v54 = vadd.f32 %v1294_v5, %v970_v22  ;;  %v1966_v55 = vmax.f32 %v1744_v43, 0.0  ;;  %v5662_v35 = vunpack.i.h.bf16 %v5660_v16  ;;  %v2082_v5 = vld [vmem:[%s7074_s5 + $0xf8] sm:$0xff] }
 0x1c1   :  { %v1292_v58 = vmul.f32 %v5634_v40, %v5977_v3  ;;  %v1291_v38 = vmul.f32 %v5633_v49, %v5977_v3  ;;  %v1964_v9 = vmax.f32 %v1736_v39, 0.0  ;;  %v4811_v17 = vcombine.low %v2078_v13, %v2082_v5 }
 0x1c2   :  { %v1428_v15 = vadd.f32 %v6268_v20, %v1357_v42  ;;  %v1429_v59 = vadd.f32 %v6268_v20, %v1358_v54  ;;  %v6523_v60 = vpack.c.bf16 %v1966_v55, %v1965_v51  ;;  %v4812_v29 = vcombine.high %v2078_v13, %v2082_v5 }
 0x1c3   :  { %v1355_v61 = vadd.f32 %v1291_v38, %v967_v34  ;;  %v1356_v62 = vadd.f32 %v1292_v58, %v968_v48  ;;  %v6525_v50 = vpack.c.bf16 %v1964_v9, %v1963_v57  ;;  %v5649_v63 = vpop.permute.xlu1 %5648  ;;  %v586_v31 = vmul.f32 %v5662_v35, %v5960_v45 }
 0x1c4   :  { %v1492_v8 = vmax.f32 %v1428_v15, 0.0  ;;  %v1493_v24 = vmax.f32 %v1429_v59, 0.0  ;;  %v5650_v27 = vunpack.i.l.bf16 %v5649_v63  ;;  %v5651_v52 = vunpack.i.h.bf16 %v5649_v63  ;;  %3500 = vmatprep.subr.bf16.mxu0 %v4812_v29 }
 0x1c5   :  { %v1426_v1 = vadd.f32 %v6268_v20, %v1355_v61  ;;  %v1427_v2 = vadd.f32 %v6268_v20, %v1356_v62  ;;  %2861 = vmatmul.mubr.bf16.gmra.mrb[48].mxu0 %v6525_v50  ;;  %v5678_v20 = vunpack.i.l.bf16 %v5677_v53  ;;  %v585_v33 = vmul.f32 %v5661_v23, %v5960_v45 }
 0x1c6   :  { %2870 = vmatprep.mubr.bf16.mxu0 %v5737_v0  ;;  %v1527_v25 = vpack.c.bf16 %v1493_v24, %v1492_v8  ;;  %v1298_v43 = vmul.f32 %v5679_v19, %v5977_v3  ;;  %3501 = vmatpush1.bf16.msra.mxu0 %v4811_v17  ;;  %v583_v48 = vmul.f32 %v5650_v27, %v5960_v45 }
 0x1c7   :  { %v1490_v10 = vmax.f32 %v1426_v1, 0.0  ;;  %v1491_v11 = vmax.f32 %v1427_v2, 0.0  ;;  %v1297_v44 = vmul.f32 %v5678_v20, %v5977_v3  ;;  %v584_v54 = vmul.f32 %v5651_v52, %v5960_v45 }
 0x1c8   :  { %v5655_v12 = vpop.permute.xlu1 %5654 }
 0x1c9   :  { %v5656_v14 = vunpack.i.l.bf16 %v5655_v12  ;;  %v1526_v18 = vpack.c.bf16 %v1491_v11, %v1490_v10  ;;  %v5657_v21 = vunpack.i.h.bf16 %v5655_v12  ;;  %v5685_v11 = vld [vmem:[#allocation2] ss:$0 sm:$0xff] }
 0x1cb   :  { %5104 = vmatprep.mubr.msk.bf16.mxu1 %vm1569_vm0, %v1526_v18  ;;  %v907_v26 = vmul.f32 %v5656_v14, %v5962_v46  ;;  %v908_v4 = vmul.f32 %v5657_v21, %v5962_v46 }
 0x1cc   :  { %v5665_v32 = vpop.permute.xlu1 %5664  ;;  %5105 = vmatmul.mubr.msk.bf16.gmra.mrb[24].mxu1 %vm1569_vm0, %v1527_v25 }
 0x1cd   :  { %v5667_v34 = vunpack.i.h.bf16 %v5665_v32  ;;  %v5666_v22 = vunpack.i.l.bf16 %v5665_v32  ;;  %2871 = vmatmul.mubr.bf16.gmra.mrb[52].mxu0 %v6523_v60  ;;  %v971_v57 = vadd.f32 %v907_v26, %v583_v48  ;;  %v972_v16 = vadd.f32 %v908_v4, %v584_v54  ;;  %v2061_v32 = vld [vmem:[%s7074_s5 + $0x50] sm:$0xff] }
 0x1ce   :  { %v5062_v47 = vpop.f32.mrb[12].mxu0  ;;  %2880 = vmatprep.mubr.bf16.mxu0 %v5737_v0  ;;  %v2065_v26 = vld [vmem:[%s7074_s5 + $0x70] sm:$0xff] }
 0x1cf   :  { %v910_v40 = vmul.f32 %v5667_v34, %v5962_v46  ;;  %v909_v49 = vmul.f32 %v5666_v22, %v5962_v46  ;;  %v1757_v39 = vadd.f32 %v5062_v47, %v6428_v6  ;;  %v1748_v42 = vpop.f32.mrb[13].mxu0 }
 0x1d0   :  { %v1749_v51 = vadd.f32 %v6428_v6, %v1748_v42  ;;  %v5063_v55 = vpop.f32.mrb[14].mxu0 }
 0x1d1   :  { %v973_v58 = vadd.f32 %v909_v49, %v585_v33  ;;  %v974_v38 = vadd.f32 %v910_v40, %v586_v31  ;;  %v1760_v9 = vadd.f32 %v5063_v55, %v6428_v6  ;;  %v5671_v15 = vpop.permute.xlu1 %5670  ;;  %v1751_v59 = vpop.f32.mrb[15].mxu0  ;;  %v1969_v2 = vmax.f32 %v1757_v39, 0.0  ;;  %v2069_v40 = vld [vmem:[%s7074_s5 + $0x90] sm:$0xff] }
 0x1d2   :  { %v5673_v61 = vunpack.i.h.bf16 %v5671_v15  ;;  %v5672_v62 = vunpack.i.l.bf16 %v5671_v15  ;;  %v1752_v46 = vadd.f32 %v6428_v6, %v1751_v59  ;;  %v1967_v45 = vmax.f32 %v1749_v51, 0.0  ;;  %v2073_v49 = vld [vmem:[%s7074_s5 + $0xb0] sm:$0xff] }
 0x1d3   :  { %v1361_v63 = vadd.f32 %v1297_v44, %v973_v58  ;;  %v1362_v1 = vadd.f32 %v1298_v43, %v974_v38  ;;  %v1970_v8 = vmax.f32 %v1760_v9, 0.0  ;;  %v4794_v44 = vcombine.high %v2061_v32, %v2065_v26  ;;  %v2086_v58 = vld [vmem:[%s7074_s5 + $0x118] sm:$0xff]  ;;  %v2077_v38 = vld [vmem:[%s7074_s5 + $0xd0] sm:$0xff] }
 0x1d4   :  { %v1296_v24 = vmul.f32 %v5673_v61, %v5977_v3  ;;  %v1295_v53 = vmul.f32 %v5672_v62, %v5977_v3  ;;  %v1968_v10 = vmax.f32 %v1752_v46, 0.0  ;;  %v4793_v51 = vcombine.low %v2061_v32, %v2065_v26  ;;  %v2089_v61 = vld [vmem:[%s7074_s5 + $0x130] sm:$0xff] }
 0x1d5   :  { %v1432_v12 = vadd.f32 %v5685_v11, %v1361_v63  ;;  %v1433_v35 = vadd.f32 %v5685_v11, %v1362_v1  ;;  %v6557_v23 = vpack.c.bf16 %v1970_v8, %v1969_v2  ;;  %v4820_v9 = vcombine.high %v2086_v58, %v2090_v28 }
 0x1d6   :  { %v1359_v13 = vadd.f32 %v1295_v53, %v971_v57  ;;  %v1360_v14 = vadd.f32 %v1296_v24, %v972_v16  ;;  %v6559_v18 = vpack.c.bf16 %v1968_v10, %v1967_v45  ;;  %v4802_v57 = vcombine.high %v2069_v40, %v2073_v49  ;;  %v2085_v16 = vld [vmem:[%s7074_s5 + $0x110] sm:$0xff] }
 0x1d7   :  { %v1496_v5 = vmax.f32 %v1432_v12, 0.0  ;;  %v1497_v21 = vmax.f32 %v1433_v35, 0.0  ;;  %v4801_v15 = vcombine.low %v2069_v40, %v2073_v49  ;;  %v4810_v59 = vcombine.high %v2077_v38, %v2081_v37  ;;  %3502 = vmatprep.subr.bf16.mxu0 %v4820_v9 }
 0x1d8   :  { %v1430_v19 = vadd.f32 %v5685_v11, %v1359_v13  ;;  %v1431_v20 = vadd.f32 %v5685_v11, %v1360_v14  ;;  %2881 = vmatmul.mubr.bf16.gmra.mrb[56].mxu0 %v6559_v18  ;;  %v4809_v62 = vcombine.low %v2077_v38, %v2081_v37  ;;  %v4818_v46 = vcombine.high %v2085_v16, %v2089_v61 }
 0x1d9   :  { %2890 = vmatprep.mubr.bf16.mxu0 %v5737_v0  ;;  %v1529_v29 = vpack.c.bf16 %v1497_v21, %v1496_v5  ;;  %v4817_v1 = vcombine.low %v2085_v16, %v2089_v61  ;;  %v2093_v21 = vld [vmem:[%s7074_s5 + $0x150] sm:$0xff] }
 0x1da   :  { %v1494_v25 = vmax.f32 %v1430_v19, 0.0  ;;  %v1495_v3 = vmax.f32 %v1431_v20, 0.0 }
 0x1dc   :  { %v1528_v17 = vpack.c.bf16 %v1495_v3, %v1494_v25  ;;  %v2097_v25 = vld [vmem:[%s7074_s5 + $0x170] sm:$0xff]  ;;  %v2094_v3 = vld [vmem:[%s7074_s5 + $0x158] sm:$0xff] }
 0x1de   :  { %5108 = vmatprep.mubr.msk.bf16.mxu1 %vm1569_vm0, %v1528_v17 }
 0x1df   :  { %5109 = vmatmul.mubr.msk.bf16.gmra.mrb[28].mxu1 %vm1569_vm0, %v1529_v29 }
 0x1e0   :  { %2891 = vmatmul.mubr.bf16.gmra.mrb[60].mxu0 %v6557_v23  ;;  %2467 = vmatprep.mubr.bf16.mxu1 %v5737_v0 }
 0x1e1   :  { %v5066_v27 = vpop.f32.mrb[16].mxu0  ;;  %2900 = vmatprep.mubr.bf16.mxu0 %v5737_v0 }
 0x1e2   :  { %v1773_v52 = vadd.f32 %v5066_v27, %v6428_v6  ;;  %v1764_v31 = vpop.f32.mrb[17].mxu0  ;;  %v4825_v27 = vcombine.low %v2093_v21, %v2097_v25 }
 0x1e3   :  { %v1765_v33 = vadd.f32 %v6428_v6, %v1764_v31  ;;  %v5067_v34 = vpop.f32.mrb[18].mxu0  ;;  %v2098_v31 = vld [vmem:[%s7074_s5 + $0x178] sm:$0xff] }
 0x1e4   :  { %v1776_v22 = vadd.f32 %v5067_v34, %v6428_v6  ;;  %v1767_v4 = vpop.f32.mrb[19].mxu0  ;;  %v1973_v47 = vmax.f32 %v1773_v52, 0.0  ;;  %v4826_v52 = vcombine.high %v2093_v21, %v2097_v25  ;;  %v4828_v34 = vcombine.high %v2094_v3, %v2098_v31 }
 0x1e5   :  { %v1768_v43 = vadd.f32 %v6428_v6, %v1767_v4  ;;  %v1971_v39 = vmax.f32 %v1765_v33, 0.0  ;;  %v4827_v33 = vcombine.low %v2094_v3, %v2098_v31 }
 0x1e6   :  { %v1974_v48 = vmax.f32 %v1776_v22, 0.0 }
 0x1e7   :  { %v1972_v42 = vmax.f32 %v1768_v43, 0.0  ;;  %2468 = vmatmul.mubr.bf16.vlgmr.msra.gmra.mrb[32].mxu1 %v6457_v41 }
 0x1e8   :  { %v6585_v54 = vpack.c.bf16 %v1974_v48, %v1973_v47  ;;  %3142 = vmatpush1.bf16.msra.mxu1 %v4785_v7  ;;  %2477 = vmatprep.mubr.bf16.mxu1 %v5737_v0  ;;  %v4819_v7 = vcombine.low %v2086_v58, %v2090_v28 }
 0x1e9   :  { %v6591_v55 = vpack.c.bf16 %v1972_v42, %v1971_v39  ;;  %3143 = vmatprep.subr.bf16.mxu1 %v4794_v44 }
 0x1ea   :  { %3503 = vmatpush1.bf16.msra.mxu0 %v4819_v7 }
 0x1eb   :  { %2901 = vmatmul.mubr.bf16.gmra.mrb[64].mxu0 %v6591_v55  ;;  %3504 = vmatprep.subr.bf16.mxu0 %v4828_v34 }
 0x1ec   :  { %2910 = vmatprep.mubr.bf16.mxu0 %v5737_v0  ;;  %3144 = vmatpush1.bf16.msra.mxu1 %v4793_v51 }
 0x1ed   :  { %3145 = vmatprep.subr.bf16.mxu1 %v4802_v57 }
 0x1ee   :  { %3505 = vmatpush1.bf16.msra.mxu0 %v4827_v33 }
 0x1ef   :  { %2478 = vmatmul.mubr.bf16.gmra.mrb[36].mxu1 %v6453_v30 }
 0x1f0   :  { %2487 = vmatprep.mubr.bf16.mxu1 %v5737_v0  ;;  %3146 = vmatpush1.bf16.msra.mxu1 %v4801_v15 }
 0x1f1   :  { %3147 = vmatprep.subr.bf16.mxu1 %v4810_v59 }
 0x1f3   :  { %2911 = vmatmul.mubr.bf16.gmra.mrb[68].mxu0 %v6585_v54 }
 0x1f4   :  { %v5070_v63 = vpop.f32.mrb[20].mxu0  ;;  %2920 = vmatprep.mubr.bf16.mxu0 %v5737_v0  ;;  %3148 = vmatpush1.bf16.msra.mxu1 %v4809_v62 }
 0x1f5   :  { %v1789_v2 = vadd.f32 %v5070_v63, %v6428_v6  ;;  %v1780_v8 = vpop.f32.mrb[21].mxu0  ;;  %3149 = vmatprep.subr.bf16.mxu1 %v4818_v46  ;;  %v2101_v46 = vld [vmem:[%s7074_s5 + $0x190] sm:$0xff] }
 0x1f6   :  { %v1781_v45 = vadd.f32 %v6428_v6, %v1780_v8  ;;  %v5071_v24 = vpop.f32.mrb[22].mxu0  ;;  %v2105_v63 = vld [vmem:[%s7074_s5 + $0x1b0] sm:$0xff] }
 0x1f7   :  { %v1792_v53 = vadd.f32 %v5071_v24, %v6428_v6  ;;  %v1783_v10 = vpop.f32.mrb[23].mxu0  ;;  %2488 = vmatmul.mubr.bf16.gmra.mrb[40].mxu1 %v6495_v56  ;;  %v1977_v12 = vmax.f32 %v1789_v2, 0.0  ;;  %v4833_v2 = vcombine.low %v2101_v46, %v2105_v63  ;;  %v4834_v8 = vcombine.high %v2101_v46, %v2105_v63 }
 0x1f8   :  { %v1784_v11 = vadd.f32 %v6428_v6, %v1783_v10  ;;  %2497 = vmatprep.mubr.bf16.mxu1 %v5737_v0  ;;  %3150 = vmatpush1.bf16.msra.mxu1 %v4817_v1  ;;  %v1975_v13 = vmax.f32 %v1781_v45, 0.0  ;;  %v2102_v1 = vld [vmem:[%s7074_s5 + $0x198] sm:$0xff] }
 0x1f9   :  { %v1978_v35 = vmax.f32 %v1792_v53, 0.0  ;;  %3151 = vmatprep.subr.bf16.mxu1 %v4826_v52  ;;  %v2106_v45 = vld [vmem:[%s7074_s5 + $0x1b8] sm:$0xff] }
 0x1fa   :  { %v1976_v14 = vmax.f32 %v1784_v11, 0.0  ;;  %v4835_v24 = vcombine.low %v2102_v1, %v2106_v45  ;;  %v4836_v53 = vcombine.high %v2102_v1, %v2106_v45 }
 0x1fb   :  { %v6623_v19 = vpack.c.bf16 %v1978_v35, %v1977_v12 }
 0x1fc   :  { %v6625_v20 = vpack.c.bf16 %v1976_v14, %v1975_v13  ;;  %3152 = vmatpush1.bf16.msra.mxu1 %v4825_v27  ;;  %3506 = vmatprep.subr.bf16.mxu0 %v4836_v53 }
 0x1fd   :  { %3153 = vmatprep.subr.bf16.mxu1 %v4834_v8  ;;  %3507 = vmatpush1.bf16.msra.mxu0 %v4835_v24 }
 0x1fe   :  { %2921 = vmatmul.mubr.bf16.gmra.mrb[72].mxu0 %v6625_v20 }
 0x1ff   :  { %2498 = vmatmul.mubr.bf16.gmra.mrb[44].mxu1 %v6493_v36  ;;  %2930 = vmatprep.mubr.bf16.mxu0 %v5737_v0 }
 0x200   :  { %2507 = vmatprep.mubr.bf16.mxu1 %v5737_v0  ;;  %3154 = vmatpush1.bf16.msra.mxu1 %v4833_v2 }
 0x206   :  { %2931 = vmatmul.mubr.bf16.gmra.mrb[76].mxu0 %v6623_v19 }
 0x207   :  { %v5074_v5 = vpop.f32.mrb[24].mxu0  ;;  %2508 = vmatmul.mubr.bf16.gmra.mrb[48].mxu1 %v6525_v50  ;;  %2940 = vmatprep.mubr.bf16.mxu0 %v5737_v0 }
 0x208   :  { %v1805_v17 = vadd.f32 %v5074_v5, %v6428_v6  ;;  %v1796_v29 = vpop.f32.mrb[25].mxu0  ;;  %2517 = vmatprep.mubr.bf16.mxu1 %v5737_v0 }
 0x209   :  { %v1797_v32 = vadd.f32 %v6428_v6, %v1796_v29  ;;  %v5075_v26 = vpop.f32.mrb[26].mxu0 }
 0x20a   :  { %v1808_v22 = vadd.f32 %v5075_v26, %v6428_v6  ;;  %v1799_v4 = vpop.f32.mrb[27].mxu0  ;;  %v1981_v44 = vmax.f32 %v1805_v17, 0.0 }
 0x20b   :  { %v1800_v43 = vadd.f32 %v6428_v6, %v1799_v4  ;;  %v1979_v48 = vmax.f32 %v1797_v32, 0.0 }
 0x20c   :  { %v1982_v47 = vmax.f32 %v1808_v22, 0.0 }
 0x20d   :  { %v1980_v40 = vmax.f32 %v1800_v43, 0.0 }
 0x20e   :  { %v6651_v49 = vpack.c.bf16 %v1982_v47, %v1981_v44 }
 0x20f   :  { %v6653_v39 = vpack.c.bf16 %v1980_v40, %v1979_v48  ;;  %2518 = vmatmul.mubr.bf16.gmra.mrb[52].mxu1 %v6523_v60  ;;  %v2110_v48 = vld [vmem:[%s7074_s5 + $0x1d8] sm:$0xff] }
 0x210   :  { %2527 = vmatprep.mubr.bf16.mxu1 %v5737_v0  ;;  %v2114_v40 = vld [vmem:[%s7074_s5 + $0x1f8] sm:$0xff] }
 0x211   :  { %2941 = vmatmul.mubr.bf16.gmra.mrb[80].mxu0 %v6653_v39 }
 0x212   :  { %2950 = vmatprep.mubr.bf16.mxu0 %v5737_v0 }
 0x217   :  { %2528 = vmatmul.mubr.bf16.gmra.mrb[56].mxu1 %v6559_v18 }
 0x218   :  { %2537 = vmatprep.mubr.bf16.mxu1 %v5737_v0 }
 0x219   :  { %2951 = vmatmul.mubr.bf16.gmra.mrb[84].mxu0 %v6651_v49 }
 0x21a   :  { %v5078_v42 = vpop.f32.mrb[28].mxu0  ;;  %2960 = vmatprep.mubr.bf16.mxu0 %v5737_v0 }
 0x21b   :  { %v1821_v51 = vadd.f32 %v5078_v42, %v6428_v6  ;;  %v1812_v57 = vpop.f32.mrb[29].mxu0 }
 0x21c   :  { %v1813_v58 = vadd.f32 %v6428_v6, %v1812_v57  ;;  %v5079_v38 = vpop.f32.mrb[30].mxu0  ;;  %v4844_v57 = vcombine.high %v2110_v48, %v2114_v40 }
 0x21d   :  { %v1824_v37 = vadd.f32 %v5079_v38, %v6428_v6  ;;  %v1815_v28 = vpop.f32.mrb[31].mxu0  ;;  %v1985_v9 = vmax.f32 %v1821_v51, 0.0  ;;  %v2109_v38 = vld [vmem:[%s7074_s5 + $0x1d0] sm:$0xff] }
 0x21e   :  { %v1816_v7 = vadd.f32 %v6428_v6, %v1815_v28  ;;  %v1983_v59 = vmax.f32 %v1813_v58, 0.0  ;;  %v4843_v28 = vcombine.low %v2110_v48, %v2114_v40  ;;  %3508 = vmatprep.subr.bf16.mxu0 %v4844_v57 }
 0x21f   :  { %v1986_v15 = vmax.f32 %v1824_v37, 0.0  ;;  %2538 = vmatmul.mubr.bf16.gmra.mrb[60].mxu1 %v6557_v23  ;;  %v2113_v37 = vld [vmem:[%s7074_s5 + $0x1f0] sm:$0xff] }
 0x220   :  { %v1984_v16 = vmax.f32 %v1816_v7, 0.0  ;;  %2547 = vmatprep.mubr.bf16.mxu1 %v5737_v0  ;;  %3509 = vmatpush1.bf16.msra.mxu0 %v4843_v28 }
 0x221   :  { %v6669_v61 = vpack.c.bf16 %v1986_v15, %v1985_v9  ;;  %v4841_v9 = vcombine.low %v2109_v38, %v2113_v37  ;;  %v4842_v15 = vcombine.high %v2109_v38, %v2113_v37 }
 0x222   :  { %v6671_v62 = vpack.c.bf16 %v1984_v16, %v1983_v59 }
 0x223   :  { %3155 = vmatprep.subr.bf16.mxu1 %v4842_v15 }
 0x224   :  { %2961 = vmatmul.mubr.bf16.gmra.mrb[88].mxu0 %v6671_v62  ;;  %3156 = vmatpush1.bf16.msra.mxu1 %v4841_v9 }
 0x225   :  { %2970 = vmatprep.mubr.bf16.mxu0 %v5737_v0 }
 0x227   :  { %2548 = vmatmul.mubr.bf16.gmra.mrb[64].mxu1 %v6591_v55 }
 0x228   :  { %2557 = vmatprep.mubr.bf16.mxu1 %v5737_v0 }
 0x22c   :  { %2971 = vmatmul.mubr.bf16.gmra.mrb[92].mxu0 %v6669_v61 }
 0x22d   :  { %v5082_v10 = vpop.f32.mrb[0].mxu1  ;;  %2980 = vmatprep.mubr.bf16.mxu0 %v5737_v0 }
 0x22e   :  { %v1837_v11 = vadd.f32 %v5082_v10, %v6428_v6  ;;  %v1828_v12 = vpop.f32.mrb[1].mxu1 }
 0x22f   :  { %v1829_v35 = vadd.f32 %v6428_v6, %v1828_v12  ;;  %v5083_v13 = vpop.f32.mrb[2].mxu1  ;;  %2558 = vmatmul.mubr.bf16.gmra.mrb[68].mxu1 %v6585_v54 }
 0x230   :  { %v1840_v14 = vadd.f32 %v5083_v13, %v6428_v6  ;;  %v1831_v5 = vpop.f32.mrb[3].mxu1  ;;  %2567 = vmatprep.mubr.bf16.mxu1 %v5737_v0  ;;  %v1989_v25 = vmax.f32 %v1837_v11, 0.0 }
 0x231   :  { %v1832_v21 = vadd.f32 %v6428_v6, %v1831_v5  ;;  %v1987_v17 = vmax.f32 %v1829_v35, 0.0 }
 0x232   :  { %v1990_v3 = vmax.f32 %v1840_v14, 0.0 }
 0x233   :  { %v1988_v29 = vmax.f32 %v1832_v21, 0.0 }
 0x234   :  { %v6697_v27 = vpack.c.bf16 %v1990_v3, %v1989_v25 }
 0x235   :  { %v6699_v52 = vpack.c.bf16 %v1988_v29, %v1987_v17  ;;  %v6758_v29 = vld [vmem:[#allocation4] ss:$0 sm:$0xff] }
 0x237   :  { %2568 = vmatmul.mubr.bf16.gmra.mrb[72].mxu1 %v6625_v20  ;;  %2981 = vmatmul.mubr.bf16.gmra.mrb[96].mxu0 %v6699_v52 }
 0x238   :  { %2577 = vmatprep.mubr.bf16.mxu1 %v5737_v0  ;;  %2990 = vmatprep.mubr.bf16.mxu0 %v5737_v0 }
 0x23f   :  { %2578 = vmatmul.mubr.bf16.gmra.mrb[76].mxu1 %v6623_v19  ;;  %2991 = vmatmul.mubr.bf16.gmra.mrb[100].mxu0 %v6697_v27 }
 0x240   :  { %v5086_v31 = vpop.f32.mrb[4].mxu1  ;;  %2587 = vmatprep.mubr.bf16.mxu1 %v5737_v0  ;;  %3000 = vmatprep.mubr.bf16.mxu0 %v5737_v0 }
 0x241   :  { %v1853_v32 = vadd.f32 %v5086_v31, %v6428_v6  ;;  %v1844_v26 = vpop.f32.mrb[5].mxu1 }
 0x242   :  { %v1845_v33 = vadd.f32 %v6428_v6, %v1844_v26  ;;  %v5087_v34 = vpop.f32.mrb[6].mxu1 }
 0x243   :  { %v1856_v22 = vadd.f32 %v5087_v34, %v6428_v6  ;;  %v1847_v4 = vpop.f32.mrb[7].mxu1  ;;  %v1993_v44 = vmax.f32 %v1853_v32, 0.0 }
 0x244   :  { %v1848_v43 = vadd.f32 %v6428_v6, %v1847_v4  ;;  %v1991_v42 = vmax.f32 %v1845_v33, 0.0 }
 0x245   :  { %v1994_v47 = vmax.f32 %v1856_v22, 0.0 }
 0x246   :  { %v1992_v51 = vmax.f32 %v1848_v43, 0.0 }
 0x247   :  { %v6719_v58 = vpack.c.bf16 %v1994_v47, %v1993_v44  ;;  %2588 = vmatmul.mubr.bf16.gmra.mrb[80].mxu1 %v6653_v39 }
 0x248   :  { %v6728_v7 = vpack.c.bf16 %v1992_v51, %v1991_v42  ;;  %2597 = vmatprep.mubr.bf16.mxu1 %v5737_v0 }
 0x24a   :  { %3001 = vmatmul.mubr.bf16.gmra.mrb[104].mxu0 %v6728_v7 }
 0x24b   :  { %3010 = vmatprep.mubr.bf16.mxu0 %v5737_v0 }
 0x24f   :  { %2598 = vmatmul.mubr.bf16.gmra.mrb[84].mxu1 %v6651_v49 }
 0x250   :  { %2607 = vmatprep.mubr.bf16.mxu1 %v5737_v0 }
 0x252   :  { %3011 = vmatmul.mubr.bf16.gmra.mrb[108].mxu0 %v6719_v58 }
 0x253   :  { %v5090_v59 = vpop.f32.mrb[8].mxu1  ;;  %3020 = vmatprep.mubr.bf16.mxu0 %v5737_v0 }
 0x254   :  { %v1869_v16 = vadd.f32 %v5090_v59, %v6428_v6  ;;  %v1860_v46 = vpop.f32.mrb[9].mxu1 }
 0x255   :  { %v1861_v63 = vadd.f32 %v6428_v6, %v1860_v46  ;;  %v5091_v1 = vpop.f32.mrb[10].mxu1 }
 0x256   :  { %v1872_v2 = vadd.f32 %v5091_v1, %v6428_v6  ;;  %v1863_v8 = vpop.f32.mrb[11].mxu1  ;;  %v1997_v24 = vmax.f32 %v1869_v16, 0.0 }
 0x257   :  { %v1864_v45 = vadd.f32 %v6428_v6, %v1863_v8  ;;  %2608 = vmatmul.mubr.bf16.gmra.mrb[88].mxu1 %v6671_v62  ;;  %v1995_v10 = vmax.f32 %v1861_v63, 0.0 }
 0x258   :  { %v1998_v53 = vmax.f32 %v1872_v2, 0.0  ;;  %2617 = vmatprep.mubr.bf16.mxu1 %v5737_v0 }
 0x259   :  { %v1996_v11 = vmax.f32 %v1864_v45, 0.0 }
 0x25a   :  { %v6743_v12 = vpack.c.bf16 %v1998_v53, %v1997_v24 }
 0x25b   :  { %v6745_v35 = vpack.c.bf16 %v1996_v11, %v1995_v10 }
 0x25d   :  { %3021 = vmatmul.mubr.bf16.gmra.mrb[112].mxu0 %v6745_v35 }
 0x25e   :  { %3030 = vmatprep.mubr.bf16.mxu0 %v5737_v0 }
 0x25f   :  { %2618 = vmatmul.mubr.bf16.gmra.mrb[92].mxu1 %v6669_v61 }
 0x260   :  { %2627 = vmatprep.mubr.bf16.mxu1 %v5737_v0 }
 0x265   :  { %3031 = vmatmul.mubr.bf16.gmra.mrb[116].mxu0 %v6743_v12 }
 0x266   :  { %v5094_v13 = vpop.f32.mrb[12].mxu1  ;;  %3040 = vmatprep.mubr.bf16.mxu0 %v5737_v0 }
 0x267   :  { %v1885_v14 = vadd.f32 %v5094_v13, %v6428_v6  ;;  %v1876_v5 = vpop.f32.mrb[13].mxu1  ;;  %2628 = vmatmul.mubr.bf16.gmra.mrb[96].mxu1 %v6699_v52 }
 0x268   :  { %v1877_v21 = vadd.f32 %v6428_v6, %v1876_v5  ;;  %v5095_v25 = vpop.f32.mrb[14].mxu1  ;;  %2637 = vmatprep.mubr.bf16.mxu1 %v5737_v0 }
 0x269   :  { %v1888_v3 = vadd.f32 %v5095_v25, %v6428_v6  ;;  %v1879_v17 = vpop.f32.mrb[15].mxu1  ;;  %v2001_v32 = vmax.f32 %v1885_v14, 0.0 }
 0x26a   :  { %v1880_v31 = vadd.f32 %v6758_v29, %v1879_v17  ;;  %v1999_v33 = vmax.f32 %v1877_v21, 0.0 }
 0x26b   :  { %v2002_v26 = vmax.f32 %v1888_v3, 0.0 }
 0x26c   :  { %v2000_v34 = vmax.f32 %v1880_v31, 0.0 }
 0x26d   :  { %v6761_v22 = vpack.c.bf16 %v2002_v26, %v2001_v32 }
 0x26e   :  { %v6763_v4 = vpack.c.bf16 %v2000_v34, %v1999_v33 }
 0x26f   :  { %2638 = vmatmul.mubr.bf16.gmra.mrb[100].mxu1 %v6697_v27 }
 0x270   :  { %3041 = vmatmul.mubr.bf16.gmra.mrb[120].mxu0 %v6763_v4  ;;  %2647 = vmatprep.mubr.bf16.mxu1 %v5737_v0 }
 0x271   :  { %3050 = vmatprep.mubr.bf16.mxu0 %v5737_v0 }
 0x272   :  { %v2822_v6 = vpop.f32.mrb[32].mxu0 }
 0x273   :  { %v2824_v43 = vpop.f32.mrb[33].mxu0 }
 0x274   :  { %v2826_v44 = vpop.f32.mrb[34].mxu0 }
 0x275   :  { %v3889_v47 = vmax.f32 %v2822_v6, %v2826_v44  ;;  %v2828_v48 = vpop.f32.mrb[35].mxu0 }
 0x276   :  { %v3910_v40 = vmax.f32 %v2824_v43, %v2828_v48 }
 0x277   :  { %2648 = vmatmul.mubr.bf16.gmra.mrb[104].mxu1 %v6728_v7 }
 0x278   :  { %3051 = vmatmul.mubr.bf16.gmra.mrb[124].mxu0 %v6761_v22  ;;  %2657 = vmatprep.mubr.bf16.mxu1 %v5737_v0 }
 0x279   :  { %v5098_v42 = vpop.f32.mrb[16].mxu1  ;;  %3060 = vmatprep.mubr.bf16.mxu0 %v5737_v0 }
 0x27a   :  { %v1901_v51 = vadd.f32 %v6758_v29, %v5098_v42  ;;  %v1892_v57 = vpop.f32.mrb[17].mxu1  ;;  %v2832_v38 = vpop.f32.mrb[36].mxu0 }
 0x27b   :  { %v1893_v37 = vadd.f32 %v6758_v29, %v1892_v57  ;;  %v3890_v28 = vmax.f32 %v3889_v47, %v2832_v38  ;;  %v5099_v9 = vpop.f32.mrb[18].mxu1  ;;  %v2834_v15 = vpop.f32.mrb[37].mxu0 }
 0x27c   :  { %v1904_v59 = vadd.f32 %v6758_v29, %v5099_v9  ;;  %v3911_v16 = vmax.f32 %v3910_v40, %v2834_v15  ;;  %v1895_v46 = vpop.f32.mrb[19].mxu1  ;;  %v2836_v63 = vpop.f32.mrb[38].mxu0  ;;  %v2005_v45 = vmax.f32 %v1901_v51, 0.0 }
 0x27d   :  { %v1896_v1 = vadd.f32 %v6758_v29, %v1895_v46  ;;  %v3891_v2 = vmax.f32 %v3890_v28, %v2836_v63  ;;  %v2838_v8 = vpop.f32.mrb[39].mxu0  ;;  %v2003_v10 = vmax.f32 %v1893_v37, 0.0 }
 0x27e   :  { %v2006_v24 = vmax.f32 %v1904_v59, 0.0  ;;  %v3912_v53 = vmax.f32 %v3911_v16, %v2838_v8 }
 0x27f   :  { %v2004_v11 = vmax.f32 %v1896_v1, 0.0  ;;  %2658 = vmatmul.mubr.bf16.gmra.mrb[108].mxu1 %v6719_v58 }
 0x280   :  { %v6778_v13 = vpack.c.bf16 %v2006_v24, %v2005_v45  ;;  %2667 = vmatprep.mubr.bf16.mxu1 %v5737_v0 }
 0x281   :  { %v6781_v14 = vpack.c.bf16 %v2004_v11, %v2003_v10 }
 0x283   :  { %3061 = vmatmul.mubr.bf16.gmra.mrb[128].mxu0 %v6781_v14 }
 0x284   :  { %3070 = vmatprep.mubr.bf16.mxu0 %v5737_v0 }
 0x285   :  { %v2842_v5 = vpop.f32.mrb[40].mxu0 }
 0x286   :  { %v3892_v21 = vmax.f32 %v3891_v2, %v2842_v5  ;;  %v2844_v25 = vpop.f32.mrb[41].mxu0 }
 0x287   :  { %v3913_v3 = vmax.f32 %v3912_v53, %v2844_v25  ;;  %2668 = vmatmul.mubr.bf16.gmra.mrb[112].mxu1 %v6745_v35  ;;  %v2846_v17 = vpop.f32.mrb[42].mxu0 }
 0x288   :  { %v3893_v31 = vmax.f32 %v3892_v21, %v2846_v17  ;;  %v2848_v32 = vpop.f32.mrb[43].mxu0  ;;  %2677 = vmatprep.mubr.bf16.mxu1 %v5737_v0 }
 0x289   :  { %v3914_v26 = vmax.f32 %v3913_v3, %v2848_v32 }
 0x28b   :  { %3071 = vmatmul.mubr.bf16.gmra.mrb[132].mxu0 %v6778_v13 }
 0x28c   :  { %v5102_v33 = vpop.f32.mrb[20].mxu1  ;;  %3080 = vmatprep.mubr.bf16.mxu0 %v5737_v0 }
 0x28d   :  { %v1917_v34 = vadd.f32 %v6758_v29, %v5102_v33  ;;  %v1908_v6 = vpop.f32.mrb[21].mxu1  ;;  %v2852_v43 = vpop.f32.mrb[44].mxu0 }
 0x28e   :  { %v1909_v44 = vadd.f32 %v6758_v29, %v1908_v6  ;;  %v3894_v47 = vmax.f32 %v3893_v31, %v2852_v43  ;;  %v5103_v48 = vpop.f32.mrb[22].mxu1  ;;  %v2854_v40 = vpop.f32.mrb[45].mxu0 }
 0x28f   :  { %v1920_v42 = vadd.f32 %v6758_v29, %v5103_v48  ;;  %v3915_v51 = vmax.f32 %v3914_v26, %v2854_v40  ;;  %v1911_v57 = vpop.f32.mrb[23].mxu1  ;;  %2678 = vmatmul.mubr.bf16.gmra.mrb[116].mxu1 %v6743_v12  ;;  %v2856_v38 = vpop.f32.mrb[46].mxu0  ;;  %v2009_v15 = vmax.f32 %v1917_v34, 0.0 }
 0x290   :  { %v1912_v37 = vadd.f32 %v6758_v29, %v1911_v57  ;;  %v3895_v28 = vmax.f32 %v3894_v47, %v2856_v38  ;;  %v2858_v9 = vpop.f32.mrb[47].mxu0  ;;  %2687 = vmatprep.mubr.bf16.mxu1 %v5737_v0  ;;  %v2007_v46 = vmax.f32 %v1909_v44, 0.0 }
 0x291   :  { %v2010_v59 = vmax.f32 %v1920_v42, 0.0  ;;  %v3916_v16 = vmax.f32 %v3915_v51, %v2858_v9 }
 0x292   :  { %v2008_v63 = vmax.f32 %v1912_v37, 0.0 }
 0x293   :  { %v6795_v1 = vpack.c.bf16 %v2010_v59, %v2009_v15 }
 0x294   :  { %v6797_v2 = vpack.c.bf16 %v2008_v63, %v2007_v46 }
 0x296   :  { %3081 = vmatmul.mubr.bf16.gmra.mrb[136].mxu0 %v6797_v2 }
 0x297   :  { %2688 = vmatmul.mubr.bf16.gmra.mrb[120].mxu1 %v6763_v4  ;;  %3090 = vmatprep.mubr.bf16.mxu0 %v5737_v0 }
 0x298   :  { %v2862_v8 = vpop.f32.mrb[48].mxu0  ;;  %2697 = vmatprep.mubr.bf16.mxu1 %v5737_v0 }
 0x299   :  { %v3896_v45 = vmax.f32 %v3895_v28, %v2862_v8  ;;  %v2864_v24 = vpop.f32.mrb[49].mxu0 }
 0x29a   :  { %v3917_v53 = vmax.f32 %v3916_v16, %v2864_v24  ;;  %v2866_v10 = vpop.f32.mrb[50].mxu0 }
 0x29b   :  { %v3897_v11 = vmax.f32 %v3896_v45, %v2866_v10  ;;  %v2868_v5 = vpop.f32.mrb[51].mxu0 }
 0x29c   :  { %v3918_v21 = vmax.f32 %v3917_v53, %v2868_v5 }
 0x29e   :  { %3091 = vmatmul.mubr.bf16.gmra.mrb[140].mxu0 %v6795_v1 }
 0x29f   :  { %v5106_v25 = vpop.f32.mrb[24].mxu1  ;;  %2698 = vmatmul.mubr.bf16.gmra.mrb[124].mxu1 %v6761_v22  ;;  %3100 = vmatprep.mubr.bf16.mxu0 %v5737_v0 }
 0x2a0   :  { %v1933_v3 = vadd.f32 %v6758_v29, %v5106_v25  ;;  %v1924_v17 = vpop.f32.mrb[25].mxu1  ;;  %v2872_v31 = vpop.f32.mrb[52].mxu0  ;;  %2707 = vmatprep.mubr.bf16.mxu1 %v5737_v0 }
 0x2a1   :  { %v1925_v32 = vadd.f32 %v6758_v29, %v1924_v17  ;;  %v3898_v26 = vmax.f32 %v3897_v11, %v2872_v31  ;;  %v5107_v33 = vpop.f32.mrb[26].mxu1  ;;  %v2874_v34 = vpop.f32.mrb[53].mxu0 }
 0x2a2   :  { %v1936_v6 = vadd.f32 %v6758_v29, %v5107_v33  ;;  %v3919_v43 = vmax.f32 %v3918_v21, %v2874_v34  ;;  %v1927_v44 = vpop.f32.mrb[27].mxu1  ;;  %v2876_v47 = vpop.f32.mrb[54].mxu0  ;;  %v2013_v51 = vmax.f32 %v1933_v3, 0.0 }
 0x2a3   :  { %v1928_v48 = vadd.f32 %v6758_v29, %v1927_v44  ;;  %v3899_v40 = vmax.f32 %v3898_v26, %v2876_v47  ;;  %v2878_v42 = vpop.f32.mrb[55].mxu0  ;;  %v2011_v37 = vmax.f32 %v1925_v32, 0.0 }
 0x2a4   :  { %v2014_v57 = vmax.f32 %v1936_v6, 0.0  ;;  %v3920_v38 = vmax.f32 %v3919_v43, %v2878_v42 }
 0x2a5   :  { %v2012_v28 = vmax.f32 %v1928_v48, 0.0 }
 0x2a6   :  { %v6811_v9 = vpack.c.bf16 %v2014_v57, %v2013_v51 }
 0x2a7   :  { %v6813_v15 = vpack.c.bf16 %v2012_v28, %v2011_v37  ;;  %2708 = vmatmul.mubr.bf16.gmra.mrb[128].mxu1 %v6781_v14 }
 0x2a8   :  { %2717 = vmatprep.mubr.bf16.mxu1 %v5737_v0 }
 0x2a9   :  { %3101 = vmatmul.mubr.bf16.gmra.mrb[144].mxu0 %v6813_v15 }
 0x2aa   :  { %3110 = vmatprep.mubr.bf16.mxu0 %v5737_v0 }
 0x2ab   :  { %v2882_v59 = vpop.f32.mrb[56].mxu0 }
 0x2ac   :  { %v3900_v16 = vmax.f32 %v3899_v40, %v2882_v59  ;;  %v2884_v46 = vpop.f32.mrb[57].mxu0 }
 0x2ad   :  { %v3921_v63 = vmax.f32 %v3920_v38, %v2884_v46  ;;  %v2886_v8 = vpop.f32.mrb[58].mxu0 }
 0x2ae   :  { %v3901_v45 = vmax.f32 %v3900_v16, %v2886_v8  ;;  %v2888_v24 = vpop.f32.mrb[59].mxu0 }
 0x2af   :  { %v3922_v53 = vmax.f32 %v3921_v63, %v2888_v24  ;;  %2718 = vmatmul.mubr.bf16.gmra.mrb[132].mxu1 %v6778_v13 }
 0x2b0   :  { %2727 = vmatprep.mubr.bf16.mxu1 %v5737_v0 }
 0x2b1   :  { %3111 = vmatmul.mubr.bf16.gmra.mrb[148].mxu0 %v6811_v9 }
 0x2b2   :  { %v5110_v10 = vpop.f32.mrb[28].mxu1  ;;  %3120 = vmatprep.mubr.bf16.mxu0 %v5737_v0 }
 0x2b3   :  { %v1949_v11 = vadd.f32 %v6758_v29, %v5110_v10  ;;  %v1940_v5 = vpop.f32.mrb[29].mxu1  ;;  %v2892_v21 = vpop.f32.mrb[60].mxu0 }
 0x2b4   :  { %v1941_v25 = vadd.f32 %v6758_v29, %v1940_v5  ;;  %v3902_v3 = vmax.f32 %v3901_v45, %v2892_v21  ;;  %v5111_v17 = vpop.f32.mrb[30].mxu1  ;;  %v2894_v31 = vpop.f32.mrb[61].mxu0 }
 0x2b5   :  { %v1952_v32 = vadd.f32 %v6758_v29, %v5111_v17  ;;  %v3923_v26 = vmax.f32 %v3922_v53, %v2894_v31  ;;  %v1943_v33 = vpop.f32.mrb[31].mxu1  ;;  %v2896_v34 = vpop.f32.mrb[62].mxu0  ;;  %v2017_v47 = vmax.f32 %v1949_v11, 0.0 }
 0x2b6   :  { %v1944_v6 = vadd.f32 %v6758_v29, %v1943_v33  ;;  %v3903_v43 = vmax.f32 %v3902_v3, %v2896_v34  ;;  %v2898_v44 = vpop.f32.mrb[63].mxu0  ;;  %v2015_v42 = vmax.f32 %v1941_v25, 0.0 }
 0x2b7   :  { %v2018_v48 = vmax.f32 %v1952_v32, 0.0  ;;  %v3924_v40 = vmax.f32 %v3923_v26, %v2898_v44  ;;  %2728 = vmatmul.mubr.bf16.gmra.mrb[136].mxu1 %v6797_v2 }
 0x2b8   :  { %v2016_v51 = vmax.f32 %v1944_v6, 0.0  ;;  %v3904_v57 = vrot.slane %v3903_v43, 4  ;;  %2737 = vmatprep.mubr.bf16.mxu1 %v5737_v0 }
 0x2b9   :  { %v6829_v38 = vpack.c.bf16 %v2018_v48, %v2017_v47  ;;  %v3925_v37 = vrot.slane %v3924_v40, 4 }
 0x2ba   :  { %v6831_v28 = vpack.c.bf16 %v2016_v51, %v2015_v42  ;;  %v3905_v59 = vmax.f32 %v3903_v43, %v3904_v57  ;;  %v2469_v16 = vpop.f32.mrb[32].mxu1 }
 0x2bb   :  { %v3926_v29 = vmax.f32 %v3924_v40, %v3925_v37  ;;  %v2471_v46 = vpop.f32.mrb[33].mxu1 }
 0x2bc   :  { %v3906_v63 = vrot.slane %v3905_v59, 2  ;;  %v2473_v8 = vpop.f32.mrb[34].mxu1  ;;  %3121 = vmatmul.mubr.bf16.gmra.mrb[152].mxu0 %v6831_v28 }
 0x2bd   :  { %v3927_v45 = vrot.slane %v3926_v29, 2  ;;  %v3847_v24 = vmax.f32 %v2469_v16, %v2473_v8  ;;  %v2475_v53 = vpop.f32.mrb[35].mxu1  ;;  %3130 = vmatprep.mubr.bf16.mxu0 %v5737_v0 }
 0x2be   :  { %v3907_v10 = vmax.f32 %v3905_v59, %v3906_v63  ;;  %v3868_v11 = vmax.f32 %v2471_v46, %v2475_v53  ;;  %v2902_v5 = vpop.f32.mrb[64].mxu0 }
 0x2bf   :  { %v3928_v21 = vmax.f32 %v3926_v29, %v3927_v45  ;;  %2738 = vmatmul.mubr.bf16.gmra.mrb[140].mxu1 %v6795_v1  ;;  %v2904_v25 = vpop.f32.mrb[65].mxu0 }
 0x2c0   :  { %v3908_v3 = vrot.slane %v3907_v10, 1  ;;  %v2906_v17 = vpop.f32.mrb[66].mxu0  ;;  %2747 = vmatprep.mubr.bf16.mxu1 %v5737_v0 }
 0x2c1   :  { %v3929_v31 = vrot.slane %v3928_v21, 1  ;;  %v4057_v32 = vmax.f32 %v2902_v5, %v2906_v17  ;;  %v2908_v26 = vpop.f32.mrb[67].mxu0 }
 0x2c2   :  { %v6837_v33 = vmax.f32 %v3907_v10, %v3908_v3  ;;  %v4078_v34 = vmax.f32 %v2904_v25, %v2908_v26  ;;  %v2479_v6 = vpop.f32.mrb[36].mxu1 }
 0x2c3   :  { %v6839_v43 = vmax.f32 %v3928_v21, %v3929_v31  ;;  %v3848_v44 = vmax.f32 %v3847_v24, %v2479_v6  ;;  %v2481_v47 = vpop.f32.mrb[37].mxu1 }
 0x2c4   :  { %v3869_v48 = vmax.f32 %v3868_v11, %v2481_v47  ;;  %v2483_v40 = vpop.f32.mrb[38].mxu1  ;;  %3131 = vmatmul.mubr.bf16.gmra.mrb[156].mxu0 %v6829_v38 }
 0x2c5   :  { %v4556_v42 = vcombine.low %v6837_v33, %v6839_v43  ;;  %v3849_v51 = vmax.f32 %v3848_v44, %v2483_v40  ;;  %v2485_v57 = vpop.f32.mrb[39].mxu1  ;;  %3526 = vmatprep.mubr.bf16.mxu0 %v5737_v0 }
 0x2c6   :  { %v3870_v37 = vmax.f32 %v3869_v48, %v2485_v57  ;;  %v2912_v59 = vpop.f32.mrb[68].mxu0 }
 0x2c7   :  { %v4058_v16 = vmax.f32 %v4057_v32, %v2912_v59  ;;  %2748 = vmatmul.mubr.bf16.gmra.mrb[144].mxu1 %v6813_v15  ;;  %v2914_v29 = vpop.f32.mrb[69].mxu0 }
 0x2c8   :  { %v4079_v46 = vmax.f32 %v4078_v34, %v2914_v29  ;;  %v2916_v63 = vpop.f32.mrb[70].mxu0  ;;  %2757 = vmatprep.mubr.bf16.mxu1 %v5737_v0 }
 0x2c9   :  { %v4059_v8 = vmax.f32 %v4058_v16, %v2916_v63  ;;  %v2918_v45 = vpop.f32.mrb[71].mxu0 }
 0x2ca   :  { %v4080_v24 = vmax.f32 %v4079_v46, %v2918_v45  ;;  %v2489_v53 = vpop.f32.mrb[40].mxu1 }
 0x2cb   :  { %v3850_v10 = vmax.f32 %v3849_v51, %v2489_v53  ;;  %v2491_v11 = vpop.f32.mrb[41].mxu1 }
 0x2cc   :  { %v3871_v5 = vmax.f32 %v3870_v37, %v2491_v11  ;;  %v2493_v21 = vpop.f32.mrb[42].mxu1  ;;  %3527 = vmatmul.mubr.bf16.vlgmr.msra.gmra.mrb[160].mxu0 %v6457_v41 }
 0x2cd   :  { %v3851_v25 = vmax.f32 %v3850_v10, %v2493_v21  ;;  %v2495_v3 = vpop.f32.mrb[43].mxu1  ;;  %3536 = vmatprep.mubr.bf16.mxu0 %v5737_v0 }
 0x2ce   :  { %v3872_v17 = vmax.f32 %v3871_v5, %v2495_v3 }
 0x2cf   :  { %2758 = vmatmul.mubr.bf16.gmra.mrb[148].mxu1 %v6811_v9 }
 0x2d0   :  { %2767 = vmatprep.mubr.bf16.mxu1 %v5737_v0 }
 0x2d1   :  { %v2922_v31 = vpop.f32.mrb[72].mxu0 }
 0x2d2   :  { %v4060_v32 = vmax.f32 %v4059_v8, %v2922_v31  ;;  %v2499_v26 = vpop.f32.mrb[44].mxu1  ;;  %v2924_v34 = vpop.f32.mrb[73].mxu0 }
 0x2d3   :  { %v3852_v6 = vmax.f32 %v3851_v25, %v2499_v26  ;;  %v4081_v44 = vmax.f32 %v4080_v24, %v2924_v34  ;;  %v2501_v47 = vpop.f32.mrb[45].mxu1  ;;  %v2926_v48 = vpop.f32.mrb[74].mxu0 }
 0x2d4   :  { %v3873_v40 = vmax.f32 %v3872_v17, %v2501_v47  ;;  %v4061_v51 = vmax.f32 %v4060_v32, %v2926_v48  ;;  %v2503_v57 = vpop.f32.mrb[46].mxu1  ;;  %v2928_v37 = vpop.f32.mrb[75].mxu0  ;;  %3537 = vmatmul.mubr.bf16.gmra.mrb[164].mxu0 %v6453_v30 }
 0x2d5   :  { %v3853_v59 = vmax.f32 %v3852_v6, %v2503_v57  ;;  %v4082_v16 = vmax.f32 %v4081_v44, %v2928_v37  ;;  %v2505_v29 = vpop.f32.mrb[47].mxu1  ;;  %3546 = vmatprep.mubr.bf16.mxu0 %v5737_v0 }
 0x2d6   :  { %v3874_v46 = vmax.f32 %v3873_v40, %v2505_v29 }
 0x2d7   :  { %2768 = vmatmul.mubr.bf16.gmra.mrb[152].mxu1 %v6831_v28 }
 0x2d8   :  { %2777 = vmatprep.mubr.bf16.mxu1 %v5737_v0 }
 0x2d9   :  { %v2932_v63 = vpop.f32.mrb[76].mxu0 }
 0x2da   :  { %v4062_v8 = vmax.f32 %v4061_v51, %v2932_v63  ;;  %v2509_v45 = vpop.f32.mrb[48].mxu1  ;;  %v2934_v24 = vpop.f32.mrb[77].mxu0 }
 0x2db   :  { %v3854_v53 = vmax.f32 %v3853_v59, %v2509_v45  ;;  %v4083_v10 = vmax.f32 %v4082_v16, %v2934_v24  ;;  %v2511_v11 = vpop.f32.mrb[49].mxu1  ;;  %v2936_v5 = vpop.f32.mrb[78].mxu0 }
 0x2dc   :  { %v3875_v21 = vmax.f32 %v3874_v46, %v2511_v11  ;;  %v4063_v25 = vmax.f32 %v4062_v8, %v2936_v5  ;;  %v2513_v3 = vpop.f32.mrb[50].mxu1  ;;  %v2938_v17 = vpop.f32.mrb[79].mxu0  ;;  %3547 = vmatmul.mubr.bf16.gmra.mrb[168].mxu0 %v6495_v56 }
 0x2dd   :  { %v3855_v31 = vmax.f32 %v3854_v53, %v2513_v3  ;;  %v4084_v32 = vmax.f32 %v4083_v10, %v2938_v17  ;;  %v2515_v26 = vpop.f32.mrb[51].mxu1  ;;  %3556 = vmatprep.mubr.bf16.mxu0 %v5737_v0 }
 0x2de   :  { %v3876_v34 = vmax.f32 %v3875_v21, %v2515_v26 }
 0x2df   :  { %2778 = vmatmul.mubr.bf16.gmra.mrb[156].mxu1 %v6829_v38 }
 0x2e0   :  { %3173 = vmatprep.mubr.bf16.mxu1 %v5737_v0 }
 0x2e2   :  { %v2519_v6 = vpop.f32.mrb[52].mxu1 }
 0x2e3   :  { %v3856_v44 = vmax.f32 %v3855_v31, %v2519_v6  ;;  %v2521_v47 = vpop.f32.mrb[53].mxu1 }
 0x2e4   :  { %v3877_v48 = vmax.f32 %v3876_v34, %v2521_v47  ;;  %v2523_v40 = vpop.f32.mrb[54].mxu1  ;;  %v2942_v51 = vpop.f32.mrb[80].mxu0  ;;  %3557 = vmatmul.mubr.bf16.gmra.mrb[172].mxu0 %v6493_v36 }
 0x2e5   :  { %v3857_v57 = vmax.f32 %v3856_v44, %v2523_v40  ;;  %v4064_v37 = vmax.f32 %v4063_v25, %v2942_v51  ;;  %v2525_v59 = vpop.f32.mrb[55].mxu1  ;;  %v2944_v16 = vpop.f32.mrb[81].mxu0  ;;  %3566 = vmatprep.mubr.bf16.mxu0 %v5737_v0 }
 0x2e6   :  { %v3878_v29 = vmax.f32 %v3877_v48, %v2525_v59  ;;  %v4085_v46 = vmax.f32 %v4084_v32, %v2944_v16  ;;  %v2946_v63 = vpop.f32.mrb[82].mxu0 }
 0x2e7   :  { %v4065_v8 = vmax.f32 %v4064_v37, %v2946_v63  ;;  %v2948_v45 = vpop.f32.mrb[83].mxu0  ;;  %3174 = vmatmul.mubr.bf16.vlgmr.msra.gmra.mrb[160].mxu1 %v6457_v41 }
 0x2e8   :  { %v4086_v24 = vmax.f32 %v4085_v46, %v2948_v45  ;;  %3183 = vmatprep.mubr.bf16.mxu1 %v5737_v0 }
 0x2ea   :  { %v2529_v53 = vpop.f32.mrb[56].mxu1 }
 0x2eb   :  { %v3858_v10 = vmax.f32 %v3857_v57, %v2529_v53  ;;  %v2531_v11 = vpop.f32.mrb[57].mxu1 }
 0x2ec   :  { %v3879_v5 = vmax.f32 %v3878_v29, %v2531_v11  ;;  %v2533_v21 = vpop.f32.mrb[58].mxu1  ;;  %v2952_v25 = vpop.f32.mrb[84].mxu0  ;;  %3567 = vmatmul.mubr.bf16.gmra.mrb[176].mxu0 %v6525_v50 }
 0x2ed   :  { %v3859_v3 = vmax.f32 %v3858_v10, %v2533_v21  ;;  %v4066_v17 = vmax.f32 %v4065_v8, %v2952_v25  ;;  %v2535_v31 = vpop.f32.mrb[59].mxu1  ;;  %v2954_v32 = vpop.f32.mrb[85].mxu0  ;;  %3576 = vmatprep.mubr.bf16.mxu0 %v5737_v0 }
 0x2ee   :  { %v3880_v26 = vmax.f32 %v3879_v5, %v2535_v31  ;;  %v4087_v34 = vmax.f32 %v4086_v24, %v2954_v32  ;;  %v2956_v41 = vpop.f32.mrb[86].mxu0 }
 0x2ef   :  { %v4067_v6 = vmax.f32 %v4066_v17, %v2956_v41  ;;  %v2958_v44 = vpop.f32.mrb[87].mxu0  ;;  %3184 = vmatmul.mubr.bf16.gmra.mrb[164].mxu1 %v6453_v30 }
 0x2f0   :  { %v4088_v47 = vmax.f32 %v4087_v34, %v2958_v44  ;;  %3193 = vmatprep.mubr.bf16.mxu1 %v5737_v0 }
 0x2f2   :  { %v2539_v48 = vpop.f32.mrb[60].mxu1 }
 0x2f3   :  { %v3860_v40 = vmax.f32 %v3859_v3, %v2539_v48  ;;  %v2541_v51 = vpop.f32.mrb[61].mxu1 }
 0x2f4   :  { %v3881_v57 = vmax.f32 %v3880_v26, %v2541_v51  ;;  %v2543_v37 = vpop.f32.mrb[62].mxu1  ;;  %3577 = vmatmul.mubr.bf16.gmra.mrb[180].mxu0 %v6523_v60 }
 0x2f5   :  { %v3861_v59 = vmax.f32 %v3860_v40, %v2543_v37  ;;  %v2545_v16 = vpop.f32.mrb[63].mxu1  ;;  %3586 = vmatprep.mubr.bf16.mxu0 %v5737_v0 }
 0x2f6   :  { %v3882_v29 = vmax.f32 %v3881_v57, %v2545_v16 }
 0x2f7   :  { %v3862_v46 = vrot.slane %v3861_v59, 4  ;;  %v2962_v63 = vpop.f32.mrb[88].mxu0  ;;  %3194 = vmatmul.mubr.bf16.gmra.mrb[168].mxu1 %v6495_v56 }
 0x2f8   :  { %v3883_v30 = vrot.slane %v3882_v29, 4  ;;  %v4068_v8 = vmax.f32 %v4067_v6, %v2962_v63  ;;  %v2964_v45 = vpop.f32.mrb[89].mxu0  ;;  %3203 = vmatprep.mubr.bf16.mxu1 %v5737_v0 }
 0x2f9   :  { %v3863_v24 = vmax.f32 %v3861_v59, %v3862_v46  ;;  %v4089_v53 = vmax.f32 %v4088_v47, %v2964_v45  ;;  %v2966_v10 = vpop.f32.mrb[90].mxu0 }
 0x2fa   :  { %v3884_v11 = vmax.f32 %v3882_v29, %v3883_v30  ;;  %v4069_v5 = vmax.f32 %v4068_v8, %v2966_v10  ;;  %v2549_v21 = vpop.f32.mrb[64].mxu1  ;;  %v2968_v25 = vpop.f32.mrb[91].mxu0 }
 0x2fb   :  { %v3864_v3 = vrot.slane %v3863_v24, 2  ;;  %v4090_v17 = vmax.f32 %v4089_v53, %v2968_v25  ;;  %v2551_v31 = vpop.f32.mrb[65].mxu1 }
 0x2fc   :  { %v3885_v32 = vrot.slane %v3884_v11, 2  ;;  %v2553_v26 = vpop.f32.mrb[66].mxu1  ;;  %3587 = vmatmul.mubr.bf16.gmra.mrb[184].mxu0 %v6559_v18 }
 0x2fd   :  { %v3865_v56 = vmax.f32 %v3863_v24, %v3864_v3  ;;  %v4015_v34 = vmax.f32 %v2549_v21, %v2553_v26  ;;  %v2555_v41 = vpop.f32.mrb[67].mxu1  ;;  %3596 = vmatprep.mubr.bf16.mxu0 %v5737_v0 }
 0x2fe   :  { %v3886_v6 = vmax.f32 %v3884_v11, %v3885_v32  ;;  %v4036_v44 = vmax.f32 %v2551_v31, %v2555_v41 }
 0x2ff   :  { %v3866_v47 = vrot.slane %v3865_v56, 1  ;;  %v2972_v48 = vpop.f32.mrb[92].mxu0  ;;  %3204 = vmatmul.mubr.bf16.gmra.mrb[172].mxu1 %v6493_v36 }
 0x300   :  { %v3887_v40 = vrot.slane %v3886_v6, 1  ;;  %v4070_v51 = vmax.f32 %v4069_v5, %v2972_v48  ;;  %v2974_v57 = vpop.f32.mrb[93].mxu0  ;;  %3213 = vmatprep.mubr.bf16.mxu1 %v5737_v0 }
 0x301   :  { %v6875_v37 = vmax.f32 %v3865_v56, %v3866_v47  ;;  %v4091_v59 = vmax.f32 %v4090_v17, %v2974_v57  ;;  %v2976_v16 = vpop.f32.mrb[94].mxu0 }
 0x302   :  { %v6877_v29 = vmax.f32 %v3886_v6, %v3887_v40  ;;  %v4071_v46 = vmax.f32 %v4070_v51, %v2976_v16  ;;  %v2559_v63 = vpop.f32.mrb[68].mxu1  ;;  %v2978_v30 = vpop.f32.mrb[95].mxu0 }
 0x303   :  { %v4016_v8 = vmax.f32 %v4015_v34, %v2559_v63  ;;  %v4092_v45 = vmax.f32 %v4091_v59, %v2978_v30  ;;  %v2561_v24 = vpop.f32.mrb[69].mxu1 }
 0x304   :  { %v4555_v36 = vcombine.low %v6875_v37, %v6877_v29  ;;  %v4072_v53 = vrot.slane %v4071_v46, 4  ;;  %v4037_v10 = vmax.f32 %v4036_v44, %v2561_v24  ;;  %v2563_v11 = vpop.f32.mrb[70].mxu1  ;;  %3597 = vmatmul.mubr.bf16.gmra.mrb[188].mxu0 %v6557_v23 }
 0x305   :  { %v4093_v5 = vrot.slane %v4092_v45, 4  ;;  %v4017_v21 = vmax.f32 %v4016_v8, %v2563_v11  ;;  %v2565_v25 = vpop.f32.mrb[71].mxu1  ;;  %3606 = vmatprep.mubr.bf16.mxu0 %v5737_v0 }
 0x306   :  { %v4073_v3 = vmax.f32 %v4071_v46, %v4072_v53  ;;  %v4038_v17 = vmax.f32 %v4037_v10, %v2565_v25 }
 0x307   :  { %v4094_v31 = vmax.f32 %v4092_v45, %v4093_v5  ;;  %3214 = vmatmul.mubr.bf16.gmra.mrb[176].mxu1 %v6525_v50 }
 0x308   :  { %v4074_v32 = vrot.slane %v4073_v3, 2  ;;  %3223 = vmatprep.mubr.bf16.mxu1 %v5737_v0 }
 0x309   :  { %v4095_v26 = vrot.slane %v4094_v31, 2 }
 0x30a   :  { %v4075_v56 = vmax.f32 %v4073_v3, %v4074_v32  ;;  %v2569_v34 = vpop.f32.mrb[72].mxu1  ;;  %v2982_v41 = vpop.f32.mrb[96].mxu0 }
 0x30b   :  { %v4096_v6 = vmax.f32 %v4094_v31, %v4095_v26  ;;  %v4018_v44 = vmax.f32 %v4017_v21, %v2569_v34  ;;  %v2571_v47 = vpop.f32.mrb[73].mxu1  ;;  %v2984_v48 = vpop.f32.mrb[97].mxu0 }
 0x30c   :  { %v4076_v40 = vrot.slane %v4075_v56, 1  ;;  %v4039_v51 = vmax.f32 %v4038_v17, %v2571_v47  ;;  %v2573_v57 = vpop.f32.mrb[74].mxu1  ;;  %v2986_v59 = vpop.f32.mrb[98].mxu0  ;;  %3607 = vmatmul.mubr.bf16.gmra.mrb[192].mxu0 %v6591_v55 }
 0x30d   :  { %v4097_v16 = vrot.slane %v4096_v6, 1  ;;  %v4019_v46 = vmax.f32 %v4018_v44, %v2573_v57  ;;  %v4225_v50 = vmax.f32 %v2982_v41, %v2986_v59  ;;  %v2575_v63 = vpop.f32.mrb[75].mxu1  ;;  %v2988_v30 = vpop.f32.mrb[99].mxu0  ;;  %3616 = vmatprep.mubr.bf16.mxu0 %v5737_v0 }
 0x30e   :  { %v4077_v8 = vmax.f32 %v4075_v56, %v4076_v40  ;;  %v4040_v45 = vmax.f32 %v4039_v51, %v2575_v63  ;;  %v4246_v24 = vmax.f32 %v2984_v48, %v2988_v30 }
 0x30f   :  { %v4098_v53 = vmax.f32 %v4096_v6, %v4097_v16  ;;  %3224 = vmatmul.mubr.bf16.gmra.mrb[180].mxu1 %v6523_v60 }
 0x310   :  { %3233 = vmatprep.mubr.bf16.mxu1 %v5737_v0 }
 0x311   :  { %v4560_v10 = vcombine.low %v4077_v8, %v4098_v53 }
 0x312   :  { %v2579_v11 = vpop.f32.mrb[76].mxu1  ;;  %v2992_v5 = vpop.f32.mrb[100].mxu0 }
 0x313   :  { %v4586_v21 = vrot.slane %v4560_v10, 7  ;;  %v4020_v25 = vmax.f32 %v4019_v46, %v2579_v11  ;;  %v4226_v3 = vmax.f32 %v4225_v50, %v2992_v5  ;;  %v2581_v17 = vpop.f32.mrb[77].mxu1  ;;  %v2994_v31 = vpop.f32.mrb[101].mxu0 }
 0x314   :  { %v4041_v32 = vmax.f32 %v4040_v45, %v2581_v17  ;;  %v4247_v26 = vmax.f32 %v4246_v24, %v2994_v31  ;;  %v2583_v56 = vpop.f32.mrb[78].mxu1  ;;  %v2996_v34 = vpop.f32.mrb[102].mxu0  ;;  %3617 = vmatmul.mubr.bf16.gmra.mrb[196].mxu0 %v6585_v54 }
 0x315   :  { %v4587_v60 = vsel %vm4572_vm1, %v4586_v21, %v4556_v42  ;;  %v4021_v41 = vmax.f32 %v4020_v25, %v2583_v56  ;;  %v4227_v6 = vmax.f32 %v4226_v3, %v2996_v34  ;;  %v2585_v44 = vpop.f32.mrb[79].mxu1  ;;  %v2998_v47 = vpop.f32.mrb[103].mxu0  ;;  %3626 = vmatprep.mubr.bf16.mxu0 %v5737_v0 }
 0x316   :  { %v6896_v48 = vsel %vm4574_vm2, %v4586_v21, %v4587_v60  ;;  %v4042_v40 = vmax.f32 %v4041_v32, %v2585_v44  ;;  %v4248_v51 = vmax.f32 %v4247_v26, %v2998_v47 }
 0x317   :  { %3234 = vmatmul.mubr.bf16.gmra.mrb[184].mxu1 %v6559_v18 }
 0x318   :  { %3243 = vmatprep.mubr.bf16.mxu1 %v5737_v0 }
 0x31a   :  { %v2589_v57 = vpop.f32.mrb[80].mxu1 }
 0x31b   :  { %v4022_v59 = vmax.f32 %v4021_v41, %v2589_v57  ;;  %v2591_v33 = vpop.f32.mrb[81].mxu1 }
 0x31c   :  { %v4043_v43 = vmax.f32 %v4042_v40, %v2591_v33  ;;  %v2593_v42 = vpop.f32.mrb[82].mxu1  ;;  %3627 = vmatmul.mubr.bf16.gmra.mrb[200].mxu0 %v6625_v20 }
 0x31d   :  { %v4023_v16 = vmax.f32 %v4022_v59, %v2593_v42  ;;  %v2595_v46 = vpop.f32.mrb[83].mxu1  ;;  %v3002_v50 = vpop.f32.mrb[104].mxu0  ;;  %3636 = vmatprep.mubr.bf16.mxu0 %v5737_v0 }
 0x31e   :  { %v4044_v63 = vmax.f32 %v4043_v43, %v2595_v46  ;;  %v4228_v30 = vmax.f32 %v4227_v6, %v3002_v50  ;;  %v3004_v8 = vpop.f32.mrb[105].mxu0 }
 0x31f   :  { %v4249_v45 = vmax.f32 %v4248_v51, %v3004_v8  ;;  %v3006_v24 = vpop.f32.mrb[106].mxu0  ;;  %3244 = vmatmul.mubr.bf16.gmra.mrb[188].mxu1 %v6557_v23 }
 0x320   :  { %v4229_v18 = vmax.f32 %v4228_v30, %v3006_v24  ;;  %v3008_v53 = vpop.f32.mrb[107].mxu0  ;;  %3253 = vmatprep.mubr.bf16.mxu1 %v5737_v0 }
 0x321   :  { %v4250_v10 = vmax.f32 %v4249_v45, %v3008_v53 }
 0x322   :  { %v2599_v11 = vpop.f32.mrb[84].mxu1 }
 0x323   :  { %v4024_v5 = vmax.f32 %v4023_v16, %v2599_v11  ;;  %v2601_v21 = vpop.f32.mrb[85].mxu1 }
 0x324   :  { %v4045_v25 = vmax.f32 %v4044_v63, %v2601_v21  ;;  %v2603_v3 = vpop.f32.mrb[86].mxu1  ;;  %3637 = vmatmul.mubr.bf16.gmra.mrb[204].mxu0 %v6623_v19 }
 0x325   :  { %v4025_v17 = vmax.f32 %v4024_v5, %v2603_v3  ;;  %v2605_v31 = vpop.f32.mrb[87].mxu1  ;;  %v3012_v32 = vpop.f32.mrb[108].mxu0  ;;  %3646 = vmatprep.mubr.bf16.mxu0 %v5737_v0 }
 0x326   :  { %v4046_v26 = vmax.f32 %v4045_v25, %v2605_v31  ;;  %v4230_v56 = vmax.f32 %v4229_v18, %v3012_v32  ;;  %v3014_v23 = vpop.f32.mrb[109].mxu0 }
 0x327   :  { %v4251_v34 = vmax.f32 %v4250_v10, %v3014_v23  ;;  %v3016_v60 = vpop.f32.mrb[110].mxu0  ;;  %3254 = vmatmul.mubr.bf16.gmra.mrb[192].mxu1 %v6591_v55 }
 0x328   :  { %v4231_v41 = vmax.f32 %v4230_v56, %v3016_v60  ;;  %v3018_v6 = vpop.f32.mrb[111].mxu0  ;;  %3263 = vmatprep.mubr.bf16.mxu1 %v5737_v0 }
 0x329   :  { %v4252_v44 = vmax.f32 %v4251_v34, %v3018_v6 }
 0x32a   :  { %v2609_v47 = vpop.f32.mrb[88].mxu1 }
 0x32b   :  { %v4026_v40 = vmax.f32 %v4025_v17, %v2609_v47  ;;  %v2611_v51 = vpop.f32.mrb[89].mxu1 }
 0x32c   :  { %v4047_v57 = vmax.f32 %v4046_v26, %v2611_v51  ;;  %v2613_v59 = vpop.f32.mrb[90].mxu1  ;;  %3647 = vmatmul.mubr.bf16.gmra.mrb[208].mxu0 %v6653_v39 }
 0x32d   :  { %v4027_v33 = vmax.f32 %v4026_v40, %v2613_v59  ;;  %v2615_v43 = vpop.f32.mrb[91].mxu1  ;;  %3656 = vmatprep.mubr.bf16.mxu0 %v5737_v0 }
 0x32e   :  { %v4048_v42 = vmax.f32 %v4047_v57, %v2615_v43 }
 0x32f   :  { %3264 = vmatmul.mubr.bf16.gmra.mrb[196].mxu1 %v6585_v54 }
 0x330   :  { %v3022_v55 = vpop.f32.mrb[112].mxu0  ;;  %3273 = vmatprep.mubr.bf16.mxu1 %v5737_v0 }
 0x331   :  { %v4232_v16 = vmax.f32 %v4231_v41, %v3022_v55  ;;  %v3024_v46 = vpop.f32.mrb[113].mxu0 }
 0x332   :  { %v4253_v50 = vmax.f32 %v4252_v44, %v3024_v46  ;;  %v2619_v63 = vpop.f32.mrb[92].mxu1  ;;  %v3026_v30 = vpop.f32.mrb[114].mxu0 }
 0x333   :  { %v4028_v8 = vmax.f32 %v4027_v33, %v2619_v63  ;;  %v4233_v45 = vmax.f32 %v4232_v16, %v3026_v30  ;;  %v2621_v24 = vpop.f32.mrb[93].mxu1  ;;  %v3028_v18 = vpop.f32.mrb[115].mxu0 }
 0x334   :  { %v4049_v53 = vmax.f32 %v4048_v42, %v2621_v24  ;;  %v4254_v10 = vmax.f32 %v4253_v50, %v3028_v18  ;;  %v2623_v11 = vpop.f32.mrb[94].mxu1  ;;  %3657 = vmatmul.mubr.bf16.gmra.mrb[212].mxu0 %v6651_v49 }
 0x335   :  { %v4029_v5 = vmax.f32 %v4028_v8, %v2623_v11  ;;  %v2625_v21 = vpop.f32.mrb[95].mxu1  ;;  %3666 = vmatprep.mubr.bf16.mxu0 %v5737_v0 }
 0x336   :  { %v4050_v54 = vmax.f32 %v4049_v53, %v2625_v21 }
 0x337   :  { %v4030_v25 = vrot.slane %v4029_v5, 4  ;;  %3274 = vmatmul.mubr.bf16.gmra.mrb[200].mxu1 %v6625_v20 }
 0x338   :  { %v4051_v3 = vrot.slane %v4050_v54, 4  ;;  %v3032_v17 = vpop.f32.mrb[116].mxu0  ;;  %3283 = vmatprep.mubr.bf16.mxu1 %v5737_v0 }
 0x339   :  { %v4031_v31 = vmax.f32 %v4029_v5, %v4030_v25  ;;  %v4234_v32 = vmax.f32 %v4233_v45, %v3032_v17  ;;  %v3034_v26 = vpop.f32.mrb[117].mxu0 }
 0x33a   :  { %v4052_v56 = vmax.f32 %v4050_v54, %v4051_v3  ;;  %v4255_v23 = vmax.f32 %v4254_v10, %v3034_v26  ;;  %v2629_v34 = vpop.f32.mrb[96].mxu1  ;;  %v3036_v60 = vpop.f32.mrb[118].mxu0 }
 0x33b   :  { %v4032_v41 = vrot.slane %v4031_v31, 2  ;;  %v4235_v6 = vmax.f32 %v4234_v32, %v3036_v60  ;;  %v2631_v44 = vpop.f32.mrb[97].mxu1  ;;  %v3038_v47 = vpop.f32.mrb[119].mxu0 }
 0x33c   :  { %v4053_v40 = vrot.slane %v4052_v56, 2  ;;  %v4256_v51 = vmax.f32 %v4255_v23, %v3038_v47  ;;  %v2633_v57 = vpop.f32.mrb[98].mxu1  ;;  %3667 = vmatmul.mubr.bf16.gmra.mrb[216].mxu0 %v6671_v62 }
 0x33d   :  { %v4033_v20 = vmax.f32 %v4031_v31, %v4032_v41  ;;  %v4183_v59 = vmax.f32 %v2629_v34, %v2633_v57  ;;  %v2635_v33 = vpop.f32.mrb[99].mxu1  ;;  %3676 = vmatprep.mubr.bf16.mxu0 %v5737_v0 }
 0x33e   :  { %v4054_v43 = vmax.f32 %v4052_v56, %v4053_v40  ;;  %v4204_v42 = vmax.f32 %v2631_v44, %v2635_v33 }
 0x33f   :  { %v4034_v55 = vrot.slane %v4033_v20, 1  ;;  %3284 = vmatmul.mubr.bf16.gmra.mrb[204].mxu1 %v6623_v19 }
 0x340   :  { %v4055_v16 = vrot.slane %v4054_v43, 1  ;;  %3293 = vmatprep.mubr.bf16.mxu1 %v5737_v0 }
 0x341   :  { %v4035_v46 = vmax.f32 %v4033_v20, %v4034_v55 }
 0x342   :  { %v4056_v50 = vmax.f32 %v4054_v43, %v4055_v16  ;;  %v2639_v63 = vpop.f32.mrb[100].mxu1 }
 0x343   :  { %v4184_v30 = vmax.f32 %v4183_v59, %v2639_v63  ;;  %v2641_v8 = vpop.f32.mrb[101].mxu1  ;;  %v3042_v45 = vpop.f32.mrb[120].mxu0 }
 0x344   :  { %v4559_v24 = vcombine.low %v4035_v46, %v4056_v50  ;;  %v4205_v18 = vmax.f32 %v4204_v42, %v2641_v8  ;;  %v4236_v53 = vmax.f32 %v4235_v6, %v3042_v45  ;;  %v2643_v10 = vpop.f32.mrb[102].mxu1  ;;  %v3044_v11 = vpop.f32.mrb[121].mxu0  ;;  %3677 = vmatmul.mubr.bf16.gmra.mrb[220].mxu0 %v6669_v61 }
 0x345   :  { %v4185_v5 = vmax.f32 %v4184_v30, %v2643_v10  ;;  %v4257_v21 = vmax.f32 %v4256_v51, %v3044_v11  ;;  %v2645_v54 = vpop.f32.mrb[103].mxu1  ;;  %v3046_v19 = vpop.f32.mrb[122].mxu0  ;;  %3686 = vmatprep.mubr.bf16.mxu0 %v5737_v0 }
 0x346   :  { %v4571_v25 = vrot.slane %v4559_v24, 7  ;;  %v4206_v3 = vmax.f32 %v4205_v18, %v2645_v54  ;;  %v4237_v17 = vmax.f32 %v4236_v53, %v3046_v19  ;;  %v3048_v31 = vpop.f32.mrb[123].mxu0 }
 0x347   :  { %v4258_v32 = vmax.f32 %v4257_v21, %v3048_v31  ;;  %3294 = vmatmul.mubr.bf16.gmra.mrb[208].mxu1 %v6653_v39 }
 0x348   :  { %v4573_v26 = vsel %vm4572_vm1, %v4571_v25, %v4555_v36  ;;  %3303 = vmatprep.mubr.bf16.mxu1 %v5737_v0 }
 0x349   :  { %v6929_v56 = vsel %vm4574_vm2, %v4571_v25, %v4573_v26 }
 0x34a   :  { %v2649_v23 = vpop.f32.mrb[104].mxu1 }
 0x34b   :  { %v4186_v34 = vmax.f32 %v4185_v5, %v2649_v23  ;;  %v2651_v60 = vpop.f32.mrb[105].mxu1  ;;  %v3052_v41 = vpop.f32.mrb[124].mxu0 }
 0x34c   :  { %v4207_v6 = vmax.f32 %v4206_v3, %v2651_v60  ;;  %v4238_v44 = vmax.f32 %v4237_v17, %v3052_v41  ;;  %v2653_v47 = vpop.f32.mrb[106].mxu1  ;;  %v3054_v40 = vpop.f32.mrb[125].mxu0  ;;  %3687 = vmatmul.mubr.bf16.gmra.mrb[224].mxu0 %v6699_v52 }
 0x34d   :  { %v4187_v39 = vmax.f32 %v4186_v34, %v2653_v47  ;;  %v4259_v51 = vmax.f32 %v4258_v32, %v3054_v40  ;;  %v2655_v37 = vpop.f32.mrb[107].mxu1  ;;  %v3056_v29 = vpop.f32.mrb[126].mxu0  ;;  %3696 = vmatprep.mubr.bf16.mxu0 %v5737_v0 }
 0x34e   :  { %v4208_v36 = vmax.f32 %v4207_v6, %v2655_v37  ;;  %v4239_v57 = vmax.f32 %v4238_v44, %v3056_v29  ;;  %v3058_v20 = vpop.f32.mrb[127].mxu0 }
 0x34f   :  { %v4260_v59 = vmax.f32 %v4259_v51, %v3058_v20  ;;  %3304 = vmatmul.mubr.bf16.gmra.mrb[212].mxu1 %v6651_v49 }
 0x350   :  { %v4240_v33 = vrot.slane %v4239_v57, 4  ;;  %3313 = vmatprep.mubr.bf16.mxu1 %v5737_v0 }
 0x351   :  { %v4261_v43 = vrot.slane %v4260_v59, 4 }
 0x352   :  { %v4241_v42 = vmax.f32 %v4239_v57, %v4240_v33  ;;  %v2659_v55 = vpop.f32.mrb[108].mxu1 }
 0x353   :  { %v4262_v16 = vmax.f32 %v4260_v59, %v4261_v43  ;;  %v4188_v46 = vmax.f32 %v4187_v39, %v2659_v55  ;;  %v2661_v50 = vpop.f32.mrb[109].mxu1 }
 0x354   :  { %v4242_v63 = vrot.slane %v4241_v42, 2  ;;  %v4209_v30 = vmax.f32 %v4208_v36, %v2661_v50  ;;  %v2663_v8 = vpop.f32.mrb[110].mxu1  ;;  %3697 = vmatmul.mubr.bf16.gmra.mrb[228].mxu0 %v6697_v27 }
 0x355   :  { %v4263_v45 = vrot.slane %v4262_v16, 2  ;;  %v4189_v24 = vmax.f32 %v4188_v46, %v2663_v8  ;;  %v2665_v18 = vpop.f32.mrb[111].mxu1  ;;  %3706 = vmatprep.mubr.bf16.mxu0 %v5737_v0 }
 0x356   :  { %v4243_v49 = vmax.f32 %v4241_v42, %v4242_v63  ;;  %v4210_v53 = vmax.f32 %v4209_v30, %v2665_v18  ;;  %v3062_v10 = vpop.f32.mrb[128].mxu0 }
 0x357   :  { %v4264_v11 = vmax.f32 %v4262_v16, %v4263_v45  ;;  %v3064_v5 = vpop.f32.mrb[129].mxu0  ;;  %3314 = vmatmul.mubr.bf16.gmra.mrb[216].mxu1 %v6671_v62 }
 0x358   :  { %v4244_v21 = vrot.slane %v4243_v49, 1  ;;  %v3066_v54 = vpop.f32.mrb[130].mxu0  ;;  %3323 = vmatprep.mubr.bf16.mxu1 %v5737_v0 }
 0x359   :  { %v4265_v19 = vrot.slane %v4264_v11, 1  ;;  %v4393_v25 = vmax.f32 %v3062_v10, %v3066_v54  ;;  %v3068_v3 = vpop.f32.mrb[131].mxu0 }
 0x35a   :  { %v4245_v17 = vmax.f32 %v4243_v49, %v4244_v21  ;;  %v4414_v31 = vmax.f32 %v3064_v5, %v3068_v3  ;;  %v2669_v32 = vpop.f32.mrb[112].mxu1 }
 0x35b   :  { %v4266_v26 = vmax.f32 %v4264_v11, %v4265_v19  ;;  %v4190_v23 = vmax.f32 %v4189_v24, %v2669_v32  ;;  %v2671_v34 = vpop.f32.mrb[113].mxu1 }
 0x35c   :  { %v4211_v60 = vmax.f32 %v4210_v53, %v2671_v34  ;;  %v2673_v41 = vpop.f32.mrb[114].mxu1  ;;  %3707 = vmatmul.mubr.bf16.gmra.mrb[232].mxu0 %v6728_v7 }
 0x35d   :  { %v4564_v6 = vcombine.low %v4245_v17, %v4266_v26  ;;  %v4191_v44 = vmax.f32 %v4190_v23, %v2673_v41  ;;  %v2675_v62 = vpop.f32.mrb[115].mxu1  ;;  %3716 = vmatprep.mubr.bf16.mxu0 %v5737_v0 }
 0x35e   :  { %v4212_v47 = vmax.f32 %v4211_v60, %v2675_v62  ;;  %v3072_v40 = vpop.f32.mrb[132].mxu0 }
 0x35f   :  { %v4589_v39 = vrot.slane %v4564_v6, 6  ;;  %v4394_v51 = vmax.f32 %v4393_v25, %v3072_v40  ;;  %v3074_v37 = vpop.f32.mrb[133].mxu0  ;;  %3324 = vmatmul.mubr.bf16.gmra.mrb[220].mxu1 %v6669_v61 }
 0x360   :  { %v4415_v29 = vmax.f32 %v4414_v31, %v3074_v37  ;;  %v3076_v36 = vpop.f32.mrb[134].mxu0  ;;  %3333 = vmatprep.mubr.bf16.mxu1 %v5737_v0 }
 0x361   :  { %v4590_v57 = vsel %vm4577_vm3, %v4589_v39, %v6896_v48  ;;  %v4395_v20 = vmax.f32 %v4394_v51, %v3076_v36  ;;  %v3078_v59 = vpop.f32.mrb[135].mxu0 }
 0x362   :  { %v6946_v33 = vsel %vm4579_vm4, %v4589_v39, %v4590_v57  ;;  %v4416_v43 = vmax.f32 %v4415_v29, %v3078_v59  ;;  %v2679_v42 = vpop.f32.mrb[116].mxu1 }
 0x363   :  { %v4192_v55 = vmax.f32 %v4191_v44, %v2679_v42  ;;  %v2681_v16 = vpop.f32.mrb[117].mxu1 }
 0x364   :  { %v4213_v46 = vmax.f32 %v4212_v47, %v2681_v16  ;;  %v2683_v50 = vpop.f32.mrb[118].mxu1  ;;  %3717 = vmatmul.mubr.bf16.gmra.mrb[236].mxu0 %v6719_v58 }
 0x365   :  { %v4193_v61 = vmax.f32 %v4192_v55, %v2683_v50  ;;  %v2685_v63 = vpop.f32.mrb[119].mxu1  ;;  %3726 = vmatprep.mubr.bf16.mxu0 %v5737_v0 }
 0x366   :  { %v4214_v30 = vmax.f32 %v4213_v46, %v2685_v63 }
 0x367   :  { %3334 = vmatmul.mubr.bf16.gmra.mrb[224].mxu1 %v6699_v52 }
 0x368   :  { %3343 = vmatprep.mubr.bf16.mxu1 %v5737_v0 }
 0x369   :  { %v3082_v48 = vpop.f32.mrb[136].mxu0 }
 0x36a   :  { %v4396_v8 = vmax.f32 %v4395_v20, %v3082_v48  ;;  %v2689_v45 = vpop.f32.mrb[120].mxu1  ;;  %v3084_v24 = vpop.f32.mrb[137].mxu0 }
 0x36b   :  { %v4194_v18 = vmax.f32 %v4193_v61, %v2689_v45  ;;  %v4417_v49 = vmax.f32 %v4416_v43, %v3084_v24  ;;  %v2691_v53 = vpop.f32.mrb[121].mxu1  ;;  %v3086_v10 = vpop.f32.mrb[138].mxu0 }
 0x36c   :  { %v4215_v11 = vmax.f32 %v4214_v30, %v2691_v53  ;;  %v4397_v5 = vmax.f32 %v4396_v8, %v3086_v10  ;;  %v2693_v21 = vpop.f32.mrb[122].mxu1  ;;  %v3088_v54 = vpop.f32.mrb[139].mxu0  ;;  %3727 = vmatmul.mubr.bf16.gmra.mrb[240].mxu0 %v6745_v35 }
 0x36d   :  { %v4195_v19 = vmax.f32 %v4194_v18, %v2693_v21  ;;  %v4418_v25 = vmax.f32 %v4417_v49, %v3088_v54  ;;  %v2695_v3 = vpop.f32.mrb[123].mxu1  ;;  %3736 = vmatprep.mubr.bf16.mxu0 %v5737_v0 }
 0x36e   :  { %v4216_v52 = vmax.f32 %v4215_v11, %v2695_v3 }
 0x36f   :  { %3344 = vmatmul.mubr.bf16.gmra.mrb[228].mxu1 %v6697_v27 }
 0x370   :  { %3353 = vmatprep.mubr.bf16.mxu1 %v5737_v0 }
 0x371   :  { %v3092_v17 = vpop.f32.mrb[140].mxu0 }
 0x372   :  { %v4398_v31 = vmax.f32 %v4397_v5, %v3092_v17  ;;  %v2699_v32 = vpop.f32.mrb[124].mxu1  ;;  %v3094_v26 = vpop.f32.mrb[141].mxu0 }
 0x373   :  { %v4196_v23 = vmax.f32 %v4195_v19, %v2699_v32  ;;  %v4419_v34 = vmax.f32 %v4418_v25, %v3094_v26  ;;  %v2701_v60 = vpop.f32.mrb[125].mxu1  ;;  %v3096_v41 = vpop.f32.mrb[142].mxu0 }
 0x374   :  { %v4217_v6 = vmax.f32 %v4216_v52, %v2701_v60  ;;  %v4399_v44 = vmax.f32 %v4398_v31, %v3096_v41  ;;  %v2703_v62 = vpop.f32.mrb[126].mxu1  ;;  %v3098_v47 = vpop.f32.mrb[143].mxu0  ;;  %3737 = vmatmul.mubr.bf16.gmra.mrb[244].mxu0 %v6743_v12 }
 0x375   :  { %v4197_v40 = vmax.f32 %v4196_v23, %v2703_v62  ;;  %v4420_v39 = vmax.f32 %v4419_v34, %v3098_v47  ;;  %v2705_v51 = vpop.f32.mrb[127].mxu1  ;;  %3746 = vmatprep.mubr.bf16.mxu0 %v5737_v0 }
 0x376   :  { %v4218_v27 = vmax.f32 %v4217_v6, %v2705_v51 }
 0x377   :  { %v4198_v37 = vrot.slane %v4197_v40, 4  ;;  %3354 = vmatmul.mubr.bf16.gmra.mrb[232].mxu1 %v6728_v7 }
 0x378   :  { %v4219_v29 = vrot.slane %v4218_v27, 4  ;;  %3363 = vmatprep.mubr.bf16.mxu1 %v5737_v0 }
 0x379   :  { %v4199_v36 = vmax.f32 %v4197_v40, %v4198_v37 }
 0x37a   :  { %v4220_v57 = vmax.f32 %v4218_v27, %v4219_v29  ;;  %v2709_v20 = vpop.f32.mrb[128].mxu1 }
 0x37b   :  { %v4200_v59 = vrot.slane %v4199_v36, 2  ;;  %v2711_v43 = vpop.f32.mrb[129].mxu1 }
 0x37c   :  { %v4221_v42 = vrot.slane %v4220_v57, 2  ;;  %v2713_v55 = vpop.f32.mrb[130].mxu1  ;;  %v3102_v16 = vpop.f32.mrb[144].mxu0  ;;  %3747 = vmatmul.mubr.bf16.gmra.mrb[248].mxu0 %v6763_v4 }
 0x37d   :  { %v4201_v46 = vmax.f32 %v4199_v36, %v4200_v59  ;;  %v4351_v50 = vmax.f32 %v2709_v20, %v2713_v55  ;;  %v4400_v61 = vmax.f32 %v4399_v44, %v3102_v16  ;;  %v2715_v63 = vpop.f32.mrb[131].mxu1  ;;  %v3104_v30 = vpop.f32.mrb[145].mxu0  ;;  %3756 = vmatprep.mubr.bf16.mxu0 %v5737_v0 }
 0x37e   :  { %v4222_v7 = vmax.f32 %v4220_v57, %v4221_v42  ;;  %v4372_v48 = vmax.f32 %v2711_v43, %v2715_v63  ;;  %v4421_v8 = vmax.f32 %v4420_v39, %v3104_v30  ;;  %v3106_v45 = vpop.f32.mrb[146].mxu0 }
 0x37f   :  { %v4202_v24 = vrot.slane %v4201_v46, 1  ;;  %v4401_v18 = vmax.f32 %v4400_v61, %v3106_v45  ;;  %v3108_v49 = vpop.f32.mrb[147].mxu0  ;;  %3364 = vmatmul.mubr.bf16.gmra.mrb[236].mxu1 %v6719_v58 }
 0x380   :  { %v4223_v53 = vrot.slane %v4222_v7, 1  ;;  %v4422_v10 = vmax.f32 %v4421_v8, %v3108_v49  ;;  %3373 = vmatprep.mubr.bf16.mxu1 %v5737_v0 }
 0x381   :  { %v4203_v11 = vmax.f32 %v4201_v46, %v4202_v24 }
 0x382   :  { %v4224_v5 = vmax.f32 %v4222_v7, %v4223_v53  ;;  %v2719_v21 = vpop.f32.mrb[132].mxu1 }
 0x383   :  { %v4352_v54 = vmax.f32 %v4351_v50, %v2719_v21  ;;  %v2721_v19 = vpop.f32.mrb[133].mxu1 }
 0x384   :  { %v4563_v25 = vcombine.low %v4203_v11, %v4224_v5  ;;  %v4373_v3 = vmax.f32 %v4372_v48, %v2721_v19  ;;  %v2723_v52 = vpop.f32.mrb[134].mxu1  ;;  %v3112_v17 = vpop.f32.mrb[148].mxu0  ;;  %3757 = vmatmul.mubr.bf16.gmra.mrb[252].mxu0 %v6761_v22 }
 0x385   :  { %v4353_v31 = vmax.f32 %v4352_v54, %v2723_v52  ;;  %v4402_v32 = vmax.f32 %v4401_v18, %v3112_v17  ;;  %v2725_v26 = vpop.f32.mrb[135].mxu1  ;;  %v3114_v23 = vpop.f32.mrb[149].mxu0  ;;  %3766 = vmatprep.mubr.bf16.mxu0 %v5737_v0 }
 0x386   :  { %v4576_v58 = vrot.slane %v4563_v25, 6  ;;  %v4374_v34 = vmax.f32 %v4373_v3, %v2725_v26  ;;  %v4423_v60 = vmax.f32 %v4422_v10, %v3114_v23  ;;  %v3116_v41 = vpop.f32.mrb[150].mxu0 }
 0x387   :  { %v4403_v6 = vmax.f32 %v4402_v32, %v3116_v41  ;;  %v3118_v44 = vpop.f32.mrb[151].mxu0  ;;  %3374 = vmatmul.mubr.bf16.gmra.mrb[240].mxu1 %v6745_v35 }
 0x388   :  { %v4578_v62 = vsel %vm4577_vm3, %v4576_v58, %v6929_v56  ;;  %v4424_v47 = vmax.f32 %v4423_v60, %v3118_v44  ;;  %3383 = vmatprep.mubr.bf16.mxu1 %v5737_v0 }
 0x389   :  { %v6971_v40 = vsel %vm4579_vm4, %v4576_v58, %v4578_v62 }
 0x38a   :  { %v2729_v39 = vpop.f32.mrb[136].mxu1 }
 0x38b   :  { %v4354_v51 = vmax.f32 %v4353_v31, %v2729_v39  ;;  %v2731_v27 = vpop.f32.mrb[137].mxu1 }
 0x38c   :  { %v4375_v37 = vmax.f32 %v4374_v34, %v2731_v27  ;;  %v2733_v29 = vpop.f32.mrb[138].mxu1  ;;  %3767 = vmatmul.mubr.bf16.gmra.mrb[0].mxu0 %v6781_v14 }
 0x38d   :  { %v4355_v36 = vmax.f32 %v4354_v51, %v2733_v29  ;;  %v2735_v57 = vpop.f32.mrb[139].mxu1  ;;  %3776 = vmatprep.mubr.bf16.mxu0 %v5737_v0 }
 0x38e   :  { %v4376_v35 = vmax.f32 %v4375_v37, %v2735_v57 }
 0x38f   :  { %v3122_v20 = vpop.f32.mrb[152].mxu0  ;;  %3384 = vmatmul.mubr.bf16.gmra.mrb[244].mxu1 %v6743_v12 }
 0x390   :  { %v4404_v56 = vmax.f32 %v4403_v6, %v3122_v20  ;;  %v3124_v59 = vpop.f32.mrb[153].mxu0  ;;  %3393 = vmatprep.mubr.bf16.mxu1 %v5737_v0 }
 0x391   :  { %v4425_v43 = vmax.f32 %v4424_v47, %v3124_v59  ;;  %v3126_v42 = vpop.f32.mrb[154].mxu0 }
 0x392   :  { %v4405_v55 = vmax.f32 %v4404_v56, %v3126_v42  ;;  %v2739_v16 = vpop.f32.mrb[140].mxu1  ;;  %v3128_v46 = vpop.f32.mrb[155].mxu0 }
 0x393   :  { %v4356_v50 = vmax.f32 %v4355_v36, %v2739_v16  ;;  %v4426_v61 = vmax.f32 %v4425_v43, %v3128_v46  ;;  %v2741_v63 = vpop.f32.mrb[141].mxu1 }
 0x394   :  { %v4377_v30 = vmax.f32 %v4376_v35, %v2741_v63  ;;  %v2743_v7 = vpop.f32.mrb[142].mxu1  ;;  %3777 = vmatmul.mubr.bf16.gmra.mrb[4].mxu0 %v6778_v13 }
 0x395   :  { %v4357_v48 = vmax.f32 %v4356_v50, %v2743_v7  ;;  %v2745_v8 = vpop.f32.mrb[143].mxu1  ;;  %3786 = vmatprep.mubr.bf16.mxu0 %v5737_v0 }
 0x396   :  { %v4378_v12 = vmax.f32 %v4377_v30, %v2745_v8 }
 0x397   :  { %v3132_v45 = vpop.f32.mrb[156].mxu0  ;;  %3394 = vmatmul.mubr.bf16.gmra.mrb[248].mxu1 %v6763_v4 }
 0x398   :  { %v4406_v24 = vmax.f32 %v4405_v55, %v3132_v45  ;;  %v3134_v18 = vpop.f32.mrb[157].mxu0  ;;  %3403 = vmatprep.mubr.bf16.mxu1 %v5737_v0 }
 0x399   :  { %v4427_v49 = vmax.f32 %v4426_v61, %v3134_v18  ;;  %v3136_v53 = vpop.f32.mrb[158].mxu0 }
 0x39a   :  { %v4407_v10 = vmax.f32 %v4406_v24, %v3136_v53  ;;  %v2749_v11 = vpop.f32.mrb[144].mxu1  ;;  %v3138_v5 = vpop.f32.mrb[159].mxu0 }
 0x39b   :  { %v4358_v21 = vmax.f32 %v4357_v48, %v2749_v11  ;;  %v4428_v54 = vmax.f32 %v4427_v49, %v3138_v5  ;;  %v2751_v19 = vpop.f32.mrb[145].mxu1 }
 0x39c   :  { %v4408_v25 = vrot.slane %v4407_v10, 4  ;;  %v4379_v3 = vmax.f32 %v4378_v12, %v2751_v19  ;;  %v2753_v52 = vpop.f32.mrb[146].mxu1  ;;  %3787 = vmatmul.mubr.bf16.gmra.mrb[8].mxu0 %v6797_v2 }
 0x39d   :  { %v4429_v17 = vrot.slane %v4428_v54, 4  ;;  %v4359_v31 = vmax.f32 %v4358_v21, %v2753_v52  ;;  %v2755_v4 = vpop.f32.mrb[147].mxu1  ;;  %3796 = vmatprep.mubr.bf16.mxu0 %v5737_v0 }
 0x39e   :  { %v4409_v32 = vmax.f32 %v4407_v10, %v4408_v25  ;;  %v4380_v26 = vmax.f32 %v4379_v3, %v2755_v4 }
 0x39f   :  { %v4430_v23 = vmax.f32 %v4428_v54, %v4429_v17  ;;  %3404 = vmatmul.mubr.bf16.gmra.mrb[252].mxu1 %v6761_v22  ;;  %v3528_v58 = vpop.f32.mrb[160].mxu0 }
 0x3a0   :  { %v4410_v34 = vrot.slane %v4409_v32, 2  ;;  %v3530_v60 = vpop.f32.mrb[161].mxu0  ;;  %3413 = vmatprep.mubr.bf16.mxu1 %v5737_v0 }
 0x3a1   :  { %v4431_v41 = vrot.slane %v4430_v23, 2  ;;  %v3532_v6 = vpop.f32.mrb[162].mxu0 }
 0x3a2   :  { %v4411_v44 = vmax.f32 %v4409_v32, %v4410_v34  ;;  %v3973_v62 = vmax.f32 %v3528_v58, %v3532_v6  ;;  %v2759_v47 = vpop.f32.mrb[148].mxu1  ;;  %v3534_v39 = vpop.f32.mrb[163].mxu0 }
 0x3a3   :  { %v4432_v51 = vmax.f32 %v4430_v23, %v4431_v41  ;;  %v4360_v27 = vmax.f32 %v4359_v31, %v2759_v47  ;;  %v3994_v37 = vmax.f32 %v3530_v60, %v3534_v39  ;;  %v2761_v29 = vpop.f32.mrb[149].mxu1 }
 0x3a4   :  { %v4412_v36 = vrot.slane %v4411_v44, 1  ;;  %v4381_v57 = vmax.f32 %v4380_v26, %v2761_v29  ;;  %v2763_v35 = vpop.f32.mrb[150].mxu1  ;;  %3797 = vmatmul.mubr.bf16.gmra.mrb[12].mxu0 %v6795_v1 }
 0x3a5   :  { %v4433_v22 = vrot.slane %v4432_v51, 1  ;;  %v4361_v20 = vmax.f32 %v4360_v27, %v2763_v35  ;;  %v2765_v56 = vpop.f32.mrb[151].mxu1  ;;  %3806 = vmatprep.mubr.bf16.mxu0 %v5737_v0 }
 0x3a6   :  { %v4413_v59 = vmax.f32 %v4411_v44, %v4412_v36  ;;  %v4382_v43 = vmax.f32 %v4381_v57, %v2765_v56 }
 0x3a7   :  { %v4434_v42 = vmax.f32 %v4432_v51, %v4433_v22  ;;  %3414 = vmatmul.mubr.bf16.gmra.mrb[0].mxu1 %v6781_v14  ;;  %v3538_v55 = vpop.f32.mrb[164].mxu0 }
 0x3a8   :  { %v3974_v16 = vmax.f32 %v3973_v62, %v3538_v55  ;;  %v3540_v46 = vpop.f32.mrb[165].mxu0  ;;  %3423 = vmatprep.mubr.bf16.mxu1 %v5737_v0 }
 0x3a9   :  { %v4568_v50 = vcombine.low %v4413_v59, %v4434_v42  ;;  %v3995_v61 = vmax.f32 %v3994_v37, %v3540_v46  ;;  %v3542_v63 = vpop.f32.mrb[166].mxu0 }
 0x3aa   :  { %v3975_v30 = vmax.f32 %v3974_v16, %v3542_v63  ;;  %v2769_v7 = vpop.f32.mrb[152].mxu1  ;;  %v3544_v48 = vpop.f32.mrb[167].mxu0 }
 0x3ab   :  { %v4592_v8 = vrot.slane %v4568_v50, 5  ;;  %v4362_v12 = vmax.f32 %v4361_v20, %v2769_v7  ;;  %v3996_v45 = vmax.f32 %v3995_v61, %v3544_v48  ;;  %v2771_v24 = vpop.f32.mrb[153].mxu1 }
 0x3ac   :  { %v4383_v18 = vmax.f32 %v4382_v43, %v2771_v24  ;;  %v2773_v49 = vpop.f32.mrb[154].mxu1  ;;  %3807 = vmatmul.mubr.bf16.gmra.mrb[16].mxu0 %v6813_v15 }
 0x3ad   :  { %v4593_v14 = vsel %vm4582_vm5, %v4592_v8, %v6946_v33  ;;  %v4363_v53 = vmax.f32 %v4362_v12, %v2773_v49  ;;  %v2775_v10 = vpop.f32.mrb[155].mxu1  ;;  %3816 = vmatprep.mubr.bf16.mxu0 %v5737_v0 }
 0x3ae   :  { %v4594_v11 = vsel %vm4584_vm6, %v4592_v8, %v4593_v14  ;;  %v4384_v5 = vmax.f32 %v4383_v18, %v2775_v10 }
 0x3af   :  { %4618 = vst [vmem:[%s7075_s6 + $0x8] sm:$0xff] %v4594_v11  ;;  %3424 = vmatmul.mubr.bf16.gmra.mrb[4].mxu1 %v6778_v13  ;;  %v3548_v21 = vpop.f32.mrb[168].mxu0 }
 0x3b0   :  { %v3976_v54 = vmax.f32 %v3975_v30, %v3548_v21  ;;  %v3550_v19 = vpop.f32.mrb[169].mxu0  ;;  %3433 = vmatprep.mubr.bf16.mxu1 %v5737_v0 }
 0x3b1   :  { %v3997_v25 = vmax.f32 %v3996_v45, %v3550_v19  ;;  %v3552_v33 = vpop.f32.mrb[170].mxu0 }
 0x3b2   :  { %v3977_v3 = vmax.f32 %v3976_v54, %v3552_v33  ;;  %v2779_v52 = vpop.f32.mrb[156].mxu1  ;;  %v3554_v17 = vpop.f32.mrb[171].mxu0 }
 0x3b3   :  { %v4364_v31 = vmax.f32 %v4363_v53, %v2779_v52  ;;  %v3998_v4 = vmax.f32 %v3997_v25, %v3554_v17  ;;  %v2781_v32 = vpop.f32.mrb[157].mxu1 }
 0x3b4   :  { %v4385_v26 = vmax.f32 %v4384_v5, %v2781_v32  ;;  %v2783_v23 = vpop.f32.mrb[158].mxu1  ;;  %3817 = vmatmul.mubr.bf16.gmra.mrb[20].mxu0 %v6811_v9 }
 0x3b5   :  { %v4365_v58 = vmax.f32 %v4364_v31, %v2783_v23  ;;  %v2785_v34 = vpop.f32.mrb[159].mxu1  ;;  %3826 = vmatprep.mubr.bf16.mxu0 %v5737_v0 }
 0x3b6   :  { %v4386_v13 = vmax.f32 %v4385_v26, %v2785_v34 }
 0x3b7   :  { %v4366_v60 = vrot.slane %v4365_v58, 4  ;;  %3434 = vmatmul.mubr.bf16.gmra.mrb[8].mxu1 %v6797_v2  ;;  %v3558_v41 = vpop.f32.mrb[172].mxu0 }
 0x3b8   :  { %v4387_v6 = vrot.slane %v4386_v13, 4  ;;  %v3978_v44 = vmax.f32 %v3977_v3, %v3558_v41  ;;  %v3560_v62 = vpop.f32.mrb[173].mxu0  ;;  %3443 = vmatprep.mubr.bf16.mxu1 %v5737_v0 }
 0x3b9   :  { %v4367_v47 = vmax.f32 %v4365_v58, %v4366_v60  ;;  %v3999_v39 = vmax.f32 %v3998_v4, %v3560_v62  ;;  %v3562_v51 = vpop.f32.mrb[174].mxu0 }
 0x3ba   :  { %v4388_v27 = vmax.f32 %v4386_v13, %v4387_v6  ;;  %v3979_v37 = vmax.f32 %v3978_v44, %v3562_v51  ;;  %v3175_v29 = vpop.f32.mrb[160].mxu1  ;;  %v3564_v36 = vpop.f32.mrb[175].mxu0 }
 0x3bb   :  { %v4368_v57 = vrot.slane %v4367_v47, 2  ;;  %v4000_v35 = vmax.f32 %v3999_v39, %v3564_v36  ;;  %v3177_v22 = vpop.f32.mrb[161].mxu1 }
 0x3bc   :  { %v4389_v20 = vrot.slane %v4388_v27, 2  ;;  %v3179_v56 = vpop.f32.mrb[162].mxu1  ;;  %3827 = vmatmul.mubr.bf16.gmra.mrb[24].mxu0 %v6831_v28 }
 0x3bd   :  { %v4369_v2 = vmax.f32 %v4367_v47, %v4368_v57  ;;  %v3931_v59 = vmax.f32 %v3175_v29, %v3179_v56  ;;  %v3181_v43 = vpop.f32.mrb[163].mxu1  ;;  %3836 = vmatprep.mubr.bf16.mxu0 %v5737_v0 }
 0x3be   :  { %v4390_v42 = vmax.f32 %v4388_v27, %v4389_v20  ;;  %v3952_v55 = vmax.f32 %v3177_v22, %v3181_v43 }
 0x3bf   :  { %v4370_v16 = vrot.slane %v4369_v2, 1  ;;  %3444 = vmatmul.mubr.bf16.gmra.mrb[12].mxu1 %v6795_v1  ;;  %v3568_v46 = vpop.f32.mrb[176].mxu0 }
 0x3c0   :  { %v4391_v50 = vrot.slane %v4390_v42, 1  ;;  %v3980_v61 = vmax.f32 %v3979_v37, %v3568_v46  ;;  %v3570_v63 = vpop.f32.mrb[177].mxu0  ;;  %3453 = vmatprep.mubr.bf16.mxu1 %v5737_v0 }
 0x3c1   :  { %v4371_v30 = vmax.f32 %v4369_v2, %v4370_v16  ;;  %v4001_v7 = vmax.f32 %v4000_v35, %v3570_v63  ;;  %v3572_v48 = vpop.f32.mrb[178].mxu0 }
 0x3c2   :  { %v4392_v8 = vmax.f32 %v4390_v42, %v4391_v50  ;;  %v3981_v12 = vmax.f32 %v3980_v61, %v3572_v48  ;;  %v3185_v45 = vpop.f32.mrb[164].mxu1  ;;  %v3574_v24 = vpop.f32.mrb[179].mxu0 }
 0x3c3   :  { %v3932_v18 = vmax.f32 %v3931_v59, %v3185_v45  ;;  %v4002_v49 = vmax.f32 %v4001_v7, %v3574_v24  ;;  %v3187_v14 = vpop.f32.mrb[165].mxu1 }
 0x3c4   :  { %v4567_v53 = vcombine.low %v4371_v30, %v4392_v8  ;;  %v3953_v10 = vmax.f32 %v3952_v55, %v3187_v14  ;;  %v3189_v11 = vpop.f32.mrb[166].mxu1  ;;  %3837 = vmatmul.mubr.bf16.gmra.mrb[28].mxu0 %v6829_v38 }
 0x3c5   :  { %v3933_v1 = vmax.f32 %v3932_v18, %v3189_v11  ;;  %v3191_v5 = vpop.f32.mrb[167].mxu1 }
 0x3c6   :  { %v4581_v21 = vrot.slane %v4567_v53, 5  ;;  %v3954_v54 = vmax.f32 %v3953_v10, %v3191_v5 }
 0x3c7   :  { %3454 = vmatmul.mubr.bf16.gmra.mrb[16].mxu1 %v6813_v15  ;;  %v3578_v19 = vpop.f32.mrb[180].mxu0 }
 0x3c8   :  { %v4583_v25 = vsel %vm4582_vm5, %v4581_v21, %v6971_v40  ;;  %v3982_v33 = vmax.f32 %v3981_v12, %v3578_v19  ;;  %v3580_v3 = vpop.f32.mrb[181].mxu0  ;;  %3463 = vmatprep.mubr.bf16.mxu1 %v5737_v0 }
 0x3c9   :  { %v4585_v52 = vsel %vm4584_vm6, %v4581_v21, %v4583_v25  ;;  %v4003_v17 = vmax.f32 %v4002_v49, %v3580_v3  ;;  %v3582_v31 = vpop.f32.mrb[182].mxu0 }
 0x3ca   :  { %4617 = vst [vmem:[%s7075_s6] sm:$0xff] %v4585_v52  ;;  %v3983_v4 = vmax.f32 %v3982_v33, %v3582_v31  ;;  %v3195_v32 = vpop.f32.mrb[168].mxu1  ;;  %v3584_v26 = vpop.f32.mrb[183].mxu0 }
 0x3cb   :  { %v3934_v15 = vmax.f32 %v3933_v1, %v3195_v32  ;;  %v4004_v23 = vmax.f32 %v4003_v17, %v3584_v26  ;;  %v3197_v58 = vpop.f32.mrb[169].mxu1 }
 0x3cc   :  { %v3955_v34 = vmax.f32 %v3954_v54, %v3197_v58  ;;  %v3199_v40 = vpop.f32.mrb[170].mxu1 }
 0x3cd   :  { %v3935_v13 = vmax.f32 %v3934_v15, %v3199_v40  ;;  %v3201_v60 = vpop.f32.mrb[171].mxu1 }
 0x3ce   :  { %v3956_v41 = vmax.f32 %v3955_v34, %v3201_v60 }
 0x3cf   :  { %3464 = vmatmul.mubr.bf16.gmra.mrb[20].mxu1 %v6811_v9  ;;  %v3588_v6 = vpop.f32.mrb[184].mxu0 }
 0x3d0   :  { %v3984_v44 = vmax.f32 %v3983_v4, %v3588_v6  ;;  %v3590_v62 = vpop.f32.mrb[185].mxu0  ;;  %3473 = vmatprep.mubr.bf16.mxu1 %v5737_v0 }
 0x3d1   :  { %v4005_v47 = vmax.f32 %v4004_v23, %v3590_v62  ;;  %v3592_v39 = vpop.f32.mrb[186].mxu0 }
 0x3d2   :  { %v3985_v51 = vmax.f32 %v3984_v44, %v3592_v39  ;;  %v3205_v27 = vpop.f32.mrb[172].mxu1  ;;  %v3594_v37 = vpop.f32.mrb[187].mxu0 }
 0x3d3   :  { %v3936_v29 = vmax.f32 %v3935_v13, %v3205_v27  ;;  %v4006_v36 = vmax.f32 %v4005_v47, %v3594_v37  ;;  %v3207_v57 = vpop.f32.mrb[173].mxu1 }
 0x3d4   :  { %v3957_v35 = vmax.f32 %v3956_v41, %v3207_v57  ;;  %v3209_v22 = vpop.f32.mrb[174].mxu1 }
 0x3d5   :  { %v3937_v20 = vmax.f32 %v3936_v29, %v3209_v22  ;;  %v3211_v56 = vpop.f32.mrb[175].mxu1 }
 0x3d6   :  { %v3958_v2 = vmax.f32 %v3957_v35, %v3211_v56 }
 0x3d7   :  { %3474 = vmatmul.mubr.bf16.gmra.mrb[24].mxu1 %v6831_v28  ;;  %v3598_v9 = vpop.f32.mrb[188].mxu0 }
 0x3d8   :  { %v3986_v59 = vmax.f32 %v3985_v51, %v3598_v9  ;;  %v3600_v43 = vpop.f32.mrb[189].mxu0  ;;  %3483 = vmatprep.mubr.bf16.mxu1 %v5737_v0 }
 0x3d9   :  { %v4007_v42 = vmax.f32 %v4006_v36, %v3600_v43  ;;  %v3602_v55 = vpop.f32.mrb[190].mxu0 }
 0x3da   :  { %v3987_v16 = vmax.f32 %v3986_v59, %v3602_v55  ;;  %v3215_v46 = vpop.f32.mrb[176].mxu1  ;;  %v3604_v50 = vpop.f32.mrb[191].mxu0 }
 0x3db   :  { %v3938_v61 = vmax.f32 %v3937_v20, %v3215_v46  ;;  %v4008_v63 = vmax.f32 %v4007_v42, %v3604_v50  ;;  %v3217_v30 = vpop.f32.mrb[177].mxu1 }
 0x3dc   :  { %v3988_v7 = vrot.slane %v3987_v16, 4  ;;  %v3959_v48 = vmax.f32 %v3958_v2, %v3217_v30  ;;  %v3219_v8 = vpop.f32.mrb[178].mxu1 }
 0x3dd   :  { %v4009_v12 = vrot.slane %v4008_v63, 4  ;;  %v3939_v45 = vmax.f32 %v3938_v61, %v3219_v8  ;;  %v3221_v24 = vpop.f32.mrb[179].mxu1 }
 0x3de   :  { %v3989_v28 = vmax.f32 %v3987_v16, %v3988_v7  ;;  %v3960_v18 = vmax.f32 %v3959_v48, %v3221_v24 }
 0x3df   :  { %v4010_v49 = vmax.f32 %v4008_v63, %v4009_v12  ;;  %3484 = vmatmul.mubr.bf16.gmra.mrb[28].mxu1 %v6829_v38  ;;  %v3608_v0 = vpop.f32.mrb[192].mxu0 }
 0x3e0   :  { %v3990_v14 = vrot.slane %v3989_v28, 2  ;;  %v3610_v53 = vpop.f32.mrb[193].mxu0 }
 0x3e1   :  { %v4011_v10 = vrot.slane %v4010_v49, 2  ;;  %v3612_v11 = vpop.f32.mrb[194].mxu0 }
 0x3e2   :  { %v3991_v1 = vmax.f32 %v3989_v28, %v3990_v14  ;;  %v4141_v5 = vmax.f32 %v3608_v0, %v3612_v11  ;;  %v3225_v21 = vpop.f32.mrb[180].mxu1  ;;  %v3614_v54 = vpop.f32.mrb[195].mxu0 }
 0x3e3   :  { %v4012_v19 = vmax.f32 %v4010_v49, %v4011_v10  ;;  %v3940_v25 = vmax.f32 %v3939_v45, %v3225_v21  ;;  %v4162_v33 = vmax.f32 %v3610_v53, %v3614_v54  ;;  %v3227_v3 = vpop.f32.mrb[181].mxu1 }
 0x3e4   :  { %v3992_v52 = vrot.slane %v3991_v1, 1  ;;  %v3961_v17 = vmax.f32 %v3960_v18, %v3227_v3  ;;  %v3229_v31 = vpop.f32.mrb[182].mxu1 }
 0x3e5   :  { %v4013_v4 = vrot.slane %v4012_v19, 1  ;;  %v3941_v32 = vmax.f32 %v3940_v25, %v3229_v31  ;;  %v3231_v26 = vpop.f32.mrb[183].mxu1 }
 0x3e6   :  { %v7021_v38 = vmax.f32 %v3991_v1, %v3992_v52  ;;  %v3962_v15 = vmax.f32 %v3961_v17, %v3231_v26 }
 0x3e7   :  { %v7023_v23 = vmax.f32 %v4012_v19, %v4013_v4  ;;  %v3618_v58 = vpop.f32.mrb[196].mxu0 }
 0x3e8   :  { %v4142_v34 = vmax.f32 %v4141_v5, %v3618_v58  ;;  %v3620_v40 = vpop.f32.mrb[197].mxu0 }
 0x3e9   :  { %v4558_v13 = vcombine.low %v7021_v38, %v7023_v23  ;;  %v4163_v60 = vmax.f32 %v4162_v33, %v3620_v40  ;;  %v3622_v41 = vpop.f32.mrb[198].mxu0 }
 0x3ea   :  { %v4143_v6 = vmax.f32 %v4142_v34, %v3622_v41  ;;  %v3235_v44 = vpop.f32.mrb[184].mxu1  ;;  %v3624_v62 = vpop.f32.mrb[199].mxu0 }
 0x3eb   :  { %v3942_v47 = vmax.f32 %v3941_v32, %v3235_v44  ;;  %v4164_v39 = vmax.f32 %v4163_v60, %v3624_v62  ;;  %v3237_v51 = vpop.f32.mrb[185].mxu1 }
 0x3ec   :  { %v3963_v27 = vmax.f32 %v3962_v15, %v3237_v51  ;;  %v3239_v37 = vpop.f32.mrb[186].mxu1 }
 0x3ed   :  { %v3943_v29 = vmax.f32 %v3942_v47, %v3239_v37  ;;  %v3241_v36 = vpop.f32.mrb[187].mxu1 }
 0x3ee   :  { %v3964_v57 = vmax.f32 %v3963_v27, %v3241_v36 }
 0x3ef   :  { %v3628_v35 = vpop.f32.mrb[200].mxu0 }
 0x3f0   :  { %v4144_v22 = vmax.f32 %v4143_v6, %v3628_v35  ;;  %v3630_v20 = vpop.f32.mrb[201].mxu0 }
 0x3f1   :  { %v4165_v56 = vmax.f32 %v4164_v39, %v3630_v20  ;;  %v3632_v2 = vpop.f32.mrb[202].mxu0 }
 0x3f2   :  { %v4145_v9 = vmax.f32 %v4144_v22, %v3632_v2  ;;  %v3245_v59 = vpop.f32.mrb[188].mxu1  ;;  %v3634_v43 = vpop.f32.mrb[203].mxu0 }
 0x3f3   :  { %v3944_v42 = vmax.f32 %v3943_v29, %v3245_v59  ;;  %v4166_v55 = vmax.f32 %v4165_v56, %v3634_v43  ;;  %v3247_v16 = vpop.f32.mrb[189].mxu1 }
 0x3f4   :  { %v3965_v46 = vmax.f32 %v3964_v57, %v3247_v16  ;;  %v3249_v50 = vpop.f32.mrb[190].mxu1 }
 0x3f5   :  { %v3945_v61 = vmax.f32 %v3944_v42, %v3249_v50  ;;  %v3251_v63 = vpop.f32.mrb[191].mxu1 }
 0x3f6   :  { %v3966_v30 = vmax.f32 %v3965_v46, %v3251_v63 }
 0x3f7   :  { %v3946_v7 = vrot.slane %v3945_v61, 4  ;;  %v3638_v48 = vpop.f32.mrb[204].mxu0 }
 0x3f8   :  { %v3967_v8 = vrot.slane %v3966_v30, 4  ;;  %v4146_v12 = vmax.f32 %v4145_v9, %v3638_v48  ;;  %v3640_v45 = vpop.f32.mrb[205].mxu0 }
 0x3f9   :  { %v3947_v24 = vmax.f32 %v3945_v61, %v3946_v7  ;;  %v4167_v28 = vmax.f32 %v4166_v55, %v3640_v45  ;;  %v3642_v18 = vpop.f32.mrb[206].mxu0 }
 0x3fa   :  { %v3968_v49 = vmax.f32 %v3966_v30, %v3967_v8  ;;  %v4147_v0 = vmax.f32 %v4146_v12, %v3642_v18  ;;  %v3255_v14 = vpop.f32.mrb[192].mxu1  ;;  %v3644_v53 = vpop.f32.mrb[207].mxu0 }
 0x3fb   :  { %v3948_v10 = vrot.slane %v3947_v24, 2  ;;  %v4168_v11 = vmax.f32 %v4167_v28, %v3644_v53  ;;  %v3257_v1 = vpop.f32.mrb[193].mxu1 }
 0x3fc   :  { %v3969_v5 = vrot.slane %v3968_v49, 2  ;;  %v3259_v21 = vpop.f32.mrb[194].mxu1 }
 0x3fd   :  { %v3949_v54 = vmax.f32 %v3947_v24, %v3948_v10  ;;  %v4099_v19 = vmax.f32 %v3255_v14, %v3259_v21  ;;  %v3261_v25 = vpop.f32.mrb[195].mxu1 }
 0x3fe   :  { %v3970_v33 = vmax.f32 %v3968_v49, %v3969_v5  ;;  %v4120_v3 = vmax.f32 %v3257_v1, %v3261_v25 }
 0x3ff   :  { %v3950_v52 = vrot.slane %v3949_v54, 1  ;;  %v3648_v17 = vpop.f32.mrb[208].mxu0 }
 0x400   :  { %v3971_v31 = vrot.slane %v3970_v33, 1  ;;  %v4148_v4 = vmax.f32 %v4147_v0, %v3648_v17  ;;  %v3650_v32 = vpop.f32.mrb[209].mxu0 }
 0x401   :  { %v7027_v26 = vmax.f32 %v3949_v54, %v3950_v52  ;;  %v4169_v15 = vmax.f32 %v4168_v11, %v3650_v32  ;;  %v3652_v58 = vpop.f32.mrb[210].mxu0 }
 0x402   :  { %v7029_v34 = vmax.f32 %v3970_v33, %v3971_v31  ;;  %v4149_v40 = vmax.f32 %v4148_v4, %v3652_v58  ;;  %v3265_v60 = vpop.f32.mrb[196].mxu1  ;;  %v3654_v41 = vpop.f32.mrb[211].mxu0 }
 0x403   :  { %v4100_v6 = vmax.f32 %v4099_v19, %v3265_v60  ;;  %v4170_v44 = vmax.f32 %v4169_v15, %v3654_v41  ;;  %v3267_v62 = vpop.f32.mrb[197].mxu1 }
 0x404   :  { %v4557_v47 = vcombine.low %v7027_v26, %v7029_v34  ;;  %v4121_v39 = vmax.f32 %v4120_v3, %v3267_v62  ;;  %v3269_v51 = vpop.f32.mrb[198].mxu1 }
 0x405   :  { %v4101_v27 = vmax.f32 %v4100_v6, %v3269_v51  ;;  %v3271_v37 = vpop.f32.mrb[199].mxu1 }
 0x406   :  { %v4122_v29 = vmax.f32 %v4121_v39, %v3271_v37 }
 0x407   :  { %v3658_v36 = vpop.f32.mrb[212].mxu0 }
 0x408   :  { %v4150_v57 = vmax.f32 %v4149_v40, %v3658_v36  ;;  %v3660_v35 = vpop.f32.mrb[213].mxu0 }
 0x409   :  { %v4171_v22 = vmax.f32 %v4170_v44, %v3660_v35  ;;  %v3662_v20 = vpop.f32.mrb[214].mxu0 }
 0x40a   :  { %v4151_v56 = vmax.f32 %v4150_v57, %v3662_v20  ;;  %v3275_v2 = vpop.f32.mrb[200].mxu1  ;;  %v3664_v9 = vpop.f32.mrb[215].mxu0 }
 0x40b   :  { %v4102_v59 = vmax.f32 %v4101_v27, %v3275_v2  ;;  %v4172_v43 = vmax.f32 %v4171_v22, %v3664_v9  ;;  %v3277_v42 = vpop.f32.mrb[201].mxu1 }
 0x40c   :  { %v4123_v55 = vmax.f32 %v4122_v29, %v3277_v42  ;;  %v3279_v16 = vpop.f32.mrb[202].mxu1 }
 0x40d   :  { %v4103_v46 = vmax.f32 %v4102_v59, %v3279_v16  ;;  %v3281_v50 = vpop.f32.mrb[203].mxu1 }
 0x40e   :  { %v4124_v61 = vmax.f32 %v4123_v55, %v3281_v50 }
 0x40f   :  { %v3668_v63 = vpop.f32.mrb[216].mxu0 }
 0x410   :  { %v4152_v30 = vmax.f32 %v4151_v56, %v3668_v63  ;;  %v3670_v7 = vpop.f32.mrb[217].mxu0 }
 0x411   :  { %v4173_v48 = vmax.f32 %v4172_v43, %v3670_v7  ;;  %v3672_v8 = vpop.f32.mrb[218].mxu0 }
 0x412   :  { %v4153_v12 = vmax.f32 %v4152_v30, %v3672_v8  ;;  %v3285_v45 = vpop.f32.mrb[204].mxu1  ;;  %v3674_v24 = vpop.f32.mrb[219].mxu0 }
 0x413   :  { %v4104_v28 = vmax.f32 %v4103_v46, %v3285_v45  ;;  %v4174_v18 = vmax.f32 %v4173_v48, %v3674_v24  ;;  %v3287_v49 = vpop.f32.mrb[205].mxu1 }
 0x414   :  { %v4125_v0 = vmax.f32 %v4124_v61, %v3287_v49  ;;  %v3289_v14 = vpop.f32.mrb[206].mxu1 }
 0x415   :  { %v4105_v53 = vmax.f32 %v4104_v28, %v3289_v14  ;;  %v3291_v10 = vpop.f32.mrb[207].mxu1 }
 0x416   :  { %v4126_v11 = vmax.f32 %v4125_v0, %v3291_v10 }
 0x417   :  { %v3678_v1 = vpop.f32.mrb[220].mxu0 }
 0x418   :  { %v4154_v5 = vmax.f32 %v4153_v12, %v3678_v1  ;;  %v3680_v21 = vpop.f32.mrb[221].mxu0 }
 0x419   :  { %v4175_v54 = vmax.f32 %v4174_v18, %v3680_v21  ;;  %v3682_v19 = vpop.f32.mrb[222].mxu0 }
 0x41a   :  { %v4155_v25 = vmax.f32 %v4154_v5, %v3682_v19  ;;  %v3295_v33 = vpop.f32.mrb[208].mxu1  ;;  %v3684_v3 = vpop.f32.mrb[223].mxu0 }
 0x41b   :  { %v4106_v52 = vmax.f32 %v4105_v53, %v3295_v33  ;;  %v4176_v17 = vmax.f32 %v4175_v54, %v3684_v3  ;;  %v3297_v31 = vpop.f32.mrb[209].mxu1 }
 0x41c   :  { %v4156_v4 = vrot.slane %v4155_v25, 4  ;;  %v4127_v32 = vmax.f32 %v4126_v11, %v3297_v31  ;;  %v3299_v15 = vpop.f32.mrb[210].mxu1 }
 0x41d   :  { %v4177_v58 = vrot.slane %v4176_v17, 4  ;;  %v4107_v40 = vmax.f32 %v4106_v52, %v3299_v15  ;;  %v3301_v60 = vpop.f32.mrb[211].mxu1 }
 0x41e   :  { %v4157_v41 = vmax.f32 %v4155_v25, %v4156_v4  ;;  %v4128_v6 = vmax.f32 %v4127_v32, %v3301_v60 }
 0x41f   :  { %v4178_v44 = vmax.f32 %v4176_v17, %v4177_v58  ;;  %v3688_v62 = vpop.f32.mrb[224].mxu0 }
 0x420   :  { %v4158_v39 = vrot.slane %v4157_v41, 2  ;;  %v3690_v51 = vpop.f32.mrb[225].mxu0 }
 0x421   :  { %v4179_v27 = vrot.slane %v4178_v44, 2  ;;  %v3692_v37 = vpop.f32.mrb[226].mxu0 }
 0x422   :  { %v4159_v29 = vmax.f32 %v4157_v41, %v4158_v39  ;;  %v4309_v36 = vmax.f32 %v3688_v62, %v3692_v37  ;;  %v3305_v57 = vpop.f32.mrb[212].mxu1  ;;  %v3694_v35 = vpop.f32.mrb[227].mxu0 }
 0x423   :  { %v4180_v22 = vmax.f32 %v4178_v44, %v4179_v27  ;;  %v4108_v20 = vmax.f32 %v4107_v40, %v3305_v57  ;;  %v4330_v56 = vmax.f32 %v3690_v51, %v3694_v35  ;;  %v3307_v2 = vpop.f32.mrb[213].mxu1 }
 0x424   :  { %v4160_v9 = vrot.slane %v4159_v29, 1  ;;  %v4129_v59 = vmax.f32 %v4128_v6, %v3307_v2  ;;  %v3309_v43 = vpop.f32.mrb[214].mxu1 }
 0x425   :  { %v4181_v42 = vrot.slane %v4180_v22, 1  ;;  %v4109_v55 = vmax.f32 %v4108_v20, %v3309_v43  ;;  %v3311_v16 = vpop.f32.mrb[215].mxu1 }
 0x426   :  { %v4161_v46 = vmax.f32 %v4159_v29, %v4160_v9  ;;  %v4130_v50 = vmax.f32 %v4129_v59, %v3311_v16 }
 0x427   :  { %v4182_v61 = vmax.f32 %v4180_v22, %v4181_v42  ;;  %v3698_v63 = vpop.f32.mrb[228].mxu0 }
 0x428   :  { %v4310_v30 = vmax.f32 %v4309_v36, %v3698_v63  ;;  %v3700_v7 = vpop.f32.mrb[229].mxu0 }
 0x429   :  { %v4562_v48 = vcombine.low %v4161_v46, %v4182_v61  ;;  %v4331_v8 = vmax.f32 %v4330_v56, %v3700_v7  ;;  %v3702_v12 = vpop.f32.mrb[230].mxu0 }
 0x42a   :  { %v4311_v45 = vmax.f32 %v4310_v30, %v3702_v12  ;;  %v3315_v24 = vpop.f32.mrb[216].mxu1  ;;  %v3704_v28 = vpop.f32.mrb[231].mxu0 }
 0x42b   :  { %v4604_v18 = vrot.slane %v4562_v48, 7  ;;  %v4110_v49 = vmax.f32 %v4109_v55, %v3315_v24  ;;  %v4332_v0 = vmax.f32 %v4331_v8, %v3704_v28  ;;  %v3317_v14 = vpop.f32.mrb[217].mxu1 }
 0x42c   :  { %v4131_v53 = vmax.f32 %v4130_v50, %v3317_v14  ;;  %v3319_v10 = vpop.f32.mrb[218].mxu1 }
 0x42d   :  { %v4605_v11 = vsel %vm4572_vm1, %v4604_v18, %v4558_v13  ;;  %v4111_v1 = vmax.f32 %v4110_v49, %v3319_v10  ;;  %v3321_v5 = vpop.f32.mrb[219].mxu1 }
 0x42e   :  { %v7038_v21 = vsel %vm4574_vm2, %v4604_v18, %v4605_v11  ;;  %v4132_v54 = vmax.f32 %v4131_v53, %v3321_v5 }
 0x42f   :  { %v3708_v19 = vpop.f32.mrb[232].mxu0 }
 0x430   :  { %v4312_v25 = vmax.f32 %v4311_v45, %v3708_v19  ;;  %v3710_v33 = vpop.f32.mrb[233].mxu0 }
 0x431   :  { %v4333_v3 = vmax.f32 %v4332_v0, %v3710_v33  ;;  %v3712_v52 = vpop.f32.mrb[234].mxu0 }
 0x432   :  { %v4313_v17 = vmax.f32 %v4312_v25, %v3712_v52  ;;  %v3325_v31 = vpop.f32.mrb[220].mxu1  ;;  %v3714_v4 = vpop.f32.mrb[235].mxu0 }
 0x433   :  { %v4112_v32 = vmax.f32 %v4111_v1, %v3325_v31  ;;  %v4334_v15 = vmax.f32 %v4333_v3, %v3714_v4  ;;  %v3327_v58 = vpop.f32.mrb[221].mxu1 }
 0x434   :  { %v4133_v38 = vmax.f32 %v4132_v54, %v3327_v58  ;;  %v3329_v23 = vpop.f32.mrb[222].mxu1 }
 0x435   :  { %v4113_v13 = vmax.f32 %v4112_v32, %v3329_v23  ;;  %v3331_v40 = vpop.f32.mrb[223].mxu1 }
 0x436   :  { %v4134_v60 = vmax.f32 %v4133_v38, %v3331_v40 }
 0x437   :  { %v4114_v41 = vrot.slane %v4113_v13, 4  ;;  %v3718_v6 = vpop.f32.mrb[236].mxu0 }
 0x438   :  { %v4135_v44 = vrot.slane %v4134_v60, 4  ;;  %v4314_v62 = vmax.f32 %v4313_v17, %v3718_v6  ;;  %v3720_v39 = vpop.f32.mrb[237].mxu0 }
 0x439   :  { %v4115_v51 = vmax.f32 %v4113_v13, %v4114_v41  ;;  %v4335_v27 = vmax.f32 %v4334_v15, %v3720_v39  ;;  %v3722_v37 = vpop.f32.mrb[238].mxu0 }
 0x43a   :  { %v4136_v29 = vmax.f32 %v4134_v60, %v4135_v44  ;;  %v4315_v36 = vmax.f32 %v4314_v62, %v3722_v37  ;;  %v3335_v57 = vpop.f32.mrb[224].mxu1  ;;  %v3724_v35 = vpop.f32.mrb[239].mxu0 }
 0x43b   :  { %v4116_v22 = vrot.slane %v4115_v51, 2  ;;  %v4336_v20 = vmax.f32 %v4335_v27, %v3724_v35  ;;  %v3337_v56 = vpop.f32.mrb[225].mxu1 }
 0x43c   :  { %v4137_v2 = vrot.slane %v4136_v29, 2  ;;  %v3339_v9 = vpop.f32.mrb[226].mxu1 }
 0x43d   :  { %v4117_v59 = vmax.f32 %v4115_v51, %v4116_v22  ;;  %v4267_v43 = vmax.f32 %v3335_v57, %v3339_v9  ;;  %v3341_v42 = vpop.f32.mrb[227].mxu1 }
 0x43e   :  { %v4138_v55 = vmax.f32 %v4136_v29, %v4137_v2  ;;  %v4288_v16 = vmax.f32 %v3337_v56, %v3341_v42 }
 0x43f   :  { %v4118_v46 = vrot.slane %v4117_v59, 1  ;;  %v3728_v50 = vpop.f32.mrb[240].mxu0 }
 0x440   :  { %v4139_v61 = vrot.slane %v4138_v55, 1  ;;  %v4316_v63 = vmax.f32 %v4315_v36, %v3728_v50  ;;  %v3730_v30 = vpop.f32.mrb[241].mxu0 }
 0x441   :  { %v4119_v7 = vmax.f32 %v4117_v59, %v4118_v46  ;;  %v4337_v48 = vmax.f32 %v4336_v20, %v3730_v30  ;;  %v3732_v8 = vpop.f32.mrb[242].mxu0 }
 0x442   :  { %v4140_v12 = vmax.f32 %v4138_v55, %v4139_v61  ;;  %v4317_v45 = vmax.f32 %v4316_v63, %v3732_v8  ;;  %v3345_v24 = vpop.f32.mrb[228].mxu1  ;;  %v3734_v28 = vpop.f32.mrb[243].mxu0 }
 0x443   :  { %v4268_v18 = vmax.f32 %v4267_v43, %v3345_v24  ;;  %v4338_v49 = vmax.f32 %v4337_v48, %v3734_v28  ;;  %v3347_v0 = vpop.f32.mrb[229].mxu1 }
 0x444   :  { %v4561_v14 = vcombine.low %v4119_v7, %v4140_v12  ;;  %v4289_v53 = vmax.f32 %v4288_v16, %v3347_v0  ;;  %v3349_v10 = vpop.f32.mrb[230].mxu1 }
 0x445   :  { %v4269_v11 = vmax.f32 %v4268_v18, %v3349_v10  ;;  %v3351_v1 = vpop.f32.mrb[231].mxu1 }
 0x446   :  { %v4595_v5 = vrot.slane %v4561_v14, 7  ;;  %v4290_v54 = vmax.f32 %v4289_v53, %v3351_v1 }
 0x447   :  { %v3738_v19 = vpop.f32.mrb[244].mxu0 }
 0x448   :  { %v4596_v25 = vsel %vm4572_vm1, %v4595_v5, %v4557_v47  ;;  %v4318_v33 = vmax.f32 %v4317_v45, %v3738_v19  ;;  %v3740_v3 = vpop.f32.mrb[245].mxu0 }
 0x449   :  { %v7045_v52 = vsel %vm4574_vm2, %v4595_v5, %v4596_v25  ;;  %v4339_v17 = vmax.f32 %v4338_v49, %v3740_v3  ;;  %v3742_v31 = vpop.f32.mrb[246].mxu0 }
 0x44a   :  { %v4319_v4 = vmax.f32 %v4318_v33, %v3742_v31  ;;  %v3355_v32 = vpop.f32.mrb[232].mxu1  ;;  %v3744_v15 = vpop.f32.mrb[247].mxu0 }
 0x44b   :  { %v4270_v58 = vmax.f32 %v4269_v11, %v3355_v32  ;;  %v4340_v38 = vmax.f32 %v4339_v17, %v3744_v15  ;;  %v3357_v23 = vpop.f32.mrb[233].mxu1 }
 0x44c   :  { %v4291_v13 = vmax.f32 %v4290_v54, %v3357_v23  ;;  %v3359_v40 = vpop.f32.mrb[234].mxu1 }
 0x44d   :  { %v4271_v60 = vmax.f32 %v4270_v58, %v3359_v40  ;;  %v3361_v41 = vpop.f32.mrb[235].mxu1 }
 0x44e   :  { %v4292_v26 = vmax.f32 %v4291_v13, %v3361_v41 }
 0x44f   :  { %v3748_v34 = vpop.f32.mrb[248].mxu0 }
 0x450   :  { %v4320_v47 = vmax.f32 %v4319_v4, %v3748_v34  ;;  %v3750_v6 = vpop.f32.mrb[249].mxu0 }
 0x451   :  { %v4341_v44 = vmax.f32 %v4340_v38, %v3750_v6  ;;  %v3752_v62 = vpop.f32.mrb[250].mxu0 }
 0x452   :  { %v4321_v39 = vmax.f32 %v4320_v47, %v3752_v62  ;;  %v3365_v51 = vpop.f32.mrb[236].mxu1  ;;  %v3754_v27 = vpop.f32.mrb[251].mxu0 }
 0x453   :  { %v4272_v37 = vmax.f32 %v4271_v60, %v3365_v51  ;;  %v4342_v29 = vmax.f32 %v4341_v44, %v3754_v27  ;;  %v3367_v36 = vpop.f32.mrb[237].mxu1 }
 0x454   :  { %v4293_v57 = vmax.f32 %v4292_v26, %v3367_v36  ;;  %v3369_v35 = vpop.f32.mrb[238].mxu1 }
 0x455   :  { %v4273_v22 = vmax.f32 %v4272_v37, %v3369_v35  ;;  %v3371_v20 = vpop.f32.mrb[239].mxu1 }
 0x456   :  { %v4294_v56 = vmax.f32 %v4293_v57, %v3371_v20 }
 0x457   :  { %v3758_v2 = vpop.f32.mrb[252].mxu0 }
 0x458   :  { %v4322_v9 = vmax.f32 %v4321_v39, %v3758_v2  ;;  %v3760_v59 = vpop.f32.mrb[253].mxu0 }
 0x459   :  { %v4343_v43 = vmax.f32 %v4342_v29, %v3760_v59  ;;  %v3762_v42 = vpop.f32.mrb[254].mxu0 }
 0x45a   :  { %v4323_v55 = vmax.f32 %v4322_v9, %v3762_v42  ;;  %v3375_v16 = vpop.f32.mrb[240].mxu1  ;;  %v3764_v46 = vpop.f32.mrb[255].mxu0 }
 0x45b   :  { %v4274_v50 = vmax.f32 %v4273_v22, %v3375_v16  ;;  %v4344_v61 = vmax.f32 %v4343_v43, %v3764_v46  ;;  %v3377_v63 = vpop.f32.mrb[241].mxu1 }
 0x45c   :  { %v4324_v30 = vrot.slane %v4323_v55, 4  ;;  %v4295_v7 = vmax.f32 %v4294_v56, %v3377_v63  ;;  %v3379_v48 = vpop.f32.mrb[242].mxu1 }
 0x45d   :  { %v4345_v8 = vrot.slane %v4344_v61, 4  ;;  %v4275_v12 = vmax.f32 %v4274_v50, %v3379_v48  ;;  %v3381_v45 = vpop.f32.mrb[243].mxu1 }
 0x45e   :  { %v4325_v24 = vmax.f32 %v4323_v55, %v4324_v30  ;;  %v4296_v28 = vmax.f32 %v4295_v7, %v3381_v45 }
 0x45f   :  { %v4346_v18 = vmax.f32 %v4344_v61, %v4345_v8  ;;  %v3768_v49 = vpop.f32.mrb[0].mxu0 }
 0x460   :  { %v4326_v0 = vrot.slane %v4325_v24, 2  ;;  %v3770_v14 = vpop.f32.mrb[1].mxu0 }
 0x461   :  { %v4347_v53 = vrot.slane %v4346_v18, 2  ;;  %v3772_v10 = vpop.f32.mrb[2].mxu0 }
 0x462   :  { %v4327_v11 = vmax.f32 %v4325_v24, %v4326_v0  ;;  %v4477_v1 = vmax.f32 %v3768_v49, %v3772_v10  ;;  %v3385_v5 = vpop.f32.mrb[244].mxu1  ;;  %v3774_v54 = vpop.f32.mrb[3].mxu0 }
 0x463   :  { %v4348_v19 = vmax.f32 %v4346_v18, %v4347_v53  ;;  %v4276_v25 = vmax.f32 %v4275_v12, %v3385_v5  ;;  %v4498_v33 = vmax.f32 %v3770_v14, %v3774_v54  ;;  %v3387_v3 = vpop.f32.mrb[245].mxu1 }
 0x464   :  { %v4328_v17 = vrot.slane %v4327_v11, 1  ;;  %v4297_v31 = vmax.f32 %v4296_v28, %v3387_v3  ;;  %v3389_v4 = vpop.f32.mrb[246].mxu1 }
 0x465   :  { %v4349_v32 = vrot.slane %v4348_v19, 1  ;;  %v4277_v15 = vmax.f32 %v4276_v25, %v3389_v4  ;;  %v3391_v58 = vpop.f32.mrb[247].mxu1 }
 0x466   :  { %v4329_v38 = vmax.f32 %v4327_v11, %v4328_v17  ;;  %v4298_v23 = vmax.f32 %v4297_v31, %v3391_v58 }
 0x467   :  { %v4350_v13 = vmax.f32 %v4348_v19, %v4349_v32  ;;  %v3778_v40 = vpop.f32.mrb[4].mxu0 }
 0x468   :  { %v4478_v60 = vmax.f32 %v4477_v1, %v3778_v40  ;;  %v3780_v41 = vpop.f32.mrb[5].mxu0 }
 0x469   :  { %v4566_v26 = vcombine.low %v4329_v38, %v4350_v13  ;;  %v4499_v34 = vmax.f32 %v4498_v33, %v3780_v41  ;;  %v3782_v47 = vpop.f32.mrb[6].mxu0 }
 0x46a   :  { %v4479_v6 = vmax.f32 %v4478_v60, %v3782_v47  ;;  %v3395_v44 = vpop.f32.mrb[248].mxu1  ;;  %v3784_v62 = vpop.f32.mrb[7].mxu0 }
 0x46b   :  { %v4607_v39 = vrot.slane %v4566_v26, 6  ;;  %v4278_v51 = vmax.f32 %v4277_v15, %v3395_v44  ;;  %v4500_v27 = vmax.f32 %v4499_v34, %v3784_v62  ;;  %v3397_v37 = vpop.f32.mrb[249].mxu1 }
 0x46c   :  { %v4299_v29 = vmax.f32 %v4298_v23, %v3397_v37  ;;  %v3399_v36 = vpop.f32.mrb[250].mxu1 }
 0x46d   :  { %v4608_v57 = vsel %vm4577_vm3, %v4607_v39, %v7038_v21  ;;  %v4279_v35 = vmax.f32 %v4278_v51, %v3399_v36  ;;  %v3401_v22 = vpop.f32.mrb[251].mxu1 }
 0x46e   :  { %v7050_v20 = vsel %vm4579_vm4, %v4607_v39, %v4608_v57  ;;  %v4300_v56 = vmax.f32 %v4299_v29, %v3401_v22 }
 0x46f   :  { %v3788_v2 = vpop.f32.mrb[8].mxu0 }
 0x470   :  { %v4480_v9 = vmax.f32 %v4479_v6, %v3788_v2  ;;  %v3790_v59 = vpop.f32.mrb[9].mxu0 }
 0x471   :  { %v4501_v43 = vmax.f32 %v4500_v27, %v3790_v59  ;;  %v3792_v42 = vpop.f32.mrb[10].mxu0 }
 0x472   :  { %v4481_v55 = vmax.f32 %v4480_v9, %v3792_v42  ;;  %v3405_v16 = vpop.f32.mrb[252].mxu1  ;;  %v3794_v46 = vpop.f32.mrb[11].mxu0 }
 0x473   :  { %v4280_v50 = vmax.f32 %v4279_v35, %v3405_v16  ;;  %v4502_v61 = vmax.f32 %v4501_v43, %v3794_v46  ;;  %v3407_v63 = vpop.f32.mrb[253].mxu1 }
 0x474   :  { %v4301_v30 = vmax.f32 %v4300_v56, %v3407_v63  ;;  %v3409_v7 = vpop.f32.mrb[254].mxu1 }
 0x475   :  { %v4281_v21 = vmax.f32 %v4280_v50, %v3409_v7  ;;  %v3411_v48 = vpop.f32.mrb[255].mxu1 }
 0x476   :  { %v4302_v8 = vmax.f32 %v4301_v30, %v3411_v48 }
 0x477   :  { %v4282_v12 = vrot.slane %v4281_v21, 4  ;;  %v3798_v45 = vpop.f32.mrb[12].mxu0 }
 0x478   :  { %v4303_v24 = vrot.slane %v4302_v8, 4  ;;  %v4482_v28 = vmax.f32 %v4481_v55, %v3798_v45  ;;  %v3800_v18 = vpop.f32.mrb[13].mxu0 }
 0x479   :  { %v4283_v49 = vmax.f32 %v4281_v21, %v4282_v12  ;;  %v4503_v0 = vmax.f32 %v4502_v61, %v3800_v18  ;;  %v3802_v14 = vpop.f32.mrb[14].mxu0 }
 0x47a   :  { %v4304_v53 = vmax.f32 %v4302_v8, %v4303_v24  ;;  %v4483_v10 = vmax.f32 %v4482_v28, %v3802_v14  ;;  %v3415_v11 = vpop.f32.mrb[0].mxu1  ;;  %v3804_v1 = vpop.f32.mrb[15].mxu0 }
 0x47b   :  { %v4284_v5 = vrot.slane %v4283_v49, 2  ;;  %v4504_v54 = vmax.f32 %v4503_v0, %v3804_v1  ;;  %v3417_v19 = vpop.f32.mrb[1].mxu1 }
 0x47c   :  { %v4305_v25 = vrot.slane %v4304_v53, 2  ;;  %v3419_v33 = vpop.f32.mrb[2].mxu1 }
 0x47d   :  { %v4285_v3 = vmax.f32 %v4283_v49, %v4284_v5  ;;  %v4435_v17 = vmax.f32 %v3415_v11, %v3419_v33  ;;  %v3421_v31 = vpop.f32.mrb[3].mxu1 }
 0x47e   :  { %v4306_v4 = vmax.f32 %v4304_v53, %v4305_v25  ;;  %v4456_v32 = vmax.f32 %v3417_v19, %v3421_v31 }
 0x47f   :  { %v4286_v15 = vrot.slane %v4285_v3, 1  ;;  %v3808_v58 = vpop.f32.mrb[16].mxu0 }
 0x480   :  { %v4307_v38 = vrot.slane %v4306_v4, 1  ;;  %v4484_v23 = vmax.f32 %v4483_v10, %v3808_v58  ;;  %v3810_v13 = vpop.f32.mrb[17].mxu0 }
 0x481   :  { %v4287_v40 = vmax.f32 %v4285_v3, %v4286_v15  ;;  %v4505_v60 = vmax.f32 %v4504_v54, %v3810_v13  ;;  %v3812_v41 = vpop.f32.mrb[18].mxu0 }
 0x482   :  { %v4308_v26 = vmax.f32 %v4306_v4, %v4307_v38  ;;  %v4485_v34 = vmax.f32 %v4484_v23, %v3812_v41  ;;  %v3425_v47 = vpop.f32.mrb[4].mxu1  ;;  %v3814_v6 = vpop.f32.mrb[19].mxu0 }
 0x483   :  { %v4436_v44 = vmax.f32 %v4435_v17, %v3425_v47  ;;  %v4506_v62 = vmax.f32 %v4505_v60, %v3814_v6  ;;  %v3427_v39 = vpop.f32.mrb[5].mxu1 }
 0x484   :  { %v4565_v51 = vcombine.low %v4287_v40, %v4308_v26  ;;  %v4457_v27 = vmax.f32 %v4456_v32, %v3427_v39  ;;  %v3429_v37 = vpop.f32.mrb[6].mxu1 }
 0x485   :  { %v4437_v29 = vmax.f32 %v4436_v44, %v3429_v37  ;;  %v3431_v36 = vpop.f32.mrb[7].mxu1 }
 0x486   :  { %v4598_v57 = vrot.slane %v4565_v51, 6  ;;  %v4458_v35 = vmax.f32 %v4457_v27, %v3431_v36 }
 0x487   :  { %v3818_v22 = vpop.f32.mrb[20].mxu0 }
 0x488   :  { %v4599_v56 = vsel %vm4577_vm3, %v4598_v57, %v7045_v52  ;;  %v4486_v2 = vmax.f32 %v4485_v34, %v3818_v22  ;;  %v3820_v9 = vpop.f32.mrb[21].mxu0 }
 0x489   :  { %v7055_v59 = vsel %vm4579_vm4, %v4598_v57, %v4599_v56  ;;  %v4507_v43 = vmax.f32 %v4506_v62, %v3820_v9  ;;  %v3822_v42 = vpop.f32.mrb[22].mxu0 }
 0x48a   :  { %v4487_v55 = vmax.f32 %v4486_v2, %v3822_v42  ;;  %v3435_v16 = vpop.f32.mrb[8].mxu1  ;;  %v3824_v46 = vpop.f32.mrb[23].mxu0 }
 0x48b   :  { %v4438_v50 = vmax.f32 %v4437_v29, %v3435_v16  ;;  %v4508_v61 = vmax.f32 %v4507_v43, %v3824_v46  ;;  %v3437_v63 = vpop.f32.mrb[9].mxu1 }
 0x48c   :  { %v4459_v30 = vmax.f32 %v4458_v35, %v3437_v63  ;;  %v3439_v7 = vpop.f32.mrb[10].mxu1 }
 0x48d   :  { %v4439_v21 = vmax.f32 %v4438_v50, %v3439_v7  ;;  %v3441_v48 = vpop.f32.mrb[11].mxu1 }
 0x48e   :  { %v4460_v8 = vmax.f32 %v4459_v30, %v3441_v48 }
 0x48f   :  { %v3828_v12 = vpop.f32.mrb[24].mxu0 }
 0x490   :  { %v4488_v52 = vmax.f32 %v4487_v55, %v3828_v12  ;;  %v3830_v45 = vpop.f32.mrb[25].mxu0 }
 0x491   :  { %v4509_v24 = vmax.f32 %v4508_v61, %v3830_v45  ;;  %v3832_v28 = vpop.f32.mrb[26].mxu0 }
 0x492   :  { %v4489_v18 = vmax.f32 %v4488_v52, %v3832_v28  ;;  %v3445_v49 = vpop.f32.mrb[12].mxu1  ;;  %v3834_v0 = vpop.f32.mrb[27].mxu0 }
 0x493   :  { %v4440_v14 = vmax.f32 %v4439_v21, %v3445_v49  ;;  %v4510_v53 = vmax.f32 %v4509_v24, %v3834_v0  ;;  %v3447_v10 = vpop.f32.mrb[13].mxu1 }
 0x494   :  { %v4461_v11 = vmax.f32 %v4460_v8, %v3447_v10  ;;  %v3449_v1 = vpop.f32.mrb[14].mxu1 }
 0x495   :  { %v4441_v5 = vmax.f32 %v4440_v14, %v3449_v1  ;;  %v3451_v54 = vpop.f32.mrb[15].mxu1 }
 0x496   :  { %v4462_v19 = vmax.f32 %v4461_v11, %v3451_v54 }
 0x497   :  { %v3838_v25 = vpop.f32.mrb[28].mxu0 }
 0x498   :  { %v4490_v33 = vmax.f32 %v4489_v18, %v3838_v25  ;;  %v3840_v3 = vpop.f32.mrb[29].mxu0 }
 0x499   :  { %v4511_v17 = vmax.f32 %v4510_v53, %v3840_v3  ;;  %v3842_v31 = vpop.f32.mrb[30].mxu0 }
 0x49a   :  { %v4491_v4 = vmax.f32 %v4490_v33, %v3842_v31  ;;  %v3455_v32 = vpop.f32.mrb[16].mxu1  ;;  %v3844_v15 = vpop.f32.mrb[31].mxu0 }
 0x49b   :  { %v4442_v58 = vmax.f32 %v4441_v5, %v3455_v32  ;;  %v4512_v38 = vmax.f32 %v4511_v17, %v3844_v15  ;;  %v3457_v23 = vpop.f32.mrb[17].mxu1 }
 0x49c   :  { %v4492_v13 = vrot.slane %v4491_v4, 4  ;;  %v4463_v40 = vmax.f32 %v4462_v19, %v3457_v23  ;;  %v3459_v60 = vpop.f32.mrb[18].mxu1 }
 0x49d   :  { %v4513_v41 = vrot.slane %v4512_v38, 4  ;;  %v4443_v26 = vmax.f32 %v4442_v58, %v3459_v60  ;;  %v3461_v34 = vpop.f32.mrb[19].mxu1 }
 0x49e   :  { %v4493_v47 = vmax.f32 %v4491_v4, %v4492_v13  ;;  %v4464_v6 = vmax.f32 %v4463_v40, %v3461_v34 }
 0x49f   :  { %v4514_v44 = vmax.f32 %v4512_v38, %v4513_v41 }
 0x4a0   :  { %v4494_v62 = vrot.slane %v4493_v47, 2 }
 0x4a1   :  { %v4515_v39 = vrot.slane %v4514_v44, 2 }
 0x4a2   :  { %v4495_v51 = vmax.f32 %v4493_v47, %v4494_v62  ;;  %v3465_v27 = vpop.f32.mrb[20].mxu1 }
 0x4a3   :  { %v4516_v37 = vmax.f32 %v4514_v44, %v4515_v39  ;;  %v4444_v29 = vmax.f32 %v4443_v26, %v3465_v27  ;;  %v3467_v36 = vpop.f32.mrb[21].mxu1 }
 0x4a4   :  { %v4496_v57 = vrot.slane %v4495_v51, 1  ;;  %v4465_v35 = vmax.f32 %v4464_v6, %v3467_v36  ;;  %v3469_v22 = vpop.f32.mrb[22].mxu1 }
 0x4a5   :  { %v4517_v56 = vrot.slane %v4516_v37, 1  ;;  %v4445_v2 = vmax.f32 %v4444_v29, %v3469_v22  ;;  %v3471_v9 = vpop.f32.mrb[23].mxu1 }
 0x4a6   :  { %v4497_v43 = vmax.f32 %v4495_v51, %v4496_v57  ;;  %v4466_v42 = vmax.f32 %v4465_v35, %v3471_v9 }
 0x4a7   :  { %v4518_v55 = vmax.f32 %v4516_v37, %v4517_v56 }
 0x4a9   :  { %v4570_v16 = vcombine.low %v4497_v43, %v4518_v55 }
 0x4aa   :  { %v3475_v46 = vpop.f32.mrb[24].mxu1 }
 0x4ab   :  { %v4610_v50 = vrot.slane %v4570_v16, 5  ;;  %v4446_v61 = vmax.f32 %v4445_v2, %v3475_v46  ;;  %v3477_v63 = vpop.f32.mrb[25].mxu1 }
 0x4ac   :  { %v4467_v30 = vmax.f32 %v4466_v42, %v3477_v63  ;;  %v3479_v7 = vpop.f32.mrb[26].mxu1 }
 0x4ad   :  { %v4611_v21 = vsel %vm4582_vm5, %v4610_v50, %v7050_v20  ;;  %v4447_v48 = vmax.f32 %v4446_v61, %v3479_v7  ;;  %v3481_v8 = vpop.f32.mrb[27].mxu1 }
 0x4ae   :  { %v4612_v12 = vsel %vm4584_vm6, %v4610_v50, %v4611_v21  ;;  %v4468_v52 = vmax.f32 %v4467_v30, %v3481_v8 }
 0x4af   :  { %4620 = vst [vmem:[%s7075_s6 + $0x18] sm:$0xff] %v4612_v12 }
 0x4b2   :  { %v3485_v45 = vpop.f32.mrb[28].mxu1 }
 0x4b3   :  { %v4448_v24 = vmax.f32 %v4447_v48, %v3485_v45  ;;  %v3487_v28 = vpop.f32.mrb[29].mxu1 }
 0x4b4   :  { %v4469_v18 = vmax.f32 %v4468_v52, %v3487_v28  ;;  %v3489_v49 = vpop.f32.mrb[30].mxu1 }
 0x4b5   :  { %v4449_v0 = vmax.f32 %v4448_v24, %v3489_v49  ;;  %v3491_v14 = vpop.f32.mrb[31].mxu1 }
 0x4b6   :  { %v4470_v53 = vmax.f32 %v4469_v18, %v3491_v14 }
 0x4b7   :  { %v4450_v10 = vrot.slane %v4449_v0, 4 }
 0x4b8   :  { %v4471_v11 = vrot.slane %v4470_v53, 4 }
 0x4b9   :  { %v4451_v20 = vmax.f32 %v4449_v0, %v4450_v10 }
 0x4ba   :  { %v4472_v1 = vmax.f32 %v4470_v53, %v4471_v11 }
 0x4bb   :  { %v4452_v5 = vrot.slane %v4451_v20, 2 }
 0x4bc   :  { %v4473_v54 = vrot.slane %v4472_v1, 2 }
 0x4bd   :  { %v4453_v19 = vmax.f32 %v4451_v20, %v4452_v5 }
 0x4be   :  { %v4474_v25 = vmax.f32 %v4472_v1, %v4473_v54 }
 0x4bf   :  { %v4454_v33 = vrot.slane %v4453_v19, 1 }
 0x4c0   :  { %v4475_v3 = vrot.slane %v4474_v25, 1 }
 0x4c1   :  { %v4455_v17 = vmax.f32 %v4453_v19, %v4454_v33 }
 0x4c2   :  { %v4476_v31 = vmax.f32 %v4474_v25, %v4475_v3 }
 0x4c4   :  { %v4569_v4 = vcombine.low %v4455_v17, %v4476_v31 }
 0x4c6   :  { %v4601_v32 = vrot.slane %v4569_v4, 5 }
 0x4c8   :  { %v4602_v15 = vsel %vm4582_vm5, %v4601_v32, %v7055_v59 }
 0x4c9   :  { %v4603_v58 = vsel %vm4584_vm6, %v4601_v32, %v4602_v15 }
 0x4ca   :  { %4619 = vst [vmem:[%s7075_s6 + $0x10] sm:$0xff] %v4603_v58 }
 0x4cb   :  { %4735 = vsyncpa [#allocation3], 1 }
 0x4cc   :  { %4736 = vsyncpa [#allocation5], 1 }

</bundles_post_ra>
